<compile_context>
chip_gen: v6e
topology: v6e:2x2x1
jax: 0.10.0
libtpu: 0.0.40
codegen_flags: <defaults>
</compile_context>

<pallas_src>
import functools

import jax
import jax.numpy as jnp
import numpy as np
from jax.experimental import pallas as pl
from jax.experimental.pallas import tpu as pltpu

# ------------------------- module configuration -----------------------------
OBS_LEN = 2
PRED_LEN = 3
MAP_CHANNEL = 2
ENC_CHANNELS = [8, 16]
DEC_CHANNELS = [16, 8]
IN_CHANNELS = MAP_CHANNEL + 1 + OBS_LEN * 2 + 1   # = 8


# ------------------------------ fused kernel ---------------------------------
def _ynet_kernel(H, W, layout, x_ref, c_ref, o_ref):
    H2, W2, H4, W4 = H // 2, W // 2, H // 4, W // 4

    def cget(name):
        # Static, sublane-aligned carve-out from the single constants buffer.
        r0, h, w = layout[name]
        return c_ref[r0:r0 + h, 0:w]

    # Per-resolution constants, loaded / built exactly ONCE (hoisted out of
    # all conv calls: JAX does not CSE broadcast_in_dim).
    res = {
        (H, W): dict(mL=cget("mL0"), mR=cget("mR0"),
                     ones=jnp.ones((1, H * W), jnp.float32)),
        (H2, W2): dict(mL=cget("mL1"), mR=cget("mR1"),
                       ones=jnp.ones((1, H2 * W2), jnp.float32)),
        (H4, W4): dict(mL=cget("mL2"), mR=cget("mR2"),
                       ones=jnp.ones((1, H4 * W4), jnp.float32)),
    }

    def conv(name, inputs, Hc, Wc, relu):
        """3x3 'same' conv over the channel-concat of `inputs`, done as ONE
        stacked-K MXU matmul.  Weights are (Cout, 9*Cin_total + 1) with the
        bias folded into the last column (matched against a ones row)."""
        HWc = Hc * Wc
        r = res[(Hc, Wc)]
        pieces = []
        for x in inputs:
            cin = x.shape[0]
            zpad = jnp.zeros((cin, Wc + 1), jnp.float32)
            xpad = jnp.concatenate([zpad, x, zpad], axis=1)   # (cin, HWc+2Wc+2)
            for ky in range(3):
                for kx in range(3):
                    dy, dx = ky - 1, kx - 1
                    off = (Wc + 1) + dy * Wc + dx
                    xs = xpad[:, off:off + HWc]               # xs[:,p]=x[:,p+dy*Wc+dx]
                    if dx == 1:
                        xs = xs * r["mR"]                     # zero wrapped cols
                    elif dx == -1:
                        xs = xs * r["mL"]
                    pieces.append(xs)
        pieces.append(r["ones"])                              # bias row
        xstk = jnp.concatenate(pieces, axis=0)                # (9*Cin_tot+1, HWc)
        acc = jnp.dot(cget(name), xstk, preferred_element_type=jnp.float32)
        return jnp.maximum(acc, 0.0) if relu else acc

    def maxpool(x, selname, Hc, Wc):
        """2x2 stride-2 max-pool on a (C, Hc*Wc) activation via shifted max +
        a 0/1 anchor-selection matmul."""
        HWc = Hc * Wc
        cin = x.shape[0]
        xpad = jnp.concatenate([x, jnp.zeros((cin, Wc + 1), x.dtype)], axis=1)
        m = jnp.maximum(jnp.maximum(x, xpad[:, 1:1 + HWc]),
                        jnp.maximum(xpad[:, Wc:Wc + HWc],
                                    xpad[:, Wc + 1:Wc + 1 + HWc]))
        # INVARIANT: non-anchor lanes of `m` may contain row-wrapped garbage;
        # the selection matrix only ever reads even-(row,col) anchors, whose
        # 2x2 neighborhoods never wrap.  Keep the selection matrix that way.
        return jnp.dot(m, cget(selname), preferred_element_type=jnp.float32)

    x = x_ref[0]                                              # (Cin, H*W)

    # ---------------- encoder ----------------
    f0 = conv("enc0", [x], H, W, True)
    p = maxpool(f0, "pool_a", H, W)
    t = conv("enc1a", [p], H2, W2, True)
    f1 = conv("enc1b", [t], H2, W2, True)
    f2 = maxpool(f1, "pool_b", H2, W2)

    # ---------------- decoder ----------------
    y = conv("center0", [f2], H4, W4, True)
    y = conv("center1", [y], H4, W4, True)

    y = jnp.dot(y, cget("ups_a"), preferred_element_type=jnp.float32)  # H/4 -> H/2
    y = conv("up0", [y], H2, W2, False)
    y = conv("dec0a", [y, f1], H2, W2, True)                  # cat([y, f1])
    y = conv("dec0b", [y], H2, W2, True)

    y = jnp.dot(y, cget("ups_b"), preferred_element_type=jnp.float32)  # H/2 -> H
    y = conv("up1", [y], H, W, False)
    y = conv("dec1a", [y, f0], H, W, True)                    # cat([y, f0])
    y = conv("dec1b", [y], H, W, True)

    # 1x1 predictor, bias folded via the ones row.
    out = jnp.dot(cget("pred"),
                  jnp.concatenate([y, res[(H, W)]["ones"]], axis=0),
                  preferred_element_type=jnp.float32)         # (pred_len, H*W)
    o_ref[0] = out.astype(o_ref.dtype)


# ------------------------------ host wrapper ---------------------------------
def make_forward(layout, H, W):
    kern = functools.partial(_ynet_kernel, H, W, layout)

    def forward(cbuf, x_nchw):
        N, C, Hx, Wx = x_nchw.shape
        assert (Hx, Wx) == (H, W)
        HW = H * W
        xf = x_nchw.reshape(N, C, HW)                   # NCHW, spatial flattened
        out = pl.pallas_call(
            kern,
            out_shape=jax.ShapeDtypeStruct((N, PRED_LEN, HW), jnp.float32),
            grid=(N,),                                  # batch over TCs on v7x
            in_specs=[pl.BlockSpec((1, C, HW), lambda n: (n, 0, 0)),
                      # single constants buffer, same block every step -> one DMA
                      pl.BlockSpec(cbuf.shape, lambda n: (0, 0))],
            out_specs=pl.BlockSpec((1, PRED_LEN, HW), lambda n: (n, 0, 0)),
            compiler_params=pltpu.CompilerParams(
                dimension_semantics=("parallel",),
                vmem_limit_bytes=32 * 1024 * 1024),
        )(xf, cbuf)
        return out.reshape(N, PRED_LEN, H, W)

    return forward


# ----------------------- one-time constant preparation -----------------------
def _bilinear_matrix_np(size_in):
    # PyTorch F.interpolate(scale_factor=2, mode='bilinear', align_corners=False)
    size_out = 2 * size_in
    i = np.arange(size_out, dtype=np.float64)
    src = np.maximum((i + 0.5) / 2.0 - 0.5, 0.0)
    x0 = np.floor(src)
    frac = src - x0
    i0 = np.clip(x0.astype(np.int64), 0, size_in - 1)
    i1 = np.clip(x0.astype(np.int64) + 1, 0, size_in - 1)
    M = np.zeros((size_out, size_in), np.float64)
    M[np.arange(size_out), i0] += 1.0 - frac
    M[np.arange(size_out), i1] += frac
    return M


def _upsample_matrix_t(H, W):
    U = np.kron(_bilinear_matrix_np(H), _bilinear_matrix_np(W))   # (4HW, HW)
    return np.ascontiguousarray(U.T).astype(np.float32)           # (HW, 4HW)


def _pool_select_matrix(H, W):
    # One 1 per column at the top-left (even row, even col) anchor of each 2x2
    # block -- the in-kernel max-pool relies on only anchors being selected.
    Hh, Wh = H // 2, W // 2
    S = np.zeros((H * W, Hh * Wh), np.float32)
    for qy in range(Hh):
        for qx in range(Wh):
            S[(2 * qy) * W + 2 * qx, qy * Wh + qx] = 1.0
    return S


def prepare_consts(params, H, W):
    """One-time packing of ALL parameters + structural matrices into a single
    flat (rows, L) f32 buffer (one DMA per pallas_call), plus the static
    layout table  name -> (row_offset, rows, cols)  used for in-kernel carving.
    Row offsets are multiples of 8 so every carve is sublane-aligned."""
    assert H % 4 == 0 and W % 4 == 0

    def pack_conv(name, split=None):
        # (3,3,cin,cout) -> (cout, 9*cin_total + 1) with bias as last column.
        # `split` gives the per-input cin sizes for concat convs so the column
        # order matches the kernel's operand stacking (per-input, tap-major).
        w = np.asarray(params[name + "_w"], np.float32)
        b = np.asarray(params[name + "_b"], np.float32)
        kh, kw, cin, cout = w.shape
        if split is None:
            split = [cin]
        cols, off = [], 0
        for c in split:
            wp = w[:, :, off:off + c, :].reshape(9, c, cout)
            cols.append(np.transpose(wp, (2, 0, 1)).reshape(cout, 9 * c))
            off += c
        cols.append(b.reshape(cout, 1))
        return np.concatenate(cols, axis=1)

    up_out = [ENC_CHANNELS[-1] * 2 // 2, DEC_CHANNELS[0] // 2]    # [16, 8]

    entries = [
        ("enc0", pack_conv("enc0")),
        ("enc1a", pack_conv("enc1a")),
        ("enc1b", pack_conv("enc1b")),
        ("center0", pack_conv("center0")),
        ("center1", pack_conv("center1")),
        ("up0", pack_conv("up0")),
        ("dec0a", pack_conv("dec0a", split=[up_out[0], ENC_CHANNELS[1]])),
        ("dec0b", pack_conv("dec0b")),
        ("up1", pack_conv("up1")),
        ("dec1a", pack_conv("dec1a", split=[up_out[1], ENC_CHANNELS[0]])),
        ("dec1b", pack_conv("dec1b")),
        ("pred", np.concatenate(
            [np.asarray(params["pred_w"], np.float32).T,
             np.asarray(params["pred_b"], np.float32).reshape(-1, 1)], axis=1)),
        ("pool_a", _pool_select_matrix(H, W)),
        ("pool_b", _pool_select_matrix(H // 2, W // 2)),
        ("ups_a", _upsample_matrix_t(H // 4, W // 4)),
        ("ups_b", _upsample_matrix_t(H // 2, W // 2)),
    ]
    # Precomputed column-boundary masks (valid for dx=-1 / dx=+1) per resolution.
    for i, (h, w) in enumerate(((H, W), (H // 2, W // 2), (H // 4, W // 4))):
        col = np.arange(h * w) % w
        entries.append((f"mL{i}", (col >= 1).astype(np.float32)[None, :]))
        entries.append((f"mR{i}", (col <= w - 2).astype(np.float32)[None, :]))

    L = max(a.shape[1] for _, a in entries)
    layout, blocks, r = {}, [], 0
    for name, a in entries:
        h, w = a.shape
        layout[name] = (r, h, w)
        hp = -(-h // 8) * 8                       # pad rows to a multiple of 8
        blk = np.zeros((hp, L), np.float32)
        blk[:h, :w] = a
        blocks.append(blk)
        r += hp
    cbuf = jnp.asarray(np.concatenate(blocks, axis=0))
    return cbuf, layout


# ------------------------------ parameters -----------------------------------
def init_params(key):
    params = {}
    keys = iter(jax.random.split(key, 64))

    def conv_init(name, kh, kw, cin, cout):
        kw_, kb_ = jax.random.split(next(keys))
        fan_in = kh * kw * cin
        params[name + "_w"] = (jax.random.normal(kw_, (kh, kw, cin, cout), jnp.float32)
                               / jnp.sqrt(jnp.float32(fan_in)))
        params[name + "_b"] = 0.01 * jax.random.normal(kb_, (cout,), jnp.float32)

    # ---- encoder ----
    conv_init("enc0", 3, 3, IN_CHANNELS, ENC_CHANNELS[0])
    for i in range(len(ENC_CHANNELS) - 1):
        conv_init(f"enc{i + 1}a", 3, 3, ENC_CHANNELS[i], ENC_CHANNELS[i + 1])
        conv_init(f"enc{i + 1}b", 3, 3, ENC_CHANNELS[i + 1], ENC_CHANNELS[i + 1])

    # ---- decoder ----
    enc_rev = ENC_CHANNELS[::-1]
    center = enc_rev[0]
    conv_init("center0", 3, 3, center, center * 2)
    conv_init("center1", 3, 3, center * 2, center * 2)
    up_in = [center * 2] + DEC_CHANNELS[:-1]
    up_out = [ch // 2 for ch in up_in]
    for i, (ci, co) in enumerate(zip(up_in, up_out)):
        conv_init(f"up{i}", 3, 3, ci, co)
    dec_in = [e + d for e, d in zip(enc_rev, up_out)]
    for i, (ci, co) in enumerate(zip(dec_in, DEC_CHANNELS)):
        conv_init(f"dec{i}a", 3, 3, ci, co)
        conv_init(f"dec{i}b", 3, 3, co, co)
    kw_, kb_ = jax.random.split(next(keys))
    params["pred_w"] = (jax.random.normal(kw_, (DEC_CHANNELS[-1], PRED_LEN), jnp.float32)
                        / jnp.sqrt(jnp.float32(DEC_CHANNELS[-1])))
    params["pred_b"] = 0.01 * jax.random.normal(kb_, (PRED_LEN,), jnp.float32)
    return params


# ------------------------- pure-JAX reference (check) -------------------------
def forward_reference(params, x):
    prec = jax.lax.Precision.HIGHEST

    def conv(xx, w, b, relu):
        y = jax.lax.conv_general_dilated(
            xx, w, window_strides=(1, 1), padding="SAME",
            dimension_numbers=("NCHW", "HWIO", "NCHW"), precision=prec)
        y = y + b[None, :, None, None]
        return jnp.maximum(y, 0.0) if relu else y

    def pool(xx):
        return jax.lax.reduce_window(xx, -jnp.inf, jax.lax.max,
                                     (1, 1, 2, 2), (1, 1, 2, 2), "VALID")

    def upsample(xx):
        H, W = xx.shape[2], xx.shape[3]
        MH = jnp.asarray(_bilinear_matrix_np(H), jnp.float32)
        MW = jnp.asarray(_bilinear_matrix_np(W), jnp.float32)
        return jnp.einsum("ai,bj,ncij->ncab", MH, MW, xx, precision=prec)

    f0 = conv(x, params["enc0_w"], params["enc0_b"], True)
    t = pool(f0)
    t = conv(t, params["enc1a_w"], params["enc1a_b"], True)
    f1 = conv(t, params["enc1b_w"], params["enc1b_b"], True)
    f2 = pool(f1)

    y = conv(f2, params["center0_w"], params["center0_b"], True)
    y = conv(y, params["center1_w"], params["center1_b"], True)

    y = upsample(y)
    y = conv(y, params["up0_w"], params["up0_b"], False)
    y = jnp.concatenate([y, f1], axis=1)
    y = conv(y, params["dec0a_w"], params["dec0a_b"], True)
    y = conv(y, params["dec0b_w"], params["dec0b_b"], True)

    y = upsample(y)
    y = conv(y, params["up1_w"], params["up1_b"], False)
    y = jnp.concatenate([y, f0], axis=1)
    y = conv(y, params["dec1a_w"], params["dec1a_b"], True)
    y = conv(y, params["dec1b_w"], params["dec1b_b"], True)

    y = (jnp.einsum("nchw,cd->ndhw", y, params["pred_w"], precision=prec)
         + params["pred_b"][None, :, None, None])
    return y


# ---------------------------------- main --------------------------------------
if __name__ == "__main__":
    key = jax.random.PRNGKey(0)
    k_param, k_x = jax.random.split(key)
    params = init_params(k_param)

    batch, H, W = 2, 16, 16
    x = jax.random.normal(k_x, (batch, IN_CHANNELS, H, W), jnp.float32)  # NCHW

    cbuf, layout = prepare_consts(params, H, W)       # one-time weight packing
    fwd = jax.jit(make_forward(layout, H, W))

    out = jax.block_until_ready(fwd(cbuf, x))         # (2, PRED_LEN, 16, 16)
    assert out.shape == (batch, PRED_LEN, H, W)

    ref = jax.block_until_ready(jax.jit(forward_reference)(params, x))
    np.testing.assert_allclose(np.asarray(out), np.asarray(ref),
                               rtol=2e-3, atol=2e-3)

    print("KERNEL_OK")
</pallas_src>

<mosaic_0001>
module attributes {stable_mosaic.version = 11 : i64} {
  func.func @_ynet_kernel(%arg0: i32, %arg1: memref<1x8x256xf32, #tpu.memory_space<vmem>>, %arg2: memref<632x289xf32, #tpu.memory_space<vmem>>, %arg3: memref<1x3x256xf32, #tpu.memory_space<vmem>>) attributes {dimension_semantics = [#tpu.dimension_semantics<parallel>], iteration_bounds = array<i64: 2>, scalar_prefetch = 0 : i64, scratch_operands = 0 : i64, tpu.core_type = #tpu.core_type<tc>, window_params = [{transform_indices = @transform_0, window_bounds = array<i64: 1, 8, 256>}, {pipeline_mode = #tpu.pipeline_mode<synchronous>, transform_indices = @transform_1, window_bounds = array<i64: 632, 289>}, {transform_indices = @transform_2, window_bounds = array<i64: 1, 3, 256>}]} {
    %c584 = arith.constant 584 : index
    %c0 = arith.constant 0 : index
    %0 = vector.load %arg2[%c584, %c0] : memref<632x289xf32, #tpu.memory_space<vmem>>, vector<1x256xf32>
    %c592 = arith.constant 592 : index
    %c0_0 = arith.constant 0 : index
    %1 = vector.load %arg2[%c592, %c0_0] : memref<632x289xf32, #tpu.memory_space<vmem>>, vector<1x256xf32>
    %cst = arith.constant 1.000000e+00 : f32
    %2 = vector.broadcast %cst : f32 to vector<1x256xf32>
    %c600 = arith.constant 600 : index
    %c0_1 = arith.constant 0 : index
    %3 = vector.load %arg2[%c600, %c0_1] : memref<632x289xf32, #tpu.memory_space<vmem>>, vector<1x64xf32>
    %c608 = arith.constant 608 : index
    %c0_2 = arith.constant 0 : index
    %4 = vector.load %arg2[%c608, %c0_2] : memref<632x289xf32, #tpu.memory_space<vmem>>, vector<1x64xf32>
    %cst_3 = arith.constant 1.000000e+00 : f32
    %5 = vector.broadcast %cst_3 : f32 to vector<1x64xf32>
    %c616 = arith.constant 616 : index
    %c0_4 = arith.constant 0 : index
    %6 = vector.load %arg2[%c616, %c0_4] : memref<632x289xf32, #tpu.memory_space<vmem>>, vector<1x16xf32>
    %c624 = arith.constant 624 : index
    %c0_5 = arith.constant 0 : index
    %7 = vector.load %arg2[%c624, %c0_5] : memref<632x289xf32, #tpu.memory_space<vmem>>, vector<1x16xf32>
    %cst_6 = arith.constant 1.000000e+00 : f32
    %8 = vector.broadcast %cst_6 : f32 to vector<1x16xf32>
    %c0_7 = arith.constant 0 : index
    %c0_8 = arith.constant 0 : index
    %c0_9 = arith.constant 0 : index
    %9 = vector.load %arg1[%c0_7, %c0_8, %c0_9] : memref<1x8x256xf32, #tpu.memory_space<vmem>>, vector<1x8x256xf32>
    %10 = vector.shape_cast %9 : vector<1x8x256xf32> to vector<8x256xf32>
    %cst_10 = arith.constant 0.000000e+00 : f32
    %11 = vector.broadcast %cst_10 : f32 to vector<8x17xf32>
    %12 = tpu.concatenate %11, %10, %11 in 1 : vector<8x17xf32>, vector<8x256xf32>, vector<8x17xf32> -> vector<8x290xf32>
    %13 = vector.extract_strided_slice %12 {offsets = [0, 0], sizes = [8, 256], strides = [1, 1]} : vector<8x290xf32> to vector<8x256xf32>
    %14 = vector.broadcast %0 : vector<1x256xf32> to vector<8x256xf32>
    %15 = arith.mulf %13, %14 : vector<8x256xf32>
    %16 = vector.extract_strided_slice %12 {offsets = [0, 1], sizes = [8, 256], strides = [1, 1]} : vector<8x290xf32> to vector<8x256xf32>
    %17 = vector.extract_strided_slice %12 {offsets = [0, 2], sizes = [8, 256], strides = [1, 1]} : vector<8x290xf32> to vector<8x256xf32>
    %18 = vector.broadcast %1 : vector<1x256xf32> to vector<8x256xf32>
    %19 = arith.mulf %17, %18 : vector<8x256xf32>
    %20 = vector.extract_strided_slice %12 {offsets = [0, 16], sizes = [8, 256], strides = [1, 1]} : vector<8x290xf32> to vector<8x256xf32>
    %21 = vector.broadcast %0 : vector<1x256xf32> to vector<8x256xf32>
    %22 = arith.mulf %20, %21 : vector<8x256xf32>
    %23 = vector.extract_strided_slice %12 {offsets = [0, 17], sizes = [8, 256], strides = [1, 1]} : vector<8x290xf32> to vector<8x256xf32>
    %24 = vector.extract_strided_slice %12 {offsets = [0, 18], sizes = [8, 256], strides = [1, 1]} : vector<8x290xf32> to vector<8x256xf32>
    %25 = vector.broadcast %1 : vector<1x256xf32> to vector<8x256xf32>
    %26 = arith.mulf %24, %25 : vector<8x256xf32>
    %27 = vector.extract_strided_slice %12 {offsets = [0, 32], sizes = [8, 256], strides = [1, 1]} : vector<8x290xf32> to vector<8x256xf32>
    %28 = vector.broadcast %0 : vector<1x256xf32> to vector<8x256xf32>
    %29 = arith.mulf %27, %28 : vector<8x256xf32>
    %30 = vector.extract_strided_slice %12 {offsets = [0, 33], sizes = [8, 256], strides = [1, 1]} : vector<8x290xf32> to vector<8x256xf32>
    %31 = vector.extract_strided_slice %12 {offsets = [0, 34], sizes = [8, 256], strides = [1, 1]} : vector<8x290xf32> to vector<8x256xf32>
    %32 = vector.broadcast %1 : vector<1x256xf32> to vector<8x256xf32>
    %33 = arith.mulf %31, %32 : vector<8x256xf32>
    %34 = tpu.concatenate %15, %16, %19, %22, %23, %26, %29, %30, %33, %2 in 0 : vector<8x256xf32>, vector<8x256xf32>, vector<8x256xf32>, vector<8x256xf32>, vector<8x256xf32>, vector<8x256xf32>, vector<8x256xf32>, vector<8x256xf32>, vector<8x256xf32>, vector<1x256xf32> -> vector<73x256xf32>
    %c0_11 = arith.constant 0 : index
    %c0_12 = arith.constant 0 : index
    %35 = vector.load %arg2[%c0_11, %c0_12] : memref<632x289xf32, #tpu.memory_space<vmem>>, vector<8x73xf32>
    %cst_13 = arith.constant dense<0.000000e+00> : vector<8x256xf32>
    %36 = tpu.matmul %35, %34, %cst_13 {dimension_numbers = #tpu.dot_dimension_numbers<[1], [0], [0], [1], [0, 0, 1, 1], [], []>} : vector<8x73xf32>, vector<73x256xf32>, vector<8x256xf32> -> vector<8x256xf32>
    %cst_14 = arith.constant 0.000000e+00 : f32
    %37 = vector.broadcast %cst_14 : f32 to vector<8x256xf32>
    %38 = arith.maximumf %36, %37 : vector<8x256xf32>
    %cst_15 = arith.constant 0.000000e+00 : f32
    %39 = vector.broadcast %cst_15 : f32 to vector<8x17xf32>
    %40 = tpu.concatenate %38, %39 in 1 : vector<8x256xf32>, vector<8x17xf32> -> vector<8x273xf32>
    %41 = vector.extract_strided_slice %40 {offsets = [0, 1], sizes = [8, 256], strides = [1, 1]} : vector<8x273xf32> to vector<8x256xf32>
    %42 = arith.maximumf %38, %41 : vector<8x256xf32>
    %43 = vector.extract_strided_slice %40 {offsets = [0, 16], sizes = [8, 256], strides = [1, 1]} : vector<8x273xf32> to vector<8x256xf32>
    %44 = vector.extract_strided_slice %40 {offsets = [0, 17], sizes = [8, 256], strides = [1, 1]} : vector<8x273xf32> to vector<8x256xf32>
    %45 = arith.maximumf %43, %44 : vector<8x256xf32>
    %46 = arith.maximumf %42, %45 : vector<8x256xf32>
    %c184 = arith.constant 184 : index
    %c0_16 = arith.constant 0 : index
    %47 = vector.load %arg2[%c184, %c0_16] : memref<632x289xf32, #tpu.memory_space<vmem>>, vector<256x64xf32>
    %cst_17 = arith.constant dense<0.000000e+00> : vector<8x64xf32>
    %48 = tpu.matmul %46, %47, %cst_17 {dimension_numbers = #tpu.dot_dimension_numbers<[1], [0], [0], [1], [0, 0, 1, 1], [], []>} : vector<8x256xf32>, vector<256x64xf32>, vector<8x64xf32> -> vector<8x64xf32>
    %cst_18 = arith.constant 0.000000e+00 : f32
    %49 = vector.broadcast %cst_18 : f32 to vector<8x9xf32>
    %50 = tpu.concatenate %49, %48, %49 in 1 : vector<8x9xf32>, vector<8x64xf32>, vector<8x9xf32> -> vector<8x82xf32>
    %51 = vector.extract_strided_slice %50 {offsets = [0, 0], sizes = [8, 64], strides = [1, 1]} : vector<8x82xf32> to vector<8x64xf32>
    %52 = vector.broadcast %3 : vector<1x64xf32> to vector<8x64xf32>
    %53 = arith.mulf %51, %52 : vector<8x64xf32>
    %54 = vector.extract_strided_slice %50 {offsets = [0, 1], sizes = [8, 64], strides = [1, 1]} : vector<8x82xf32> to vector<8x64xf32>
    %55 = vector.extract_strided_slice %50 {offsets = [0, 2], sizes = [8, 64], strides = [1, 1]} : vector<8x82xf32> to vector<8x64xf32>
    %56 = vector.broadcast %4 : vector<1x64xf32> to vector<8x64xf32>
    %57 = arith.mulf %55, %56 : vector<8x64xf32>
    %58 = vector.extract_strided_slice %50 {offsets = [0, 8], sizes = [8, 64], strides = [1, 1]} : vector<8x82xf32> to vector<8x64xf32>
    %59 = vector.broadcast %3 : vector<1x64xf32> to vector<8x64xf32>
    %60 = arith.mulf %58, %59 : vector<8x64xf32>
    %61 = vector.extract_strided_slice %50 {offsets = [0, 9], sizes = [8, 64], strides = [1, 1]} : vector<8x82xf32> to vector<8x64xf32>
    %62 = vector.extract_strided_slice %50 {offsets = [0, 10], sizes = [8, 64], strides = [1, 1]} : vector<8x82xf32> to vector<8x64xf32>
    %63 = vector.broadcast %4 : vector<1x64xf32> to vector<8x64xf32>
    %64 = arith.mulf %62, %63 : vector<8x64xf32>
    %65 = vector.extract_strided_slice %50 {offsets = [0, 16], sizes = [8, 64], strides = [1, 1]} : vector<8x82xf32> to vector<8x64xf32>
    %66 = vector.broadcast %3 : vector<1x64xf32> to vector<8x64xf32>
    %67 = arith.mulf %65, %66 : vector<8x64xf32>
    %68 = vector.extract_strided_slice %50 {offsets = [0, 17], sizes = [8, 64], strides = [1, 1]} : vector<8x82xf32> to vector<8x64xf32>
    %69 = vector.extract_strided_slice %50 {offsets = [0, 18], sizes = [8, 64], strides = [1, 1]} : vector<8x82xf32> to vector<8x64xf32>
    %70 = vector.broadcast %4 : vector<1x64xf32> to vector<8x64xf32>
    %71 = arith.mulf %69, %70 : vector<8x64xf32>
    %72 = tpu.concatenate %53, %54, %57, %60, %61, %64, %67, %68, %71, %5 in 0 : vector<8x64xf32>, vector<8x64xf32>, vector<8x64xf32>, vector<8x64xf32>, vector<8x64xf32>, vector<8x64xf32>, vector<8x64xf32>, vector<8x64xf32>, vector<8x64xf32>, vector<1x64xf32> -> vector<73x64xf32>
    %c8 = arith.constant 8 : index
    %c0_19 = arith.constant 0 : index
    %73 = vector.load %arg2[%c8, %c0_19] : memref<632x289xf32, #tpu.memory_space<vmem>>, vector<16x73xf32>
    %cst_20 = arith.constant dense<0.000000e+00> : vector<16x64xf32>
    %74 = tpu.matmul %73, %72, %cst_20 {dimension_numbers = #tpu.dot_dimension_numbers<[1], [0], [0], [1], [0, 0, 1, 1], [], []>} : vector<16x73xf32>, vector<73x64xf32>, vector<16x64xf32> -> vector<16x64xf32>
    %cst_21 = arith.constant 0.000000e+00 : f32
    %75 = vector.broadcast %cst_21 : f32 to vector<16x64xf32>
    %76 = arith.maximumf %74, %75 : vector<16x64xf32>
    %cst_22 = arith.constant 0.000000e+00 : f32
    %77 = vector.broadcast %cst_22 : f32 to vector<16x9xf32>
    %78 = tpu.concatenate %77, %76, %77 in 1 : vector<16x9xf32>, vector<16x64xf32>, vector<16x9xf32> -> vector<16x82xf32>
    %79 = vector.extract_strided_slice %78 {offsets = [0, 0], sizes = [16, 64], strides = [1, 1]} : vector<16x82xf32> to vector<16x64xf32>
    %80 = vector.broadcast %3 : vector<1x64xf32> to vector<16x64xf32>
    %81 = arith.mulf %79, %80 : vector<16x64xf32>
    %82 = vector.extract_strided_slice %78 {offsets = [0, 1], sizes = [16, 64], strides = [1, 1]} : vector<16x82xf32> to vector<16x64xf32>
    %83 = vector.extract_strided_slice %78 {offsets = [0, 2], sizes = [16, 64], strides = [1, 1]} : vector<16x82xf32> to vector<16x64xf32>
    %84 = vector.broadcast %4 : vector<1x64xf32> to vector<16x64xf32>
    %85 = arith.mulf %83, %84 : vector<16x64xf32>
    %86 = vector.extract_strided_slice %78 {offsets = [0, 8], sizes = [16, 64], strides = [1, 1]} : vector<16x82xf32> to vector<16x64xf32>
    %87 = vector.broadcast %3 : vector<1x64xf32> to vector<16x64xf32>
    %88 = arith.mulf %86, %87 : vector<16x64xf32>
    %89 = vector.extract_strided_slice %78 {offsets = [0, 9], sizes = [16, 64], strides = [1, 1]} : vector<16x82xf32> to vector<16x64xf32>
    %90 = vector.extract_strided_slice %78 {offsets = [0, 10], sizes = [16, 64], strides = [1, 1]} : vector<16x82xf32> to vector<16x64xf32>
    %91 = vector.broadcast %4 : vector<1x64xf32> to vector<16x64xf32>
    %92 = arith.mulf %90, %91 : vector<16x64xf32>
    %93 = vector.extract_strided_slice %78 {offsets = [0, 16], sizes = [16, 64], strides = [1, 1]} : vector<16x82xf32> to vector<16x64xf32>
    %94 = vector.broadcast %3 : vector<1x64xf32> to vector<16x64xf32>
    %95 = arith.mulf %93, %94 : vector<16x64xf32>
    %96 = vector.extract_strided_slice %78 {offsets = [0, 17], sizes = [16, 64], strides = [1, 1]} : vector<16x82xf32> to vector<16x64xf32>
    %97 = vector.extract_strided_slice %78 {offsets = [0, 18], sizes = [16, 64], strides = [1, 1]} : vector<16x82xf32> to vector<16x64xf32>
    %98 = vector.broadcast %4 : vector<1x64xf32> to vector<16x64xf32>
    %99 = arith.mulf %97, %98 : vector<16x64xf32>
    %100 = tpu.concatenate %81, %82, %85, %88, %89, %92, %95, %96, %99, %5 in 0 : vector<16x64xf32>, vector<16x64xf32>, vector<16x64xf32>, vector<16x64xf32>, vector<16x64xf32>, vector<16x64xf32>, vector<16x64xf32>, vector<16x64xf32>, vector<16x64xf32>, vector<1x64xf32> -> vector<145x64xf32>
    %c24 = arith.constant 24 : index
    %c0_23 = arith.constant 0 : index
    %101 = vector.load %arg2[%c24, %c0_23] : memref<632x289xf32, #tpu.memory_space<vmem>>, vector<16x145xf32>
    %cst_24 = arith.constant dense<0.000000e+00> : vector<16x64xf32>
    %102 = tpu.matmul %101, %100, %cst_24 {dimension_numbers = #tpu.dot_dimension_numbers<[1], [0], [0], [1], [0, 0, 1, 1], [], []>} : vector<16x145xf32>, vector<145x64xf32>, vector<16x64xf32> -> vector<16x64xf32>
    %cst_25 = arith.constant 0.000000e+00 : f32
    %103 = vector.broadcast %cst_25 : f32 to vector<16x64xf32>
    %104 = arith.maximumf %102, %103 : vector<16x64xf32>
    %cst_26 = arith.constant 0.000000e+00 : f32
    %105 = vector.broadcast %cst_26 : f32 to vector<16x9xf32>
    %106 = tpu.concatenate %104, %105 in 1 : vector<16x64xf32>, vector<16x9xf32> -> vector<16x73xf32>
    %107 = vector.extract_strided_slice %106 {offsets = [0, 1], sizes = [16, 64], strides = [1, 1]} : vector<16x73xf32> to vector<16x64xf32>
    %108 = arith.maximumf %104, %107 : vector<16x64xf32>
    %109 = vector.extract_strided_slice %106 {offsets = [0, 8], sizes = [16, 64], strides = [1, 1]} : vector<16x73xf32> to vector<16x64xf32>
    %110 = vector.extract_strided_slice %106 {offsets = [0, 9], sizes = [16, 64], strides = [1, 1]} : vector<16x73xf32> to vector<16x64xf32>
    %111 = arith.maximumf %109, %110 : vector<16x64xf32>
    %112 = arith.maximumf %108, %111 : vector<16x64xf32>
    %c440 = arith.constant 440 : index
    %c0_27 = arith.constant 0 : index
    %113 = vector.load %arg2[%c440, %c0_27] : memref<632x289xf32, #tpu.memory_space<vmem>>, vector<64x16xf32>
    %cst_28 = arith.constant dense<0.000000e+00> : vector<16x16xf32>
    %114 = tpu.matmul %112, %113, %cst_28 {dimension_numbers = #tpu.dot_dimension_numbers<[1], [0], [0], [1], [0, 0, 1, 1], [], []>} : vector<16x64xf32>, vector<64x16xf32>, vector<16x16xf32> -> vector<16x16xf32>
    %cst_29 = arith.constant 0.000000e+00 : f32
    %115 = vector.broadcast %cst_29 : f32 to vector<16x5xf32>
    %116 = tpu.concatenate %115, %114, %115 in 1 : vector<16x5xf32>, vector<16x16xf32>, vector<16x5xf32> -> vector<16x26xf32>
    %117 = vector.extract_strided_slice %116 {offsets = [0, 0], sizes = [16, 16], strides = [1, 1]} : vector<16x26xf32> to vector<16x16xf32>
    %118 = vector.broadcast %6 : vector<1x16xf32> to vector<16x16xf32>
    %119 = arith.mulf %117, %118 : vector<16x16xf32>
    %120 = vector.extract_strided_slice %116 {offsets = [0, 1], sizes = [16, 16], strides = [1, 1]} : vector<16x26xf32> to vector<16x16xf32>
    %121 = vector.extract_strided_slice %116 {offsets = [0, 2], sizes = [16, 16], strides = [1, 1]} : vector<16x26xf32> to vector<16x16xf32>
    %122 = vector.broadcast %7 : vector<1x16xf32> to vector<16x16xf32>
    %123 = arith.mulf %121, %122 : vector<16x16xf32>
    %124 = vector.extract_strided_slice %116 {offsets = [0, 4], sizes = [16, 16], strides = [1, 1]} : vector<16x26xf32> to vector<16x16xf32>
    %125 = vector.broadcast %6 : vector<1x16xf32> to vector<16x16xf32>
    %126 = arith.mulf %124, %125 : vector<16x16xf32>
    %127 = vector.extract_strided_slice %116 {offsets = [0, 5], sizes = [16, 16], strides = [1, 1]} : vector<16x26xf32> to vector<16x16xf32>
    %128 = vector.extract_strided_slice %116 {offsets = [0, 6], sizes = [16, 16], strides = [1, 1]} : vector<16x26xf32> to vector<16x16xf32>
    %129 = vector.broadcast %7 : vector<1x16xf32> to vector<16x16xf32>
    %130 = arith.mulf %128, %129 : vector<16x16xf32>
    %131 = vector.extract_strided_slice %116 {offsets = [0, 8], sizes = [16, 16], strides = [1, 1]} : vector<16x26xf32> to vector<16x16xf32>
    %132 = vector.broadcast %6 : vector<1x16xf32> to vector<16x16xf32>
    %133 = arith.mulf %131, %132 : vector<16x16xf32>
    %134 = vector.extract_strided_slice %116 {offsets = [0, 9], sizes = [16, 16], strides = [1, 1]} : vector<16x26xf32> to vector<16x16xf32>
    %135 = vector.extract_strided_slice %116 {offsets = [0, 10], sizes = [16, 16], strides = [1, 1]} : vector<16x26xf32> to vector<16x16xf32>
    %136 = vector.broadcast %7 : vector<1x16xf32> to vector<16x16xf32>
    %137 = arith.mulf %135, %136 : vector<16x16xf32>
    %138 = tpu.concatenate %119, %120, %123, %126, %127, %130, %133, %134, %137, %8 in 0 : vector<16x16xf32>, vector<16x16xf32>, vector<16x16xf32>, vector<16x16xf32>, vector<16x16xf32>, vector<16x16xf32>, vector<16x16xf32>, vector<16x16xf32>, vector<16x16xf32>, vector<1x16xf32> -> vector<145x16xf32>
    %c40 = arith.constant 40 : index
    %c0_30 = arith.constant 0 : index
    %139 = vector.load %arg2[%c40, %c0_30] : memref<632x289xf32, #tpu.memory_space<vmem>>, vector<32x145xf32>
    %cst_31 = arith.constant dense<0.000000e+00> : vector<32x16xf32>
    %140 = tpu.matmul %139, %138, %cst_31 {dimension_numbers = #tpu.dot_dimension_numbers<[1], [0], [0], [1], [0, 0, 1, 1], [], []>} : vector<32x145xf32>, vector<145x16xf32>, vector<32x16xf32> -> vector<32x16xf32>
    %cst_32 = arith.constant 0.000000e+00 : f32
    %141 = vector.broadcast %cst_32 : f32 to vector<32x16xf32>
    %142 = arith.maximumf %140, %141 : vector<32x16xf32>
    %cst_33 = arith.constant 0.000000e+00 : f32
    %143 = vector.broadcast %cst_33 : f32 to vector<32x5xf32>
    %144 = tpu.concatenate %143, %142, %143 in 1 : vector<32x5xf32>, vector<32x16xf32>, vector<32x5xf32> -> vector<32x26xf32>
    %145 = vector.extract_strided_slice %144 {offsets = [0, 0], sizes = [32, 16], strides = [1, 1]} : vector<32x26xf32> to vector<32x16xf32>
    %146 = vector.broadcast %6 : vector<1x16xf32> to vector<32x16xf32>
    %147 = arith.mulf %145, %146 : vector<32x16xf32>
    %148 = vector.extract_strided_slice %144 {offsets = [0, 1], sizes = [32, 16], strides = [1, 1]} : vector<32x26xf32> to vector<32x16xf32>
    %149 = vector.extract_strided_slice %144 {offsets = [0, 2], sizes = [32, 16], strides = [1, 1]} : vector<32x26xf32> to vector<32x16xf32>
    %150 = vector.broadcast %7 : vector<1x16xf32> to vector<32x16xf32>
    %151 = arith.mulf %149, %150 : vector<32x16xf32>
    %152 = vector.extract_strided_slice %144 {offsets = [0, 4], sizes = [32, 16], strides = [1, 1]} : vector<32x26xf32> to vector<32x16xf32>
    %153 = vector.broadcast %6 : vector<1x16xf32> to vector<32x16xf32>
    %154 = arith.mulf %152, %153 : vector<32x16xf32>
    %155 = vector.extract_strided_slice %144 {offsets = [0, 5], sizes = [32, 16], strides = [1, 1]} : vector<32x26xf32> to vector<32x16xf32>
    %156 = vector.extract_strided_slice %144 {offsets = [0, 6], sizes = [32, 16], strides = [1, 1]} : vector<32x26xf32> to vector<32x16xf32>
    %157 = vector.broadcast %7 : vector<1x16xf32> to vector<32x16xf32>
    %158 = arith.mulf %156, %157 : vector<32x16xf32>
    %159 = vector.extract_strided_slice %144 {offsets = [0, 8], sizes = [32, 16], strides = [1, 1]} : vector<32x26xf32> to vector<32x16xf32>
    %160 = vector.broadcast %6 : vector<1x16xf32> to vector<32x16xf32>
    %161 = arith.mulf %159, %160 : vector<32x16xf32>
    %162 = vector.extract_strided_slice %144 {offsets = [0, 9], sizes = [32, 16], strides = [1, 1]} : vector<32x26xf32> to vector<32x16xf32>
    %163 = vector.extract_strided_slice %144 {offsets = [0, 10], sizes = [32, 16], strides = [1, 1]} : vector<32x26xf32> to vector<32x16xf32>
    %164 = vector.broadcast %7 : vector<1x16xf32> to vector<32x16xf32>
    %165 = arith.mulf %163, %164 : vector<32x16xf32>
    %166 = tpu.concatenate %147, %148, %151, %154, %155, %158, %161, %162, %165, %8 in 0 : vector<32x16xf32>, vector<32x16xf32>, vector<32x16xf32>, vector<32x16xf32>, vector<32x16xf32>, vector<32x16xf32>, vector<32x16xf32>, vector<32x16xf32>, vector<32x16xf32>, vector<1x16xf32> -> vector<289x16xf32>
    %c72 = arith.constant 72 : index
    %c0_34 = arith.constant 0 : index
    %167 = vector.load %arg2[%c72, %c0_34] : memref<632x289xf32, #tpu.memory_space<vmem>>, vector<32x289xf32>
    %cst_35 = arith.constant dense<0.000000e+00> : vector<32x16xf32>
    %168 = tpu.matmul %167, %166, %cst_35 {dimension_numbers = #tpu.dot_dimension_numbers<[1], [0], [0], [1], [0, 0, 1, 1], [], []>} : vector<32x289xf32>, vector<289x16xf32>, vector<32x16xf32> -> vector<32x16xf32>
    %cst_36 = arith.constant 0.000000e+00 : f32
    %169 = vector.broadcast %cst_36 : f32 to vector<32x16xf32>
    %170 = arith.maximumf %168, %169 : vector<32x16xf32>
    %c504 = arith.constant 504 : index
    %c0_37 = arith.constant 0 : index
    %171 = vector.load %arg2[%c504, %c0_37] : memref<632x289xf32, #tpu.memory_space<vmem>>, vector<16x64xf32>
    %cst_38 = arith.constant dense<0.000000e+00> : vector<32x64xf32>
    %172 = tpu.matmul %170, %171, %cst_38 {dimension_numbers = #tpu.dot_dimension_numbers<[1], [0], [0], [1], [0, 0, 1, 1], [], []>} : vector<32x16xf32>, vector<16x64xf32>, vector<32x64xf32> -> vector<32x64xf32>
    %cst_39 = arith.constant 0.000000e+00 : f32
    %173 = vector.broadcast %cst_39 : f32 to vector<32x9xf32>
    %174 = tpu.concatenate %173, %172, %173 in 1 : vector<32x9xf32>, vector<32x64xf32>, vector<32x9xf32> -> vector<32x82xf32>
    %175 = vector.extract_strided_slice %174 {offsets = [0, 0], sizes = [32, 64], strides = [1, 1]} : vector<32x82xf32> to vector<32x64xf32>
    %176 = vector.broadcast %3 : vector<1x64xf32> to vector<32x64xf32>
    %177 = arith.mulf %175, %176 : vector<32x64xf32>
    %178 = vector.extract_strided_slice %174 {offsets = [0, 1], sizes = [32, 64], strides = [1, 1]} : vector<32x82xf32> to vector<32x64xf32>
    %179 = vector.extract_strided_slice %174 {offsets = [0, 2], sizes = [32, 64], strides = [1, 1]} : vector<32x82xf32> to vector<32x64xf32>
    %180 = vector.broadcast %4 : vector<1x64xf32> to vector<32x64xf32>
    %181 = arith.mulf %179, %180 : vector<32x64xf32>
    %182 = vector.extract_strided_slice %174 {offsets = [0, 8], sizes = [32, 64], strides = [1, 1]} : vector<32x82xf32> to vector<32x64xf32>
    %183 = vector.broadcast %3 : vector<1x64xf32> to vector<32x64xf32>
    %184 = arith.mulf %182, %183 : vector<32x64xf32>
    %185 = vector.extract_strided_slice %174 {offsets = [0, 9], sizes = [32, 64], strides = [1, 1]} : vector<32x82xf32> to vector<32x64xf32>
    %186 = vector.extract_strided_slice %174 {offsets = [0, 10], sizes = [32, 64], strides = [1, 1]} : vector<32x82xf32> to vector<32x64xf32>
    %187 = vector.broadcast %4 : vector<1x64xf32> to vector<32x64xf32>
    %188 = arith.mulf %186, %187 : vector<32x64xf32>
    %189 = vector.extract_strided_slice %174 {offsets = [0, 16], sizes = [32, 64], strides = [1, 1]} : vector<32x82xf32> to vector<32x64xf32>
    %190 = vector.broadcast %3 : vector<1x64xf32> to vector<32x64xf32>
    %191 = arith.mulf %189, %190 : vector<32x64xf32>
    %192 = vector.extract_strided_slice %174 {offsets = [0, 17], sizes = [32, 64], strides = [1, 1]} : vector<32x82xf32> to vector<32x64xf32>
    %193 = vector.extract_strided_slice %174 {offsets = [0, 18], sizes = [32, 64], strides = [1, 1]} : vector<32x82xf32> to vector<32x64xf32>
    %194 = vector.broadcast %4 : vector<1x64xf32> to vector<32x64xf32>
    %195 = arith.mulf %193, %194 : vector<32x64xf32>
    %196 = tpu.concatenate %177, %178, %181, %184, %185, %188, %191, %192, %195, %5 in 0 : vector<32x64xf32>, vector<32x64xf32>, vector<32x64xf32>, vector<32x64xf32>, vector<32x64xf32>, vector<32x64xf32>, vector<32x64xf32>, vector<32x64xf32>, vector<32x64xf32>, vector<1x64xf32> -> vector<289x64xf32>
    %c104 = arith.constant 104 : index
    %c0_40 = arith.constant 0 : index
    %197 = vector.load %arg2[%c104, %c0_40] : memref<632x289xf32, #tpu.memory_space<vmem>>, vector<16x289xf32>
    %cst_41 = arith.constant dense<0.000000e+00> : vector<16x64xf32>
    %198 = tpu.matmul %197, %196, %cst_41 {dimension_numbers = #tpu.dot_dimension_numbers<[1], [0], [0], [1], [0, 0, 1, 1], [], []>} : vector<16x289xf32>, vector<289x64xf32>, vector<16x64xf32> -> vector<16x64xf32>
    %cst_42 = arith.constant 0.000000e+00 : f32
    %199 = vector.broadcast %cst_42 : f32 to vector<16x9xf32>
    %200 = tpu.concatenate %199, %198, %199 in 1 : vector<16x9xf32>, vector<16x64xf32>, vector<16x9xf32> -> vector<16x82xf32>
    %201 = vector.extract_strided_slice %200 {offsets = [0, 0], sizes = [16, 64], strides = [1, 1]} : vector<16x82xf32> to vector<16x64xf32>
    %202 = vector.broadcast %3 : vector<1x64xf32> to vector<16x64xf32>
    %203 = arith.mulf %201, %202 : vector<16x64xf32>
    %204 = vector.extract_strided_slice %200 {offsets = [0, 1], sizes = [16, 64], strides = [1, 1]} : vector<16x82xf32> to vector<16x64xf32>
    %205 = vector.extract_strided_slice %200 {offsets = [0, 2], sizes = [16, 64], strides = [1, 1]} : vector<16x82xf32> to vector<16x64xf32>
    %206 = vector.broadcast %4 : vector<1x64xf32> to vector<16x64xf32>
    %207 = arith.mulf %205, %206 : vector<16x64xf32>
    %208 = vector.extract_strided_slice %200 {offsets = [0, 8], sizes = [16, 64], strides = [1, 1]} : vector<16x82xf32> to vector<16x64xf32>
    %209 = vector.broadcast %3 : vector<1x64xf32> to vector<16x64xf32>
    %210 = arith.mulf %208, %209 : vector<16x64xf32>
    %211 = vector.extract_strided_slice %200 {offsets = [0, 9], sizes = [16, 64], strides = [1, 1]} : vector<16x82xf32> to vector<16x64xf32>
    %212 = vector.extract_strided_slice %200 {offsets = [0, 10], sizes = [16, 64], strides = [1, 1]} : vector<16x82xf32> to vector<16x64xf32>
    %213 = vector.broadcast %4 : vector<1x64xf32> to vector<16x64xf32>
    %214 = arith.mulf %212, %213 : vector<16x64xf32>
    %215 = vector.extract_strided_slice %200 {offsets = [0, 16], sizes = [16, 64], strides = [1, 1]} : vector<16x82xf32> to vector<16x64xf32>
    %216 = vector.broadcast %3 : vector<1x64xf32> to vector<16x64xf32>
    %217 = arith.mulf %215, %216 : vector<16x64xf32>
    %218 = vector.extract_strided_slice %200 {offsets = [0, 17], sizes = [16, 64], strides = [1, 1]} : vector<16x82xf32> to vector<16x64xf32>
    %219 = vector.extract_strided_slice %200 {offsets = [0, 18], sizes = [16, 64], strides = [1, 1]} : vector<16x82xf32> to vector<16x64xf32>
    %220 = vector.broadcast %4 : vector<1x64xf32> to vector<16x64xf32>
    %221 = arith.mulf %219, %220 : vector<16x64xf32>
    %cst_43 = arith.constant 0.000000e+00 : f32
    %222 = vector.broadcast %cst_43 : f32 to vector<16x9xf32>
    %223 = tpu.concatenate %222, %104, %222 in 1 : vector<16x9xf32>, vector<16x64xf32>, vector<16x9xf32> -> vector<16x82xf32>
    %224 = vector.extract_strided_slice %223 {offsets = [0, 0], sizes = [16, 64], strides = [1, 1]} : vector<16x82xf32> to vector<16x64xf32>
    %225 = vector.broadcast %3 : vector<1x64xf32> to vector<16x64xf32>
    %226 = arith.mulf %224, %225 : vector<16x64xf32>
    %227 = vector.extract_strided_slice %223 {offsets = [0, 1], sizes = [16, 64], strides = [1, 1]} : vector<16x82xf32> to vector<16x64xf32>
    %228 = vector.extract_strided_slice %223 {offsets = [0, 2], sizes = [16, 64], strides = [1, 1]} : vector<16x82xf32> to vector<16x64xf32>
    %229 = vector.broadcast %4 : vector<1x64xf32> to vector<16x64xf32>
    %230 = arith.mulf %228, %229 : vector<16x64xf32>
    %231 = vector.extract_strided_slice %223 {offsets = [0, 8], sizes = [16, 64], strides = [1, 1]} : vector<16x82xf32> to vector<16x64xf32>
    %232 = vector.broadcast %3 : vector<1x64xf32> to vector<16x64xf32>
    %233 = arith.mulf %231, %232 : vector<16x64xf32>
    %234 = vector.extract_strided_slice %223 {offsets = [0, 9], sizes = [16, 64], strides = [1, 1]} : vector<16x82xf32> to vector<16x64xf32>
    %235 = vector.extract_strided_slice %223 {offsets = [0, 10], sizes = [16, 64], strides = [1, 1]} : vector<16x82xf32> to vector<16x64xf32>
    %236 = vector.broadcast %4 : vector<1x64xf32> to vector<16x64xf32>
    %237 = arith.mulf %235, %236 : vector<16x64xf32>
    %238 = vector.extract_strided_slice %223 {offsets = [0, 16], sizes = [16, 64], strides = [1, 1]} : vector<16x82xf32> to vector<16x64xf32>
    %239 = vector.broadcast %3 : vector<1x64xf32> to vector<16x64xf32>
    %240 = arith.mulf %238, %239 : vector<16x64xf32>
    %241 = vector.extract_strided_slice %223 {offsets = [0, 17], sizes = [16, 64], strides = [1, 1]} : vector<16x82xf32> to vector<16x64xf32>
    %242 = vector.extract_strided_slice %223 {offsets = [0, 18], sizes = [16, 64], strides = [1, 1]} : vector<16x82xf32> to vector<16x64xf32>
    %243 = vector.broadcast %4 : vector<1x64xf32> to vector<16x64xf32>
    %244 = arith.mulf %242, %243 : vector<16x64xf32>
    %245 = tpu.concatenate %203, %204, %207, %210, %211, %214, %217, %218, %221, %226, %227, %230, %233, %234, %237, %240 in 0 : vector<16x64xf32>, vector<16x64xf32>, vector<16x64xf32>, vector<16x64xf32>, vector<16x64xf32>, vector<16x64xf32>, vector<16x64xf32>, vector<16x64xf32>, vector<16x64xf32>, vector<16x64xf32>, vector<16x64xf32>, vector<16x64xf32>, vector<16x64xf32>, vector<16x64xf32>, vector<16x64xf32>, vector<16x64xf32> -> vector<256x64xf32>
    %246 = tpu.concatenate %241, %244, %5 in 0 : vector<16x64xf32>, vector<16x64xf32>, vector<1x64xf32> -> vector<33x64xf32>
    %247 = tpu.concatenate %245, %246 in 0 : vector<256x64xf32>, vector<33x64xf32> -> vector<289x64xf32>
    %c120 = arith.constant 120 : index
    %c0_44 = arith.constant 0 : index
    %248 = vector.load %arg2[%c120, %c0_44] : memref<632x289xf32, #tpu.memory_space<vmem>>, vector<16x289xf32>
    %cst_45 = arith.constant dense<0.000000e+00> : vector<16x64xf32>
    %249 = tpu.matmul %248, %247, %cst_45 {dimension_numbers = #tpu.dot_dimension_numbers<[1], [0], [0], [1], [0, 0, 1, 1], [], []>} : vector<16x289xf32>, vector<289x64xf32>, vector<16x64xf32> -> vector<16x64xf32>
    %cst_46 = arith.constant 0.000000e+00 : f32
    %250 = vector.broadcast %cst_46 : f32 to vector<16x64xf32>
    %251 = arith.maximumf %249, %250 : vector<16x64xf32>
    %cst_47 = arith.constant 0.000000e+00 : f32
    %252 = vector.broadcast %cst_47 : f32 to vector<16x9xf32>
    %253 = tpu.concatenate %252, %251, %252 in 1 : vector<16x9xf32>, vector<16x64xf32>, vector<16x9xf32> -> vector<16x82xf32>
    %254 = vector.extract_strided_slice %253 {offsets = [0, 0], sizes = [16, 64], strides = [1, 1]} : vector<16x82xf32> to vector<16x64xf32>
    %255 = vector.broadcast %3 : vector<1x64xf32> to vector<16x64xf32>
    %256 = arith.mulf %254, %255 : vector<16x64xf32>
    %257 = vector.extract_strided_slice %253 {offsets = [0, 1], sizes = [16, 64], strides = [1, 1]} : vector<16x82xf32> to vector<16x64xf32>
    %258 = vector.extract_strided_slice %253 {offsets = [0, 2], sizes = [16, 64], strides = [1, 1]} : vector<16x82xf32> to vector<16x64xf32>
    %259 = vector.broadcast %4 : vector<1x64xf32> to vector<16x64xf32>
    %260 = arith.mulf %258, %259 : vector<16x64xf32>
    %261 = vector.extract_strided_slice %253 {offsets = [0, 8], sizes = [16, 64], strides = [1, 1]} : vector<16x82xf32> to vector<16x64xf32>
    %262 = vector.broadcast %3 : vector<1x64xf32> to vector<16x64xf32>
    %263 = arith.mulf %261, %262 : vector<16x64xf32>
    %264 = vector.extract_strided_slice %253 {offsets = [0, 9], sizes = [16, 64], strides = [1, 1]} : vector<16x82xf32> to vector<16x64xf32>
    %265 = vector.extract_strided_slice %253 {offsets = [0, 10], sizes = [16, 64], strides = [1, 1]} : vector<16x82xf32> to vector<16x64xf32>
    %266 = vector.broadcast %4 : vector<1x64xf32> to vector<16x64xf32>
    %267 = arith.mulf %265, %266 : vector<16x64xf32>
    %268 = vector.extract_strided_slice %253 {offsets = [0, 16], sizes = [16, 64], strides = [1, 1]} : vector<16x82xf32> to vector<16x64xf32>
    %269 = vector.broadcast %3 : vector<1x64xf32> to vector<16x64xf32>
    %270 = arith.mulf %268, %269 : vector<16x64xf32>
    %271 = vector.extract_strided_slice %253 {offsets = [0, 17], sizes = [16, 64], strides = [1, 1]} : vector<16x82xf32> to vector<16x64xf32>
    %272 = vector.extract_strided_slice %253 {offsets = [0, 18], sizes = [16, 64], strides = [1, 1]} : vector<16x82xf32> to vector<16x64xf32>
    %273 = vector.broadcast %4 : vector<1x64xf32> to vector<16x64xf32>
    %274 = arith.mulf %272, %273 : vector<16x64xf32>
    %275 = tpu.concatenate %256, %257, %260, %263, %264, %267, %270, %271, %274, %5 in 0 : vector<16x64xf32>, vector<16x64xf32>, vector<16x64xf32>, vector<16x64xf32>, vector<16x64xf32>, vector<16x64xf32>, vector<16x64xf32>, vector<16x64xf32>, vector<16x64xf32>, vector<1x64xf32> -> vector<145x64xf32>
    %c136 = arith.constant 136 : index
    %c0_48 = arith.constant 0 : index
    %276 = vector.load %arg2[%c136, %c0_48] : memref<632x289xf32, #tpu.memory_space<vmem>>, vector<16x145xf32>
    %cst_49 = arith.constant dense<0.000000e+00> : vector<16x64xf32>
    %277 = tpu.matmul %276, %275, %cst_49 {dimension_numbers = #tpu.dot_dimension_numbers<[1], [0], [0], [1], [0, 0, 1, 1], [], []>} : vector<16x145xf32>, vector<145x64xf32>, vector<16x64xf32> -> vector<16x64xf32>
    %cst_50 = arith.constant 0.000000e+00 : f32
    %278 = vector.broadcast %cst_50 : f32 to vector<16x64xf32>
    %279 = arith.maximumf %277, %278 : vector<16x64xf32>
    %c520 = arith.constant 520 : index
    %c0_51 = arith.constant 0 : index
    %280 = vector.load %arg2[%c520, %c0_51] : memref<632x289xf32, #tpu.memory_space<vmem>>, vector<64x256xf32>
    %cst_52 = arith.constant dense<0.000000e+00> : vector<16x256xf32>
    %281 = tpu.matmul %279, %280, %cst_52 {dimension_numbers = #tpu.dot_dimension_numbers<[1], [0], [0], [1], [0, 0, 1, 1], [], []>} : vector<16x64xf32>, vector<64x256xf32>, vector<16x256xf32> -> vector<16x256xf32>
    %cst_53 = arith.constant 0.000000e+00 : f32
    %282 = vector.broadcast %cst_53 : f32 to vector<16x17xf32>
    %283 = tpu.concatenate %282, %281, %282 in 1 : vector<16x17xf32>, vector<16x256xf32>, vector<16x17xf32> -> vector<16x290xf32>
    %284 = vector.extract_strided_slice %283 {offsets = [0, 0], sizes = [16, 256], strides = [1, 1]} : vector<16x290xf32> to vector<16x256xf32>
    %285 = vector.broadcast %0 : vector<1x256xf32> to vector<16x256xf32>
    %286 = arith.mulf %284, %285 : vector<16x256xf32>
    %287 = vector.extract_strided_slice %283 {offsets = [0, 1], sizes = [16, 256], strides = [1, 1]} : vector<16x290xf32> to vector<16x256xf32>
    %288 = vector.extract_strided_slice %283 {offsets = [0, 2], sizes = [16, 256], strides = [1, 1]} : vector<16x290xf32> to vector<16x256xf32>
    %289 = vector.broadcast %1 : vector<1x256xf32> to vector<16x256xf32>
    %290 = arith.mulf %288, %289 : vector<16x256xf32>
    %291 = vector.extract_strided_slice %283 {offsets = [0, 16], sizes = [16, 256], strides = [1, 1]} : vector<16x290xf32> to vector<16x256xf32>
    %292 = vector.broadcast %0 : vector<1x256xf32> to vector<16x256xf32>
    %293 = arith.mulf %291, %292 : vector<16x256xf32>
    %294 = vector.extract_strided_slice %283 {offsets = [0, 17], sizes = [16, 256], strides = [1, 1]} : vector<16x290xf32> to vector<16x256xf32>
    %295 = vector.extract_strided_slice %283 {offsets = [0, 18], sizes = [16, 256], strides = [1, 1]} : vector<16x290xf32> to vector<16x256xf32>
    %296 = vector.broadcast %1 : vector<1x256xf32> to vector<16x256xf32>
    %297 = arith.mulf %295, %296 : vector<16x256xf32>
    %298 = vector.extract_strided_slice %283 {offsets = [0, 32], sizes = [16, 256], strides = [1, 1]} : vector<16x290xf32> to vector<16x256xf32>
    %299 = vector.broadcast %0 : vector<1x256xf32> to vector<16x256xf32>
    %300 = arith.mulf %298, %299 : vector<16x256xf32>
    %301 = vector.extract_strided_slice %283 {offsets = [0, 33], sizes = [16, 256], strides = [1, 1]} : vector<16x290xf32> to vector<16x256xf32>
    %302 = vector.extract_strided_slice %283 {offsets = [0, 34], sizes = [16, 256], strides = [1, 1]} : vector<16x290xf32> to vector<16x256xf32>
    %303 = vector.broadcast %1 : vector<1x256xf32> to vector<16x256xf32>
    %304 = arith.mulf %302, %303 : vector<16x256xf32>
    %305 = tpu.concatenate %286, %287, %290, %293, %294, %297, %300, %301, %304, %2 in 0 : vector<16x256xf32>, vector<16x256xf32>, vector<16x256xf32>, vector<16x256xf32>, vector<16x256xf32>, vector<16x256xf32>, vector<16x256xf32>, vector<16x256xf32>, vector<16x256xf32>, vector<1x256xf32> -> vector<145x256xf32>
    %c152 = arith.constant 152 : index
    %c0_54 = arith.constant 0 : index
    %306 = vector.load %arg2[%c152, %c0_54] : memref<632x289xf32, #tpu.memory_space<vmem>>, vector<8x145xf32>
    %cst_55 = arith.constant dense<0.000000e+00> : vector<8x256xf32>
    %307 = tpu.matmul %306, %305, %cst_55 {dimension_numbers = #tpu.dot_dimension_numbers<[1], [0], [0], [1], [0, 0, 1, 1], [], []>} : vector<8x145xf32>, vector<145x256xf32>, vector<8x256xf32> -> vector<8x256xf32>
    %cst_56 = arith.constant 0.000000e+00 : f32
    %308 = vector.broadcast %cst_56 : f32 to vector<8x17xf32>
    %309 = tpu.concatenate %308, %307, %308 in 1 : vector<8x17xf32>, vector<8x256xf32>, vector<8x17xf32> -> vector<8x290xf32>
    %310 = vector.extract_strided_slice %309 {offsets = [0, 0], sizes = [8, 256], strides = [1, 1]} : vector<8x290xf32> to vector<8x256xf32>
    %311 = vector.broadcast %0 : vector<1x256xf32> to vector<8x256xf32>
    %312 = arith.mulf %310, %311 : vector<8x256xf32>
    %313 = vector.extract_strided_slice %309 {offsets = [0, 1], sizes = [8, 256], strides = [1, 1]} : vector<8x290xf32> to vector<8x256xf32>
    %314 = vector.extract_strided_slice %309 {offsets = [0, 2], sizes = [8, 256], strides = [1, 1]} : vector<8x290xf32> to vector<8x256xf32>
    %315 = vector.broadcast %1 : vector<1x256xf32> to vector<8x256xf32>
    %316 = arith.mulf %314, %315 : vector<8x256xf32>
    %317 = vector.extract_strided_slice %309 {offsets = [0, 16], sizes = [8, 256], strides = [1, 1]} : vector<8x290xf32> to vector<8x256xf32>
    %318 = vector.broadcast %0 : vector<1x256xf32> to vector<8x256xf32>
    %319 = arith.mulf %317, %318 : vector<8x256xf32>
    %320 = vector.extract_strided_slice %309 {offsets = [0, 17], sizes = [8, 256], strides = [1, 1]} : vector<8x290xf32> to vector<8x256xf32>
    %321 = vector.extract_strided_slice %309 {offsets = [0, 18], sizes = [8, 256], strides = [1, 1]} : vector<8x290xf32> to vector<8x256xf32>
    %322 = vector.broadcast %1 : vector<1x256xf32> to vector<8x256xf32>
    %323 = arith.mulf %321, %322 : vector<8x256xf32>
    %324 = vector.extract_strided_slice %309 {offsets = [0, 32], sizes = [8, 256], strides = [1, 1]} : vector<8x290xf32> to vector<8x256xf32>
    %325 = vector.broadcast %0 : vector<1x256xf32> to vector<8x256xf32>
    %326 = arith.mulf %324, %325 : vector<8x256xf32>
    %327 = vector.extract_strided_slice %309 {offsets = [0, 33], sizes = [8, 256], strides = [1, 1]} : vector<8x290xf32> to vector<8x256xf32>
    %328 = vector.extract_strided_slice %309 {offsets = [0, 34], sizes = [8, 256], strides = [1, 1]} : vector<8x290xf32> to vector<8x256xf32>
    %329 = vector.broadcast %1 : vector<1x256xf32> to vector<8x256xf32>
    %330 = arith.mulf %328, %329 : vector<8x256xf32>
    %cst_57 = arith.constant 0.000000e+00 : f32
    %331 = vector.broadcast %cst_57 : f32 to vector<8x17xf32>
    %332 = tpu.concatenate %331, %38, %331 in 1 : vector<8x17xf32>, vector<8x256xf32>, vector<8x17xf32> -> vector<8x290xf32>
    %333 = vector.extract_strided_slice %332 {offsets = [0, 0], sizes = [8, 256], strides = [1, 1]} : vector<8x290xf32> to vector<8x256xf32>
    %334 = vector.broadcast %0 : vector<1x256xf32> to vector<8x256xf32>
    %335 = arith.mulf %333, %334 : vector<8x256xf32>
    %336 = vector.extract_strided_slice %332 {offsets = [0, 1], sizes = [8, 256], strides = [1, 1]} : vector<8x290xf32> to vector<8x256xf32>
    %337 = vector.extract_strided_slice %332 {offsets = [0, 2], sizes = [8, 256], strides = [1, 1]} : vector<8x290xf32> to vector<8x256xf32>
    %338 = vector.broadcast %1 : vector<1x256xf32> to vector<8x256xf32>
    %339 = arith.mulf %337, %338 : vector<8x256xf32>
    %340 = vector.extract_strided_slice %332 {offsets = [0, 16], sizes = [8, 256], strides = [1, 1]} : vector<8x290xf32> to vector<8x256xf32>
    %341 = vector.broadcast %0 : vector<1x256xf32> to vector<8x256xf32>
    %342 = arith.mulf %340, %341 : vector<8x256xf32>
    %343 = vector.extract_strided_slice %332 {offsets = [0, 17], sizes = [8, 256], strides = [1, 1]} : vector<8x290xf32> to vector<8x256xf32>
    %344 = vector.extract_strided_slice %332 {offsets = [0, 18], sizes = [8, 256], strides = [1, 1]} : vector<8x290xf32> to vector<8x256xf32>
    %345 = vector.broadcast %1 : vector<1x256xf32> to vector<8x256xf32>
    %346 = arith.mulf %344, %345 : vector<8x256xf32>
    %347 = vector.extract_strided_slice %332 {offsets = [0, 32], sizes = [8, 256], strides = [1, 1]} : vector<8x290xf32> to vector<8x256xf32>
    %348 = vector.broadcast %0 : vector<1x256xf32> to vector<8x256xf32>
    %349 = arith.mulf %347, %348 : vector<8x256xf32>
    %350 = vector.extract_strided_slice %332 {offsets = [0, 33], sizes = [8, 256], strides = [1, 1]} : vector<8x290xf32> to vector<8x256xf32>
    %351 = vector.extract_strided_slice %332 {offsets = [0, 34], sizes = [8, 256], strides = [1, 1]} : vector<8x290xf32> to vector<8x256xf32>
    %352 = vector.broadcast %1 : vector<1x256xf32> to vector<8x256xf32>
    %353 = arith.mulf %351, %352 : vector<8x256xf32>
    %354 = tpu.concatenate %312, %313, %316, %319, %320, %323, %326, %327, %330, %335, %336, %339, %342, %343, %346, %349 in 0 : vector<8x256xf32>, vector<8x256xf32>, vector<8x256xf32>, vector<8x256xf32>, vector<8x256xf32>, vector<8x256xf32>, vector<8x256xf32>, vector<8x256xf32>, vector<8x256xf32>, vector<8x256xf32>, vector<8x256xf32>, vector<8x256xf32>, vector<8x256xf32>, vector<8x256xf32>, vector<8x256xf32>, vector<8x256xf32> -> vector<128x256xf32>
    %355 = tpu.concatenate %350, %353, %2 in 0 : vector<8x256xf32>, vector<8x256xf32>, vector<1x256xf32> -> vector<17x256xf32>
    %356 = tpu.concatenate %354, %355 in 0 : vector<128x256xf32>, vector<17x256xf32> -> vector<145x256xf32>
    %c160 = arith.constant 160 : index
    %c0_58 = arith.constant 0 : index
    %357 = vector.load %arg2[%c160, %c0_58] : memref<632x289xf32, #tpu.memory_space<vmem>>, vector<8x145xf32>
    %cst_59 = arith.constant dense<0.000000e+00> : vector<8x256xf32>
    %358 = tpu.matmul %357, %356, %cst_59 {dimension_numbers = #tpu.dot_dimension_numbers<[1], [0], [0], [1], [0, 0, 1, 1], [], []>} : vector<8x145xf32>, vector<145x256xf32>, vector<8x256xf32> -> vector<8x256xf32>
    %cst_60 = arith.constant 0.000000e+00 : f32
    %359 = vector.broadcast %cst_60 : f32 to vector<8x256xf32>
    %360 = arith.maximumf %358, %359 : vector<8x256xf32>
    %cst_61 = arith.constant 0.000000e+00 : f32
    %361 = vector.broadcast %cst_61 : f32 to vector<8x17xf32>
    %362 = tpu.concatenate %361, %360, %361 in 1 : vector<8x17xf32>, vector<8x256xf32>, vector<8x17xf32> -> vector<8x290xf32>
    %363 = vector.extract_strided_slice %362 {offsets = [0, 0], sizes = [8, 256], strides = [1, 1]} : vector<8x290xf32> to vector<8x256xf32>
    %364 = vector.broadcast %0 : vector<1x256xf32> to vector<8x256xf32>
    %365 = arith.mulf %363, %364 : vector<8x256xf32>
    %366 = vector.extract_strided_slice %362 {offsets = [0, 1], sizes = [8, 256], strides = [1, 1]} : vector<8x290xf32> to vector<8x256xf32>
    %367 = vector.extract_strided_slice %362 {offsets = [0, 2], sizes = [8, 256], strides = [1, 1]} : vector<8x290xf32> to vector<8x256xf32>
    %368 = vector.broadcast %1 : vector<1x256xf32> to vector<8x256xf32>
    %369 = arith.mulf %367, %368 : vector<8x256xf32>
    %370 = vector.extract_strided_slice %362 {offsets = [0, 16], sizes = [8, 256], strides = [1, 1]} : vector<8x290xf32> to vector<8x256xf32>
    %371 = vector.broadcast %0 : vector<1x256xf32> to vector<8x256xf32>
    %372 = arith.mulf %370, %371 : vector<8x256xf32>
    %373 = vector.extract_strided_slice %362 {offsets = [0, 17], sizes = [8, 256], strides = [1, 1]} : vector<8x290xf32> to vector<8x256xf32>
    %374 = vector.extract_strided_slice %362 {offsets = [0, 18], sizes = [8, 256], strides = [1, 1]} : vector<8x290xf32> to vector<8x256xf32>
    %375 = vector.broadcast %1 : vector<1x256xf32> to vector<8x256xf32>
    %376 = arith.mulf %374, %375 : vector<8x256xf32>
    %377 = vector.extract_strided_slice %362 {offsets = [0, 32], sizes = [8, 256], strides = [1, 1]} : vector<8x290xf32> to vector<8x256xf32>
    %378 = vector.broadcast %0 : vector<1x256xf32> to vector<8x256xf32>
    %379 = arith.mulf %377, %378 : vector<8x256xf32>
    %380 = vector.extract_strided_slice %362 {offsets = [0, 33], sizes = [8, 256], strides = [1, 1]} : vector<8x290xf32> to vector<8x256xf32>
    %381 = vector.extract_strided_slice %362 {offsets = [0, 34], sizes = [8, 256], strides = [1, 1]} : vector<8x290xf32> to vector<8x256xf32>
    %382 = vector.broadcast %1 : vector<1x256xf32> to vector<8x256xf32>
    %383 = arith.mulf %381, %382 : vector<8x256xf32>
    %384 = tpu.concatenate %365, %366, %369, %372, %373, %376, %379, %380, %383, %2 in 0 : vector<8x256xf32>, vector<8x256xf32>, vector<8x256xf32>, vector<8x256xf32>, vector<8x256xf32>, vector<8x256xf32>, vector<8x256xf32>, vector<8x256xf32>, vector<8x256xf32>, vector<1x256xf32> -> vector<73x256xf32>
    %c168 = arith.constant 168 : index
    %c0_62 = arith.constant 0 : index
    %385 = vector.load %arg2[%c168, %c0_62] : memref<632x289xf32, #tpu.memory_space<vmem>>, vector<8x73xf32>
    %cst_63 = arith.constant dense<0.000000e+00> : vector<8x256xf32>
    %386 = tpu.matmul %385, %384, %cst_63 {dimension_numbers = #tpu.dot_dimension_numbers<[1], [0], [0], [1], [0, 0, 1, 1], [], []>} : vector<8x73xf32>, vector<73x256xf32>, vector<8x256xf32> -> vector<8x256xf32>
    %cst_64 = arith.constant 0.000000e+00 : f32
    %387 = vector.broadcast %cst_64 : f32 to vector<8x256xf32>
    %388 = arith.maximumf %386, %387 : vector<8x256xf32>
    %c176 = arith.constant 176 : index
    %c0_65 = arith.constant 0 : index
    %389 = vector.load %arg2[%c176, %c0_65] : memref<632x289xf32, #tpu.memory_space<vmem>>, vector<3x9xf32>
    %390 = tpu.concatenate %388, %2 in 0 : vector<8x256xf32>, vector<1x256xf32> -> vector<9x256xf32>
    %cst_66 = arith.constant dense<0.000000e+00> : vector<3x256xf32>
    %391 = tpu.matmul %389, %390, %cst_66 {dimension_numbers = #tpu.dot_dimension_numbers<[1], [0], [0], [1], [0, 0, 1, 1], [], []>} : vector<3x9xf32>, vector<9x256xf32>, vector<3x256xf32> -> vector<3x256xf32>
    %c0_67 = arith.constant 0 : index
    %c0_68 = arith.constant 0 : index
    %c0_69 = arith.constant 0 : index
    %392 = vector.load %arg3[%c0_67, %c0_68, %c0_69] : memref<1x3x256xf32, #tpu.memory_space<vmem>>, vector<1x3x256xf32>
    %393 = vector.shape_cast %392 : vector<1x3x256xf32> to vector<3x256xf32>
    %394 = vector.shape_cast %391 : vector<3x256xf32> to vector<1x3x256xf32>
    tpu.vector_store %arg3[%c0_67, %c0_68, %c0_69], %394 {strides = array<i32>} : memref<1x3x256xf32, #tpu.memory_space<vmem>>, vector<1x3x256xf32>,
    return
  }
  func.func @transform_0(%arg0: i32) -> (i32, i32, i32) {
    %c0_i32 = arith.constant 0 : i32
    %c0_i32_0 = arith.constant 0 : i32
    %c0_i32_1 = arith.constant 0 : i32
    return %arg0, %c0_i32, %c0_i32_0 : i32, i32, i32
  }
  func.func @transform_1(%arg0: i32) -> (i32, i32) {
    %c0_i32 = arith.constant 0 : i32
    %c0_i32_0 = arith.constant 0 : i32
    %c0_i32_1 = arith.constant 0 : i32
    return %c0_i32, %c0_i32_0 : i32, i32
  }
  func.func @transform_2(%arg0: i32) -> (i32, i32, i32) {
    %c0_i32 = arith.constant 0 : i32
    %c0_i32_0 = arith.constant 0 : i32
    %c0_i32_1 = arith.constant 0 : i32
    return %arg0, %c0_i32, %c0_i32_0 : i32, i32, i32
  }
}

</mosaic_0001>

<bundles_post_ra>
// kernel: forward.1
= control target key start
LH: loop header
LB: loop body
LE: loop exit
PB: predicated region body
PF: predicated region fallthrough
CT: control target
= control target key end

     0   :  { %s4085_s9 = smov 0   ;;  %s5810_s0 = inlined_call_operand.vmem [shape: f32[2,8,256], index: 0, kind: input, shape index: {}]   ;;  %s5811_s1 = inlined_call_operand.vmem [shape: f32[632,289], index: 1, kind: input, shape index: {}]   ;;  %s5812_s2 = inlined_call_operand.vmem [shape: f32[2,3,256], index: 2, kind: output, shape index: {}]  }
   0x1 LB: > { %s3624_s10 = sadd.s32 4294967295, %s4040_s9   ;;  %p3628_p0 = scmp.ge.s32.totalorder %s4040_s9, 1  ;;  %s4040_s9 = sphi %s4085_s9, %s12_s9  }
   0x2   : > { %p112_p1 = scmp.lt.s32.totalorder %s4040_s9, 3 }
   0x4   : > { %p113_p2 = pnand %p3628_p0, %p112_p1 }
   0x5   : > { %p134_p3 = scmp.lt.s32.totalorder (!%p113_p2), %s3624_s10, 1  ;;  %s4042_s17 = smov (!%p113_p2), 17  }
   0x6   : > { %116 = sbr.rel (%p113_p2) target bundleno = 6781 (0x1a7d), region = 28  ;;  %s4043_s18 = smov (!%p113_p2), 34  }
   0x7   : > { %s4044_s21 = smov (!%p113_p2), 32   ;;  %s4045_s22 = smov (!%p113_p2), 18  }
   0x8   : > { %s4046_s23 = smov (!%p113_p2), 16   ;;  %s4047_s24 = smov (!%p113_p2), 2  }
   0x9   : > { %s4048_s25 = smov (!%p113_p2), 95   ;;  %s4049_s26 = smov (!%p113_p2), 111  }
   0xa   : > { %s4051_s27 = smov (!%p113_p2), 94   ;;  %s4052_s28 = smov (!%p113_p2), 96  }
   0xb   : > { %v168_v0 = vlaneseq  ;;  %s5814_s10 = smov (!%p134_p3, %s3624_s10), 1  ;;  %v3634_v2 = vld [vmem:[%s5811_s1 + $0x6f0] ss:$8 sm:$0x3]  ;;  %vm160_vm0 = vcmask 138240   ;;  %vm359_vm1 = vcmask 1040384  }
   0xc   : > { %s3685_s13 = sshll.u32 %s5814_s10, 4  ;;  %v3633_v7 = vld [vmem:[%s5811_s1 + $0x6d8] ss:$8 sm:$0x3]  ;;  %v4050_v24 = vmov 1.0   ;;  %s4053_s29 = smov 110  }
   0xd   : > { %v169_v1 = vshrl.u32 %v168_v0, 7  ;;  %s138_s16 = scalar_lea.vmem %s5810_s0, %s3685_s13  ;;  %3635 = vmatprep.subr.msk.mxu0 %vm359_vm1, %v4050_v24  ;;  %vm241_vm2 = vcmask 277504   ;;  %s4054_s30 = smov 112   ;;  %vm229_vm3 = vcmask 261120   ;;  %vm217_vm4 = vcmask 146432  }
   0xe   : > { %v152_v5 = vld [vmem:[%s138_s16] sm:$0xff]  ;;  %v153_v8 = vld [vmem:[%s138_s16 + $0x8] sm:$0xff]  ;;  %3636 = vmatpush1.msk.msra.mxu0 %vm359_vm1, %v4050_v24  ;;  %s4055_s3 = smov 126   ;;  %vm205_vm5 = vcmask 130048   ;;  %vm193_vm6 = vcmask 15360   ;;  %v4056_v47 = vmov 0.0  }
   0xf   : > { %v170_v3 = vsub.s32 0, %v169_v1  ;;  %v174_v4 = vsub.s32 1, %v169_v1  ;;  %156 = vrot.lane.b32.xlu0 %v152_v5, %s4042_s17  ;;  %427 = vmatprep.mubr.f32.mxu0 %v4056_v47  ;;  %s4057_s4 = smov 127   ;;  %vm349_vm7 = vcmask 769024   ;;  %vm335_vm8 = vcmask 777216   ;;  %s4058_s20 = smov 10  }
  0x10   : > { %vm324_vm9 = vcmask 785408   ;;  %vm310_vm10 = vcmask 900096   ;;  %vm296_vm11 = vcmask 908288   ;;  %vm285_vm12 = vcmask 916480   ;;  %s4060_s6 = smov 8   ;;  %s4062_s11 = smov 120  }
  0x11   : > { %v184_v6 = vrot.slane %v3634_v2, %v170_v3  ;;  %v188_v9 = vrot.slane %v3634_v2, %v174_v4  ;;  %v4106_v10 = vrot.slane %v3633_v7, %v170_v3  ;;  %v4109_v11 = vrot.slane %v3633_v7, %v174_v4  ;;  %s4063_s12 = smov 119   ;;  %s4065_s14 = smov 6  }
  0x12   : > { %vm271_vm13 = vcmask 1031168   ;;  %vm257_vm14 = vcmask 1039360   ;;  %vm355_vm15 = vcmask 596992   ;;  %s4066_s15 = smov 4  }
  0x13   : > { %237 = vrot.lane.b32.xlu1 %v184_v6, %s4043_s18  ;;  %158 = vrot.lane.b32.xlu0 %v153_v8, %s4042_s17 }
  0x17   : > { %239 = vrot.lane.b32.xlu1 %v188_v9, %s4043_s18  ;;  %225 = vrot.lane.b32.xlu0 %v4106_v10, %s4044_s21 }
  0x1b   : > { %227 = vrot.lane.b32.xlu1 %v4109_v11, %s4044_s21  ;;  %213 = vrot.lane.b32.xlu0 %v184_v6, %s4045_s22  ;;  %s4064_s21 = smov 5  }
  0x1f   : > { %215 = vrot.lane.b32.xlu1 %v188_v9, %s4045_s22  ;;  %201 = vrot.lane.b32.xlu0 %v4106_v10, %s4046_s23 }
  0x23   : > { %203 = vrot.lane.b32.xlu1 %v4109_v11, %s4046_s23  ;;  %189 = vrot.lane.b32.xlu0 %v184_v6, %s4047_s24 }
  0x27   : > { %191 = vrot.lane.b32.xlu1 %v188_v9, %s4047_s24 }
  0x81   : > { %v157_v12 = vpop.permute.xlu0 %156 }
  0x82   : > { %v4136_v18 = vsel %vm160_vm0, 0.0, %v157_v12 }
  0x85   : > { %v4121_v13 = vpop.permute.xlu1 %237  ;;  %v159_v14 = vpop.permute.xlu0 %158 }
  0x86   : > { %v4124_v15 = vsel %vm160_vm0, %v157_v12, %v159_v14  ;;  %v4127_v16 = vsel %vm160_vm0, %v159_v14, 0.0  ;;  %v246_v21 = vmul.f32 %v4121_v13, %v4136_v18 }
  0x87   : > { %333 = vrot.lane.b32.xlu0 %v4127_v16, %s4048_s25  ;;  %331 = vrot.lane.b32.xlu1 %v4124_v15, %s4048_s25 }
  0x89   : > { %v4129_v17 = vpop.permute.xlu1 %239  ;;  %v4144_v20 = vpop.permute.xlu0 %225 }
  0x8a   : > { %v248_v22 = vmul.f32 %v4129_v17, %v4127_v16  ;;  %v234_v27 = vmul.f32 %v4144_v20, %v4136_v18  ;;  %v4188_v35 = vsel %vm241_vm2, %v4121_v13, %v4129_v17  ;;  %vm574_vm2 = vcmask 72704  }
  0x8b   : > { %292 = vrot.lane.b32.xlu0 %v4124_v15, %s4049_s26  ;;  %329 = vrot.lane.b32.xlu1 %v4136_v18, %s4048_s25  ;;  %v247_v36 = vmul.f32 %v4188_v35, %v4124_v15 }
  0x8d   : > { %v4142_v19 = vpop.permute.xlu1 %227  ;;  %v4160_v25 = vpop.permute.xlu0 %213 }
  0x8e   : > { %v236_v26 = vmul.f32 %v4142_v19, %v4127_v16  ;;  %v222_v30 = vmul.f32 %v4160_v25, %v4136_v18  ;;  %v4198_v38 = vsel %vm229_vm3, %v4144_v20, %v4142_v19  ;;  %vm886_vm3 = vcmask 523264  }
  0x8f   : > { %290 = vrot.lane.b32.xlu0 %v4136_v18, %s4049_s26  ;;  %294 = vrot.lane.b32.xlu1 %v4127_v16, %s4049_s26  ;;  %v235_v40 = vmul.f32 %v4198_v38, %v4124_v15 }
  0x91   : > { %v4154_v23 = vpop.permute.xlu1 %215  ;;  %v4176_v31 = vpop.permute.xlu0 %201 }
  0x92   : > { %v224_v29 = vmul.f32 %v4154_v23, %v4127_v16  ;;  %v210_v33 = vmul.f32 %v4176_v31, %v4136_v18  ;;  %v4202_v39 = vsel %vm217_vm4, %v4160_v25, %v4154_v23  ;;  %vm1008_vm4 = vcmask 39936  }
  0x93   : > { %343 = vrot.lane.b32.xlu0 %v246_v21, %s4051_s27  ;;  %347 = vrot.lane.b32.xlu1 %v248_v22, %s4051_s27  ;;  %v223_v41 = vmul.f32 %v4202_v39, %v4124_v15 }
  0x95   : > { %v4170_v28 = vpop.permute.xlu1 %203  ;;  %v4210_v42 = vpop.permute.xlu0 %189 }
  0x96   : > { %v212_v32 = vmul.f32 %v4170_v28, %v4127_v16  ;;  %v4215_v43 = vsel %vm205_vm5, %v4176_v31, %v4170_v28  ;;  %v198_v45 = vmul.f32 %v4210_v42, %v4136_v18 }
  0x97   : > { %322 = vrot.lane.b32.xlu1 %v236_v26, %s4052_s28  ;;  %318 = vrot.lane.b32.xlu0 %v234_v27, %s4052_s28  ;;  %v211_v44 = vmul.f32 %v4215_v43, %v4124_v15 }
  0x99   : > { %v4184_v34 = vpop.permute.xlu1 %191 }
  0x9a   : > { %v200_v37 = vmul.f32 %v4184_v34, %v4127_v16  ;;  %v4225_v46 = vsel %vm193_vm6, %v4210_v42, %v4184_v34  ;;  %vm1011_vm6 = vcmask 171008  }
  0x9b   : > { %308 = vrot.lane.b32.xlu0 %v224_v29, %s4053_s29  ;;  %304 = vrot.lane.b32.xlu1 %v222_v30, %s4053_s29  ;;  %v199_v48 = vmul.f32 %v4225_v46, %v4124_v15 }
  0x9f   : > { %283 = vrot.lane.b32.xlu0 %v212_v32, %s4054_s30  ;;  %279 = vrot.lane.b32.xlu1 %v210_v33, %s4054_s30 }
  0xa3   : > { %345 = vrot.lane.b32.xlu0 %v247_v36, %s4051_s27  ;;  %269 = vrot.lane.b32.xlu1 %v200_v37, %s4055_s3 }
  0xa7   : > { %320 = vrot.lane.b32.xlu0 %v235_v40, %s4052_s28  ;;  %306 = vrot.lane.b32.xlu1 %v223_v41, %s4053_s29 }
  0xab   : > { %281 = vrot.lane.b32.xlu1 %v211_v44, %s4054_s30  ;;  %265 = vrot.lane.b32.xlu0 %v198_v45, %s4055_s3  ;;  %v179_v44 = vmul.f32 %v4109_v11, %v4124_v15  ;;  %v178_v45 = vmul.f32 %v4106_v10, %v4136_v18 }
  0xaf   : > { %253 = vrot.lane.b32.xlu1 %v4124_v15, %s4057_s4  ;;  %267 = vrot.lane.b32.xlu0 %v199_v48, %s4055_s3  ;;  %v354_v48 = vld [vmem:[%s5811_s1] sm:$0xff] }
  0xb3   : > { %251 = vrot.lane.b32.xlu1 %v4136_v18, %s4057_s4  ;;  %255 = vrot.lane.b32.xlu0 %v4127_v16, %s4057_s4  ;;  %v499_v18 = vld [vmem:[%s5811_s1 + $0x510] sm:$0xff] }
  0xb4   : > { %3687 = vmatprep.subr.mxu1 %v499_v18 }
  0xf9   : > { %v332_v49 = vpop.permute.xlu1 %331  ;;  %v334_v50 = vpop.permute.xlu0 %333 }
  0xfa   : > { %v337_v3 = vsel %vm335_vm8, %v332_v49, %v334_v50  ;;  %v483_v50 = vld [vmem:[%s5811_s1 + $0x390] sm:$0xff] }
  0xfb   : > { %3688 = vmatpush3.msra.mxu1 %v483_v50  ;;  %v149_v50 = vld [vmem:[%s5811_s1 + $0x720] ss:$0 sm:$0xff] }
  0xfd   : > { %v330_v51 = vpop.permute.xlu1 %329  ;;  %v293_v52 = vpop.permute.xlu0 %292 }
  0xfe   : > { %v336_v6 = vsel %vm335_vm8, %v330_v51, %v332_v49  ;;  %v498_v51 = vld [vmem:[%s5811_s1 + $0x4f8] sm:$0xff] }
  0xff   : > { %3689 = vmatprep.subr.mxu1 %v498_v51 }
 0x101   : > { %v295_v53 = vpop.permute.xlu1 %294  ;;  %v291_v54 = vpop.permute.xlu0 %290 }
 0x102   : > { %v298_v21 = vsel %vm296_vm11, %v293_v52, %v295_v53  ;;  %v297_v22 = vsel %vm296_vm11, %v291_v54, %v293_v52  ;;  %v482_v53 = vld [vmem:[%s5811_s1 + $0x378] sm:$0xff] }
 0x103   : > { %3690 = vmatpush3.msra.mxu1 %v482_v53 }
 0x105   : > { %v348_v55 = vpop.permute.xlu1 %347  ;;  %v344_v56 = vpop.permute.xlu0 %343 }
 0x109   : > { %v323_v57 = vpop.permute.xlu1 %322  ;;  %v319_v58 = vpop.permute.xlu0 %318 }
 0x10d   : > { %v305_v59 = vpop.permute.xlu1 %304  ;;  %v309_v60 = vpop.permute.xlu0 %308 }
 0x111   : > { %v280_v61 = vpop.permute.xlu1 %279  ;;  %v284_v62 = vpop.permute.xlu0 %283 }
 0x115   : > { %v270_v63 = vpop.permute.xlu1 %269  ;;  %v346_v0 = vpop.permute.xlu0 %345 }
 0x116   : > { %v351_v1 = vsel %vm349_vm7, %v346_v0, %v348_v55  ;;  %v350_v2 = vsel %vm349_vm7, %v344_v56, %v346_v0  ;;  %v497_v55 = vld [vmem:[%s5811_s1 + $0x4e0] sm:$0xff] }
 0x117   : > { %377 = vmatprep.subr.mxu0 %v351_v1  ;;  %v481_v56 = vld [vmem:[%s5811_s1 + $0x360] sm:$0xff]  ;;  %3691 = vmatprep.subr.mxu1 %v497_v55 }
 0x118   : > { %378 = vmatpush1.msra.mxu0 %v350_v2  ;;  %3692 = vmatpush3.msra.mxu1 %v481_v56  ;;  %v493_v0 = vld [vmem:[%s5811_s1 + $0x480] sm:$0xff]  ;;  %v492_v2 = vld [vmem:[%s5811_s1 + $0x468] sm:$0xff] }
 0x119   : > { %v307_v4 = vpop.permute.xlu1 %306  ;;  %379 = vmatprep.subr.mxu0 %v337_v3  ;;  %v321_v5 = vpop.permute.xlu0 %320  ;;  %v477_v1 = vld [vmem:[%s5811_s1 + $0x300] sm:$0xff]  ;;  %v476_v3 = vld [vmem:[%s5811_s1 + $0x2e8] sm:$0xff] }
 0x11a   : > { %380 = vmatpush1.msra.mxu0 %v336_v6  ;;  %v326_v7 = vsel %vm324_vm9, %v321_v5, %v323_v57  ;;  %v325_v8 = vsel %vm324_vm9, %v319_v58, %v321_v5  ;;  %v312_v9 = vsel %vm310_vm10, %v307_v4, %v309_v60  ;;  %v311_v16 = vsel %vm310_vm10, %v305_v59, %v307_v4  ;;  %v496_v58 = vld [vmem:[%s5811_s1 + $0x4c8] sm:$0xff]  ;;  %v495_v60 = vld [vmem:[%s5811_s1 + $0x4b0] sm:$0xff]  ;;  %v490_v6 = vld [vmem:[%s5811_s1 + $0x438] sm:$0xff] }
 0x11b   : > { %381 = vmatprep.subr.mxu0 %v326_v7  ;;  %v480_v59 = vld [vmem:[%s5811_s1 + $0x348] sm:$0xff]  ;;  %3693 = vmatprep.subr.mxu1 %v496_v58  ;;  %v491_v4 = vld [vmem:[%s5811_s1 + $0x450] sm:$0xff]  ;;  %v474_v7 = vld [vmem:[%s5811_s1 + $0x2b8] sm:$0xff] }
 0x11c   : > { %382 = vmatpush1.msra.mxu0 %v325_v8  ;;  %3694 = vmatpush3.msra.mxu1 %v480_v59  ;;  %v475_v5 = vld [vmem:[%s5811_s1 + $0x2d0] sm:$0xff]  ;;  %v489_v8 = vld [vmem:[%s5811_s1 + $0x420] sm:$0xff] }
 0x11d   : > { %v282_v12 = vpop.permute.xlu1 %281  ;;  %383 = vmatprep.subr.mxu0 %v312_v9  ;;  %v266_v14 = vpop.permute.xlu0 %265  ;;  %3695 = vmatprep.subr.mxu1 %v495_v60  ;;  %v473_v9 = vld [vmem:[%s5811_s1 + $0x2a0] sm:$0xff] }
 0x11e   : > { %384 = vmatpush1.msra.mxu0 %v311_v16  ;;  %v287_v26 = vsel %vm285_vm12, %v282_v12, %v284_v62  ;;  %v286_v30 = vsel %vm285_vm12, %v280_v61, %v282_v12  ;;  %v479_v61 = vld [vmem:[%s5811_s1 + $0x330] sm:$0xff]  ;;  %v494_v62 = vld [vmem:[%s5811_s1 + $0x498] sm:$0xff]  ;;  %v488_v12 = vld [vmem:[%s5811_s1 + $0x408] sm:$0xff] }
 0x11f   : > { %385 = vmatprep.subr.mxu0 %v298_v21  ;;  %3696 = vmatpush3.msra.mxu1 %v479_v61  ;;  %v487_v16 = vld [vmem:[%s5811_s1 + $0x3f0] sm:$0xff] }
 0x120   : > { %386 = vmatpush1.msra.mxu0 %v297_v22  ;;  %3697 = vmatprep.subr.mxu1 %v494_v62  ;;  %v471_v21 = vld [vmem:[%s5811_s1 + $0x270] sm:$0xff]  ;;  %v486_v22 = vld [vmem:[%s5811_s1 + $0x3d8] sm:$0xff] }
 0x121   : > { %v254_v27 = vpop.permute.xlu1 %253  ;;  %387 = vmatprep.subr.mxu0 %v287_v26  ;;  %v268_v29 = vpop.permute.xlu0 %267  ;;  %v470_v26 = vld [vmem:[%s5811_s1 + $0x258] sm:$0xff] }
 0x122   : > { %388 = vmatpush1.msra.mxu0 %v286_v30  ;;  %v273_v32 = vsel %vm271_vm13, %v268_v29, %v270_v63  ;;  %v272_v33 = vsel %vm271_vm13, %v266_v14, %v268_v29  ;;  %v478_v63 = vld [vmem:[%s5811_s1 + $0x318] sm:$0xff]  ;;  %v472_v14 = vld [vmem:[%s5811_s1 + $0x288] sm:$0xff]  ;;  %v469_v29 = vld [vmem:[%s5811_s1 + $0x240] sm:$0xff] }
 0x123   : > { %389 = vmatprep.subr.mxu0 %v273_v32  ;;  %3698 = vmatpush3.msra.mxu1 %v478_v63  ;;  %v484_v30 = vld [vmem:[%s5811_s1 + $0x3a8] sm:$0xff] }
 0x124   : > { %390 = vmatpush1.msra.mxu0 %v272_v33  ;;  %3699 = vmatprep.subr.mxu1 %v493_v0  ;;  %v468_v32 = vld [vmem:[%s5811_s1 + $0x228] sm:$0xff] }
 0x125   : > { %v252_v36 = vpop.permute.xlu1 %251  ;;  %v256_v37 = vpop.permute.xlu0 %255  ;;  %3700 = vmatpush3.msra.mxu1 %v477_v1  ;;  %v4391_v63 = vld [vmem:[%s5811_s1 + $0x708] ss:$0 sm:$0xff] }
 0x126   : > { %v259_v40 = vsel %vm257_vm14, %v254_v27, %v256_v37  ;;  %v258_v41 = vsel %vm257_vm14, %v252_v36, %v254_v27  ;;  %3701 = vmatprep.subr.mxu1 %v492_v2  ;;  %v485_v27 = vld [vmem:[%s5811_s1 + $0x3c0] sm:$0xff] }
 0x127   : > { %391 = vmatprep.subr.mxu0 %v259_v40  ;;  %3702 = vmatpush3.msra.mxu1 %v476_v3 }
 0x128   : > { %392 = vmatpush1.msra.mxu0 %v258_v41  ;;  %3703 = vmatprep.subr.mxu1 %v491_v4 }
 0x129   : > { %393 = vmatprep.subr.mxu0 %v179_v44  ;;  %3704 = vmatpush3.msra.mxu1 %v475_v5 }
 0x12a   : > { %394 = vmatpush1.msra.mxu0 %v178_v45  ;;  %3705 = vmatprep.subr.mxu1 %v490_v6 }
 0x12b   : > { %3637 = vmatmul.mubr.msk.f32.vlgmr.msra.gmra.mxu0 %vm355_vm15, %v354_v48  ;;  %3893 = vmatprep.subr.msk.mxu0 %vm359_vm1, %v4050_v24 }
 0x12c   : > { %3894 = vmatpush3.msk.msra.mxu0 %vm359_vm1, %v4050_v24  ;;  %3706 = vmatpush3.msra.mxu1 %v474_v7 }
 0x12d   : > { %3707 = vmatprep.subr.mxu1 %v489_v8 }
 0x12e   : > { %3708 = vmatpush3.msra.mxu1 %v473_v9 }
 0x12f   : > { %3709 = vmatprep.subr.mxu1 %v488_v12  ;;  %v630_v12 = vld [vmem:[%s5811_s1 + $0x18] sm:$0xff] }
 0x130   : > { %3710 = vmatpush3.msra.mxu1 %v472_v14  ;;  %3913 = vmatprep.mubr.msk.f32.mxu0 %vm355_vm15, %v630_v12 }
 0x131   : > { %3711 = vmatprep.subr.mxu1 %v487_v16 }
 0x132   : > { %3712 = vmatpush3.msra.mxu1 %v471_v21 }
 0x133   : > { %3713 = vmatprep.subr.mxu1 %v486_v22 }
 0x134   : > { %3714 = vmatpush3.msra.mxu1 %v470_v26 }
 0x135   : > { %3715 = vmatprep.subr.mxu1 %v485_v27 }
 0x136   : > { %3716 = vmatpush3.msra.mxu1 %v469_v29 }
 0x137   : > { %3717 = vmatprep.subr.mxu1 %v484_v30 }
 0x138   : > { %3718 = vmatpush3.msra.mxu1 %v468_v32 }
 0x139   : > { %809 = vmatprep.subr.mxu1 %v4056_v47 }
 0x1eb   : > { %v429_v15 = vpop.f32.mrf.mxu0 }
 0x1ec   : > { %v4267_v49 = vmax.f32 %v429_v15, 0.0 }
 0x1ed   : > { %v431_v52 = vpop.f32.mrf.mxu0 }
 0x1ee   : > { %v4281_v54 = vmax.f32 %v431_v52, 0.0  ;;  %439 = vrot.lane.b32.xlu1 %v4267_v49, %s4057_s4 }
 0x1f0   : > { %v4023_v57 = vpack.i.bf16 %v4056_v47, %v4281_v54 }
 0x1f2   : > { %4024 = vrot.lane.b32.xlu0 %v4023_v57, %s4057_s4 }
 0x260   : > { %v440_v40 = vpop.permute.xlu1 %439 }
 0x264   : > { %v4025_v33 = vpop.permute.xlu0 %4024 }
 0x265   : > { %v4027_v36 = vunpack.i.h.bf16 %v4025_v33  ;;  %v4026_v37 = vunpack.i.l.bf16 %v4025_v33 }
 0x267   : > { %v452_v41 = vmax.f32 %v4027_v36, 0.0  ;;  %v445_v44 = vsel %vm257_vm14, %v440_v40, %v4026_v37  ;;  %v446_v45 = vsel %vm257_vm14, %v4026_v37, %v4027_v36  ;;  %v631_v40 = vld [vmem:[%s5811_s1 + $0x30] sm:$0xff] }
 0x268   : > { %v449_v48 = vmax.f32 %v4267_v49, %v445_v44  ;;  %v450_v15 = vmax.f32 %v4281_v54, %v446_v45 }
 0x26a   : > { %456 = vrot.lane.b32.xlu1 %v449_v48, %s4054_s30  ;;  %v4028_v18 = vpack.i.bf16 %v452_v41, %v450_v15 }
 0x26c   : > { %4029 = vrot.lane.b32.xlu0 %v4028_v18, %s4054_s30 }
 0x26e   : > { %596 = vrot.lane.b32.xlu1 %v149_v50, %s4045_s22  ;;  %s4059_s22 = smov 9  }
 0x272   : > { %588 = vrot.lane.b32.xlu1 %v149_v50, %s4058_s20 }
 0x276   : > { %579 = vrot.lane.b32.xlu1 %v149_v50, %s4047_s24 }
 0x2dc   : > { %v457_v55 = vpop.permute.xlu1 %456 }
 0x2de   : > { %v4030_v51 = vpop.permute.xlu0 %4029 }
 0x2df   : > { %v4032_v52 = vunpack.i.h.bf16 %v4030_v51  ;;  %v4031_v53 = vunpack.i.l.bf16 %v4030_v51 }
 0x2e0   : > { %v4397_v0 = vpop.permute.xlu1 %596 }
 0x2e1   : > { %v463_v56 = vsel %vm285_vm12, %v4031_v53, %v4032_v52  ;;  %v462_v57 = vsel %vm285_vm12, %v457_v55, %v4031_v53 }
 0x2e2   : > { %v467_v58 = vmax.f32 %v450_v15, %v463_v56  ;;  %v466_v59 = vmax.f32 %v449_v48, %v462_v57 }
 0x2e4   : > { %564 = vmatprep.mubr.f32.mxu1 %v467_v58  ;;  %v4403_v5 = vpop.permute.xlu1 %588 }
 0x2e5   : > { %565 = vmatmul.mubr.f32.vlgmr.msra.gmra.mxu1 %v466_v59 }
 0x2e8   : > { %v4420_v16 = vpop.permute.xlu1 %579 }
 0x3a5   : > { %v3719_v60 = vpop.f32.mrf.mxu1 }
 0x3a7   : > { %v3720_v61 = vpop.f32.mrf.mxu1 }
 0x3a8   : > { %v3721_v62 = vadd.f32 %v3720_v61, %v3719_v60 }
 0x3aa   : > { %571 = vrot.lane.b32.xlu0 %v3721_v62, %s4059_s22 }
 0x3ae   : > { %592 = vrot.lane.b32.xlu0 %v4391_v63, %s4046_s23  ;;  %s4061_s23 = smov 118  }
 0x3b2   : > { %584 = vrot.lane.b32.xlu0 %v4391_v63, %s4060_s6 }
 0x41c   : > { %v572_v1 = vpop.permute.xlu0 %571 }
 0x41d   : > { %v575_v2 = vsel %vm574_vm2, 0.0, %v572_v1  ;;  %v800_v1 = vld [vmem:[%s5811_s1 + $0x50] sm:$0xff] }
 0x41e   : > { %v576_v3 = vsel %vm355_vm15, %v575_v2, 0.0  ;;  %3642 = vmatprep.mubr.msk.f32.mxu1 %vm160_vm0, %v800_v1  ;;  %v912_v1 = vld [vmem:[%s5811_s1 + $0x540] sm:$0xff] }
 0x41f   : > { %623 = vrot.lane.b32.xlu1 %v576_v3, %s4049_s26  ;;  %v599_v4 = vmul.f32 %v4397_v0, %v576_v3  ;;  %v591_v7 = vmul.f32 %v4403_v5, %v576_v3  ;;  %v582_v21 = vmul.f32 %v4420_v16, %v576_v3  ;;  %v577_v37 = vmul.f32 %v576_v3, %v4391_v63 }
 0x420   : > { %v4405_v6 = vpop.permute.xlu0 %592 }
 0x421   : > { %627 = vrot.lane.b32.xlu0 %v599_v4, %s4053_s29  ;;  %v595_v8 = vmul.f32 %v4405_v6, %v576_v3 }
 0x423   : > { %616 = vrot.lane.b32.xlu1 %v591_v7, %s4061_s23 }
 0x424   : > { %v4411_v9 = vpop.permute.xlu0 %584 }
 0x425   : > { %620 = vrot.lane.b32.xlu0 %v595_v8, %s4054_s30  ;;  %v587_v14 = vmul.f32 %v4411_v9, %v576_v3 }
 0x427   : > { %609 = vrot.lane.b32.xlu1 %v587_v14, %s4062_s11 }
 0x429   : > { %612 = vrot.lane.b32.xlu0 %v576_v3, %s4063_s12 }
 0x42b   : > { %601 = vrot.lane.b32.xlu1 %v576_v3, %s4057_s4 }
 0x42d   : > { %605 = vrot.lane.b32.xlu0 %v582_v21, %s4055_s3 }
 0x491   : > { %v624_v22 = vpop.permute.xlu1 %623 }
 0x493   : > { %v628_v26 = vpop.permute.xlu0 %627 }
 0x494   : > { %3895 = vmatprep.subr.mxu0 %v628_v26 }
 0x495   : > { %3896 = vmatpush3.msra.mxu0 %v628_v26  ;;  %v617_v27 = vpop.permute.xlu1 %616 }
 0x496   : > { %3897 = vmatprep.subr.mxu0 %v624_v22 }
 0x497   : > { %v621_v29 = vpop.permute.xlu0 %620  ;;  %3898 = vmatpush3.msra.mxu0 %v624_v22 }
 0x498   : > { %3899 = vmatprep.subr.mxu0 %v621_v29 }
 0x499   : > { %3900 = vmatpush3.msra.mxu0 %v621_v29  ;;  %v610_v30 = vpop.permute.xlu1 %609 }
 0x49a   : > { %3901 = vmatprep.subr.mxu0 %v617_v27 }
 0x49b   : > { %v613_v32 = vpop.permute.xlu0 %612  ;;  %3902 = vmatpush3.msra.mxu0 %v617_v27 }
 0x49c   : > { %3903 = vmatprep.subr.mxu0 %v613_v32 }
 0x49d   : > { %3904 = vmatpush3.msra.mxu0 %v613_v32  ;;  %v602_v36 = vpop.permute.xlu1 %601 }
 0x49e   : > { %3905 = vmatprep.subr.mxu0 %v610_v30 }
 0x49f   : > { %v606_v33 = vpop.permute.xlu0 %605  ;;  %3906 = vmatpush3.msra.mxu0 %v610_v30 }
 0x4a0   : > { %3907 = vmatprep.subr.mxu0 %v606_v33 }
 0x4a1   : > { %3908 = vmatpush3.msra.mxu0 %v606_v33 }
 0x4a2   : > { %3909 = vmatprep.subr.mxu0 %v602_v36 }
 0x4a3   : > { %3910 = vmatpush3.msra.mxu0 %v602_v36 }
 0x4a4   : > { %3911 = vmatprep.subr.mxu0 %v577_v37 }
 0x4a5   : > { %3912 = vmatpush3.msra.mxu0 %v577_v37 }
 0x4a6   : > { %3914 = vmatmul.mubr.msk.f32.vlgmr.msra.gmra.mxu0 %vm355_vm15, %v631_v40 }
 0x566   : > { %v3915_v41 = vpop.f32.mrf.mxu0 }
 0x567   : > { %v714_v44 = vmax.f32 %v3915_v41, 0.0 }
 0x568   : > { %v704_v45 = vpop.f32.mrf.mxu0 }
 0x569   : > { %v713_v48 = vmax.f32 %v704_v45, 0.0  ;;  %719 = vrot.lane.b32.xlu0 %v714_v44, %s4059_s22  ;;  %v799_v44 = vld [vmem:[%s5811_s1 + $0x48] sm:$0xff] }
 0x56b   : > { %717 = vrot.lane.b32.xlu1 %v713_v48, %s4059_s22  ;;  %v801_v48 = vld [vmem:[%s5811_s1 + $0x60] sm:$0xff] }
 0x5db   : > { %v720_v15 = vpop.permute.xlu0 %719 }
 0x5dc   : > { %v724_v18 = vsel %vm574_vm2, 0.0, %v720_v15  ;;  %v918_v15 = vld [vmem:[%s5811_s1 + $0x5d0] sm:$0xff] }
 0x5dd   : > { %v4435_v50 = vsel %vm355_vm15, %v724_v18, 0.0  ;;  %v718_v51 = vpop.permute.xlu1 %717  ;;  %v917_v18 = vld [vmem:[%s5811_s1 + $0x5b8] sm:$0xff]  ;;  %3916 = vmatprep.subr.mxu0 %v918_v15 }
 0x5de   : > { %v723_v52 = vsel %vm574_vm2, 0.0, %v718_v51  ;;  %787 = vrot.lane.b32.xlu0 %v4435_v50, %s4049_s26  ;;  %v736_v55 = vmul.f32 %v4435_v50, %v4405_v6  ;;  %v734_v57 = vmul.f32 %v4435_v50, %v4403_v5  ;;  %v732_v59 = vmul.f32 %v4435_v50, %v4411_v9  ;;  %3917 = vmatpush3.msra.mxu0 %v918_v15 }
 0x5df   : > { %v4441_v53 = vsel %vm355_vm15, %v723_v52, 0.0  ;;  %v730_v61 = vmul.f32 %v4435_v50, %v4420_v16  ;;  %v738_v2 = vmul.f32 %v4435_v50, %v4397_v0  ;;  %v728_v37 = vmul.f32 %v4435_v50, %v4391_v63  ;;  %3918 = vmatprep.subr.mxu0 %v917_v18 }
 0x5e0   : > { %785 = vrot.lane.b32.xlu1 %v4441_v53, %s4049_s26  ;;  %v735_v56 = vmul.f32 %v4441_v53, %v4405_v6  ;;  %v733_v58 = vmul.f32 %v4441_v53, %v4403_v5  ;;  %v731_v60 = vmul.f32 %v4441_v53, %v4411_v9  ;;  %v729_v62 = vmul.f32 %v4441_v53, %v4420_v16 }
 0x5e1   : > { %v737_v3 = vmul.f32 %v4441_v53, %v4397_v0  ;;  %v727_v40 = vmul.f32 %v4441_v53, %v4391_v63  ;;  %v802_v63 = vld [vmem:[%s5811_s1 + $0x68] sm:$0xff]  ;;  %3919 = vmatpush3.msra.mxu0 %v917_v18 }
 0x5e2   : > { %781 = vrot.lane.b32.xlu0 %v736_v55, %s4054_s30 }
 0x5e4   : > { %779 = vrot.lane.b32.xlu1 %v735_v56, %s4054_s30 }
 0x5e6   : > { %773 = vrot.lane.b32.xlu0 %v734_v57, %s4061_s23  ;;  %v914_v57 = vld [vmem:[%s5811_s1 + $0x570] sm:$0xff] }
 0x5e8   : > { %771 = vrot.lane.b32.xlu1 %v733_v58, %s4061_s23 }
 0x5ea   : > { %765 = vrot.lane.b32.xlu0 %v4435_v50, %s4063_s12 }
 0x5ec   : > { %763 = vrot.lane.b32.xlu1 %v4441_v53, %s4063_s12 }
 0x5ee   : > { %759 = vrot.lane.b32.xlu0 %v732_v59, %s4062_s11 }
 0x5f0   : > { %757 = vrot.lane.b32.xlu1 %v731_v60, %s4062_s11 }
 0x5f2   : > { %751 = vrot.lane.b32.xlu0 %v730_v61, %s4055_s3 }
 0x5f4   : > { %749 = vrot.lane.b32.xlu1 %v729_v62, %s4055_s3  ;;  %v913_v62 = vld [vmem:[%s5811_s1 + $0x558] sm:$0xff] }
 0x5f6   : > { %743 = vrot.lane.b32.xlu0 %v4435_v50, %s4057_s4  ;;  %v916_v50 = vld [vmem:[%s5811_s1 + $0x5a0] sm:$0xff] }
 0x5f7   : > { %3920 = vmatprep.subr.mxu0 %v916_v50 }
 0x5f8   : > { %741 = vrot.lane.b32.xlu1 %v4441_v53, %s4057_s4  ;;  %v915_v53 = vld [vmem:[%s5811_s1 + $0x588] sm:$0xff]  ;;  %3921 = vmatpush3.msra.mxu0 %v916_v50 }
 0x5f9   : > { %3922 = vmatprep.subr.mxu0 %v915_v53 }
 0x5fa   : > { %795 = vrot.lane.b32.xlu0 %v738_v2, %s4053_s29  ;;  %3923 = vmatpush3.msra.mxu0 %v915_v53  ;;  %v911_v2 = vld [vmem:[%s5811_s1 + $0x528] sm:$0xff] }
 0x5fb   : > { %3924 = vmatprep.subr.mxu0 %v914_v57 }
 0x5fc   : > { %793 = vrot.lane.b32.xlu1 %v737_v3, %s4053_s29  ;;  %3925 = vmatpush3.msra.mxu0 %v914_v57 }
 0x5fd   : > { %3926 = vmatprep.subr.mxu0 %v913_v62 }
 0x5fe   : > { %3927 = vmatpush3.msra.mxu0 %v913_v62  ;;  %v1104_v62 = vld [vmem:[%s5811_s1 + $0x80] sm:$0xff] }
 0x5ff   : > { %3928 = vmatprep.subr.mxu0 %v912_v1 }
 0x600   : > { %3929 = vmatpush3.msra.mxu0 %v912_v1 }
 0x601   : > { %3930 = vmatprep.subr.mxu0 %v911_v2 }
 0x602   : > { %3931 = vmatpush3.msra.mxu0 %v911_v2 }
 0x603   : > { %1123 = vmatprep.subr.mxu0 %v4056_v47 }
 0x650   : > { %v788_v4 = vpop.permute.xlu0 %787 }
 0x651   : > { %810 = vmatpush1.msra.mxu1 %v788_v4 }
 0x652   : > { %811 = vmatprep.subr.mxu1 %v4056_v47  ;;  %v786_v7 = vpop.permute.xlu1 %785 }
 0x653   : > { %812 = vmatpush1.msra.mxu1 %v786_v7 }
 0x654   : > { %v782_v8 = vpop.permute.xlu0 %781  ;;  %813 = vmatprep.subr.mxu1 %v4056_v47 }
 0x655   : > { %814 = vmatpush1.msra.mxu1 %v782_v8 }
 0x656   : > { %815 = vmatprep.subr.mxu1 %v4056_v47  ;;  %v780_v12 = vpop.permute.xlu1 %779 }
 0x657   : > { %816 = vmatpush1.msra.mxu1 %v780_v12 }
 0x658   : > { %v774_v14 = vpop.permute.xlu0 %773  ;;  %817 = vmatprep.subr.mxu1 %v4056_v47 }
 0x659   : > { %818 = vmatpush1.msra.mxu1 %v774_v14 }
 0x65a   : > { %819 = vmatprep.subr.mxu1 %v4056_v47  ;;  %v772_v21 = vpop.permute.xlu1 %771 }
 0x65b   : > { %820 = vmatpush1.msra.mxu1 %v772_v21 }
 0x65c   : > { %v766_v22 = vpop.permute.xlu0 %765  ;;  %821 = vmatprep.subr.mxu1 %v4056_v47 }
 0x65d   : > { %822 = vmatpush1.msra.mxu1 %v766_v22 }
 0x65e   : > { %823 = vmatprep.subr.mxu1 %v4056_v47  ;;  %v764_v26 = vpop.permute.xlu1 %763 }
 0x65f   : > { %824 = vmatpush1.msra.mxu1 %v764_v26 }
 0x660   : > { %v760_v27 = vpop.permute.xlu0 %759  ;;  %825 = vmatprep.subr.mxu1 %v4056_v47 }
 0x661   : > { %826 = vmatpush1.msra.mxu1 %v760_v27 }
 0x662   : > { %827 = vmatprep.subr.mxu1 %v4056_v47  ;;  %v758_v29 = vpop.permute.xlu1 %757 }
 0x663   : > { %828 = vmatpush1.msra.mxu1 %v758_v29 }
 0x664   : > { %v752_v30 = vpop.permute.xlu0 %751  ;;  %829 = vmatprep.subr.mxu1 %v4056_v47 }
 0x665   : > { %830 = vmatpush1.msra.mxu1 %v752_v30 }
 0x666   : > { %831 = vmatprep.subr.mxu1 %v4056_v47  ;;  %v750_v32 = vpop.permute.xlu1 %749 }
 0x667   : > { %832 = vmatpush1.msra.mxu1 %v750_v32  ;;  %v4566_v32 = vld [vmem:[%s5811_s1 + $0x738] ss:$0 sm:$0xff] }
 0x668   : > { %v744_v33 = vpop.permute.xlu0 %743  ;;  %833 = vmatprep.subr.mxu1 %v4056_v47 }
 0x669   : > { %834 = vmatpush1.msra.mxu1 %v744_v33  ;;  %v151_v33 = vld [vmem:[%s5811_s1 + $0x750] ss:$0 sm:$0xff] }
 0x66a   : > { %835 = vmatprep.subr.mxu1 %v4056_v47  ;;  %v742_v36 = vpop.permute.xlu1 %741 }
 0x66b   : > { %836 = vmatpush1.msra.mxu1 %v742_v36 }
 0x66c   : > { %837 = vmatprep.subr.mxu1 %v4056_v47  ;;  %v796_v41 = vpop.permute.xlu0 %795 }
 0x66d   : > { %838 = vmatpush1.msra.mxu1 %v728_v37 }
 0x66e   : > { %839 = vmatprep.subr.mxu1 %v4056_v47  ;;  %v794_v45 = vpop.permute.xlu1 %793 }
 0x66f   : > { %840 = vmatpush1.msra.mxu1 %v727_v40 }
 0x670   : > { %867 = vmatprep.subr.mxu1 %v4056_v47 }
 0x671   : > { %3641 = vmatpush2.msk.msra.mxu1 %vm359_vm1, %v4050_v24 }
 0x672   : > { %869 = vmatprep.subr.mxu1 %v4056_v47 }
 0x673   : > { %870 = vmatpush2.msra.mxu1 %v796_v41 }
 0x674   : > { %871 = vmatprep.subr.mxu1 %v4056_v47 }
 0x675   : > { %872 = vmatpush2.msra.mxu1 %v794_v45 }
 0x676   : > { %874 = vmatmul.mubr.f32.vlgmr.msra.gmra.mxu1 %v799_v44 }
 0x677   : > { %3643 = vmatprep.mubr.msk.f32.mxu1 %vm160_vm0, %v802_v63 }
 0x67a   : > { %879 = vmatmul.mubr.f32.gmra.mxu1 %v801_v48 }
 0x736   : > { %v875_v51 = vpop.f32.mrf.mxu1 }
 0x737   : > { %v4530_v52 = vmax.f32 %v875_v51, 0.0 }
 0x738   : > { %v877_v55 = vpop.f32.mrf.mxu1 }
 0x739   : > { %v887_v56 = vsel %vm886_vm3, %v4530_v52, 0.0 }
 0x73a   : > { %891 = vrot.lane.b32.xlu0 %v887_v56, %s4057_s4  ;;  %v880_v58 = vpop.f32.mrf.mxu1 }
 0x73b   : > { %v4541_v59 = vmax.f32 %v880_v58, 0.0 }
 0x73c   : > { %v882_v60 = vpop.f32.mrf.mxu1 }
 0x73d   : > { %v888_v61 = vsel %vm886_vm3, %v4541_v59, 0.0 }
 0x73e   : > { %893 = vrot.lane.b32.xlu1 %v888_v61, %s4057_s4 }
 0x7ac   : > { %v892_v3 = vpop.permute.xlu0 %891 }
 0x7ad   : > { %v899_v4 = vmax.f32 %v887_v56, %v892_v3  ;;  %v897_v12 = vmax.f32 %v4530_v52, %v892_v3 }
 0x7af   : > { %903 = vrot.lane.b32.xlu0 %v899_v4, %s4062_s11 }
 0x7b0   : > { %v894_v7 = vpop.permute.xlu1 %893 }
 0x7b1   : > { %v900_v8 = vmax.f32 %v888_v61, %v894_v7  ;;  %v898_v22 = vmax.f32 %v4541_v59, %v894_v7 }
 0x7b3   : > { %905 = vrot.lane.b32.xlu1 %v900_v8, %s4062_s11 }
 0x821   : > { %v904_v14 = vpop.permute.xlu0 %903 }
 0x822   : > { %v909_v21 = vmax.f32 %v897_v12, %v904_v14 }
 0x824   : > { %3932 = vmatprep.mubr.msk.f32.mxu0 %vm886_vm3, %v909_v21 }
 0x825   : > { %v906_v26 = vpop.permute.xlu1 %905 }
 0x826   : > { %v910_v27 = vmax.f32 %v898_v22, %v906_v26 }
 0x828   : > { %3933 = vmatmul.mubr.msk.f32.vlgmr.msra.gmra.mxu0 %vm886_vm3, %v910_v27 }
 0x829   : > { %3647 = vmatprep.mubr.msk.f32.mxu0 %vm160_vm0, %v1104_v62 }
 0x8e8   : > { %v3934_v29 = vpop.f32.mrf.mxu0 }
 0x8e9   : > { %1004 = vrot.lane.b32.xlu0 %v3934_v29, %s4064_s21 }
 0x8ea   : > { %v991_v30 = vpop.f32.mrf.mxu0 }
 0x8eb   : > { %1002 = vrot.lane.b32.xlu1 %v991_v30, %s4064_s21 }
 0x8ed   : > { %1033 = vrot.lane.b32.xlu0 %v4566_v32, %s4060_s6  ;;  %s4069_s6 = smov 124  }
 0x8ef   : > { %1028 = vrot.lane.b32.xlu1 %v151_v33, %s4065_s14 }
 0x8f1   : > { %1023 = vrot.lane.b32.xlu0 %v4566_v32, %s4066_s15 }
 0x8f3   : > { %1017 = vrot.lane.b32.xlu1 %v151_v33, %s4047_s24  ;;  %s4067_s24 = smov 122  }
 0x8f5   : > { %1038 = vrot.lane.b32.xlu0 %v151_v33, %s4058_s20  ;;  %s4068_s20 = smov 123  }
 0x95b   : > { %v1005_v36 = vpop.permute.xlu0 %1004 }
 0x95c   : > { %v1010_v37 = vsel %vm1008_vm4, 0.0, %v1005_v36 }
 0x95d   : > { %v4579_v40 = vsel %vm1011_vm6, %v1010_v37, 0.0  ;;  %v1003_v41 = vpop.permute.xlu1 %1002 }
 0x95e   : > { %v1009_v44 = vsel %vm1008_vm4, 0.0, %v1003_v41  ;;  %1091 = vrot.lane.b32.xlu1 %v4579_v40, %s4063_s12  ;;  %v1015_v37 = vmul.f32 %v4579_v40, %v4566_v32 }
 0x95f   : > { %v4585_v45 = vsel %vm1011_vm6, %v1009_v44, 0.0  ;;  %v4587_v63 = vpop.permute.xlu0 %1033 }
 0x960   : > { %1089 = vrot.lane.b32.xlu0 %v4585_v45, %s4063_s12  ;;  %v1037_v48 = vmul.f32 %v4587_v63, %v4579_v40  ;;  %v1036_v18 = vmul.f32 %v4587_v63, %v4585_v45  ;;  %v1014_v41 = vmul.f32 %v4585_v45, %v4566_v32 }
 0x961   : > { %v4593_v15 = vpop.permute.xlu1 %1028 }
 0x962   : > { %1085 = vrot.lane.b32.xlu1 %v1037_v48, %s4062_s11  ;;  %v1032_v50 = vmul.f32 %v4593_v15, %v4579_v40  ;;  %v1031_v51 = vmul.f32 %v4593_v15, %v4585_v45 }
 0x963   : > { %v4605_v53 = vpop.permute.xlu0 %1023 }
 0x964   : > { %1083 = vrot.lane.b32.xlu0 %v1036_v18, %s4062_s11  ;;  %v1027_v55 = vmul.f32 %v4605_v53, %v4579_v40  ;;  %v1026_v57 = vmul.f32 %v4605_v53, %v4585_v45  ;;  %v1105_v18 = vld [vmem:[%s5811_s1 + $0x90] sm:$0xff] }
 0x965   : > { %v4613_v56 = vpop.permute.xlu1 %1017 }
 0x966   : > { %1077 = vrot.lane.b32.xlu1 %v1032_v50, %s4067_s24  ;;  %v1021_v58 = vmul.f32 %v4613_v56, %v4579_v40  ;;  %v1020_v60 = vmul.f32 %v4613_v56, %v4585_v45  ;;  %v1108_v50 = vld [vmem:[%s5811_s1 + $0xb0] sm:$0xff] }
 0x967   : > { %v4625_v61 = vpop.permute.xlu0 %1038 }
 0x968   : > { %1075 = vrot.lane.b32.xlu0 %v1031_v51, %s4067_s24  ;;  %v1042_v1 = vmul.f32 %v4625_v61, %v4579_v40  ;;  %v1041_v2 = vmul.f32 %v4625_v61, %v4585_v45  ;;  %v1107_v51 = vld [vmem:[%s5811_s1 + $0xa8] sm:$0xff] }
 0x96a   : > { %1069 = vrot.lane.b32.xlu1 %v4579_v40, %s4068_s20 }
 0x96c   : > { %1067 = vrot.lane.b32.xlu0 %v4585_v45, %s4068_s20 }
 0x96e   : > { %1063 = vrot.lane.b32.xlu1 %v1027_v55, %s4069_s6  ;;  %v1110_v55 = vld [vmem:[%s5811_s1 + $0xc8] sm:$0xff] }
 0x970   : > { %1061 = vrot.lane.b32.xlu0 %v1026_v57, %s4069_s6  ;;  %v1109_v57 = vld [vmem:[%s5811_s1 + $0xc0] sm:$0xff] }
 0x972   : > { %1055 = vrot.lane.b32.xlu1 %v1021_v58, %s4055_s3 }
 0x974   : > { %1053 = vrot.lane.b32.xlu0 %v1020_v60, %s4055_s3 }
 0x976   : > { %1047 = vrot.lane.b32.xlu1 %v4579_v40, %s4057_s4  ;;  %v1103_v40 = vld [vmem:[%s5811_s1 + $0x78] sm:$0xff] }
 0x978   : > { %1045 = vrot.lane.b32.xlu0 %v4585_v45, %s4057_s4  ;;  %v1106_v45 = vld [vmem:[%s5811_s1 + $0x98] sm:$0xff] }
 0x97a   : > { %1099 = vrot.lane.b32.xlu1 %v1042_v1, %s4061_s23 }
 0x97c   : > { %1097 = vrot.lane.b32.xlu0 %v1041_v2, %s4061_s23 }
 0x9d0   : > { %v1092_v3 = vpop.permute.xlu1 %1091 }
 0x9d1   : > { %1124 = vmatpush1.msra.mxu0 %v1092_v3 }
 0x9d2   : > { %v1090_v4 = vpop.permute.xlu0 %1089  ;;  %1125 = vmatprep.subr.mxu0 %v4056_v47 }
 0x9d3   : > { %1126 = vmatpush1.msra.mxu0 %v1090_v4 }
 0x9d4   : > { %1127 = vmatprep.subr.mxu0 %v4056_v47  ;;  %v1086_v7 = vpop.permute.xlu1 %1085 }
 0x9d5   : > { %1128 = vmatpush1.msra.mxu0 %v1086_v7 }
 0x9d6   : > { %v1084_v8 = vpop.permute.xlu0 %1083  ;;  %1129 = vmatprep.subr.mxu0 %v4056_v47 }
 0x9d7   : > { %1130 = vmatpush1.msra.mxu0 %v1084_v8 }
 0x9d8   : > { %1131 = vmatprep.subr.mxu0 %v4056_v47  ;;  %v1078_v12 = vpop.permute.xlu1 %1077 }
 0x9d9   : > { %1132 = vmatpush1.msra.mxu0 %v1078_v12 }
 0x9da   : > { %v1076_v14 = vpop.permute.xlu0 %1075  ;;  %1133 = vmatprep.subr.mxu0 %v4056_v47 }
 0x9db   : > { %1134 = vmatpush1.msra.mxu0 %v1076_v14 }
 0x9dc   : > { %1135 = vmatprep.subr.mxu0 %v4056_v47  ;;  %v1070_v21 = vpop.permute.xlu1 %1069 }
 0x9dd   : > { %1136 = vmatpush1.msra.mxu0 %v1070_v21 }
 0x9de   : > { %v1068_v22 = vpop.permute.xlu0 %1067  ;;  %1137 = vmatprep.subr.mxu0 %v4056_v47 }
 0x9df   : > { %1138 = vmatpush1.msra.mxu0 %v1068_v22 }
 0x9e0   : > { %1139 = vmatprep.subr.mxu0 %v4056_v47  ;;  %v1064_v26 = vpop.permute.xlu1 %1063 }
 0x9e1   : > { %1140 = vmatpush1.msra.mxu0 %v1064_v26 }
 0x9e2   : > { %v1062_v27 = vpop.permute.xlu0 %1061  ;;  %1141 = vmatprep.subr.mxu0 %v4056_v47 }
 0x9e3   : > { %1142 = vmatpush1.msra.mxu0 %v1062_v27 }
 0x9e4   : > { %1143 = vmatprep.subr.mxu0 %v4056_v47  ;;  %v1056_v29 = vpop.permute.xlu1 %1055 }
 0x9e5   : > { %1144 = vmatpush1.msra.mxu0 %v1056_v29 }
 0x9e6   : > { %v1054_v30 = vpop.permute.xlu0 %1053  ;;  %1145 = vmatprep.subr.mxu0 %v4056_v47 }
 0x9e7   : > { %1146 = vmatpush1.msra.mxu0 %v1054_v30 }
 0x9e8   : > { %1147 = vmatprep.subr.mxu0 %v4056_v47  ;;  %v1048_v33 = vpop.permute.xlu1 %1047 }
 0x9e9   : > { %1148 = vmatpush1.msra.mxu0 %v1048_v33 }
 0x9ea   : > { %v1046_v36 = vpop.permute.xlu0 %1045  ;;  %1149 = vmatprep.subr.mxu0 %v4056_v47 }
 0x9eb   : > { %1150 = vmatpush1.msra.mxu0 %v1046_v36 }
 0x9ec   : > { %1151 = vmatprep.subr.mxu0 %v4056_v47  ;;  %v1100_v44 = vpop.permute.xlu1 %1099 }
 0x9ed   : > { %1152 = vmatpush1.msra.mxu0 %v1015_v37 }
 0x9ee   : > { %1153 = vmatprep.subr.mxu0 %v4056_v47  ;;  %v1098_v48 = vpop.permute.xlu0 %1097 }
 0x9ef   : > { %1154 = vmatpush1.msra.mxu0 %v1014_v41 }
 0x9f0   : > { %1181 = vmatprep.subr.mxu0 %v4056_v47 }
 0x9f1   : > { %3646 = vmatpush2.msk.msra.mxu0 %vm359_vm1, %v4050_v24 }
 0x9f2   : > { %1183 = vmatprep.subr.mxu0 %v4056_v47 }
 0x9f3   : > { %1184 = vmatpush2.msra.mxu0 %v1100_v44 }
 0x9f4   : > { %1185 = vmatprep.subr.mxu0 %v4056_v47 }
 0x9f5   : > { %1186 = vmatpush2.msra.mxu0 %v1098_v48 }
 0x9f6   : > { %1188 = vmatmul.mubr.f32.vlgmr.msra.gmra.mxu0 %v1103_v40  ;;  %3935 = vmatprep.subr.msk.mxu0 %vm359_vm1, %v4050_v24 }
 0x9f7   : > { %3648 = vmatprep.mubr.msk.f32.mxu0 %vm160_vm0, %v1106_v45  ;;  %3936 = vmatpush3.msk.msra.mxu0 %vm359_vm1, %v4050_v24 }
 0x9fa   : > { %1193 = vmatmul.mubr.f32.gmra.mxu0 %v1105_v18 }
 0x9fb   : > { %3649 = vmatprep.mubr.msk.f32.mxu0 %vm160_vm0, %v1108_v50 }
 0x9fe   : > { %1198 = vmatmul.mubr.f32.gmra.mxu0 %v1107_v51 }
 0x9ff   : > { %3650 = vmatprep.mubr.msk.f32.mxu0 %vm160_vm0, %v1110_v55 }
 0xa02   : > { %1203 = vmatmul.mubr.f32.gmra.mxu0 %v1109_v57 }
 0xab6   : > { %v1189_v58 = vpop.f32.mrf.mxu0 }
 0xab7   : > { %v1208_v8 = vmax.f32 %v1189_v58, 0.0 }
 0xab8   : > { %v1191_v60 = vpop.f32.mrf.mxu0 }
 0xaba   : > { %v1194_v62 = vpop.f32.mrf.mxu0 }
 0xabb   : > { %v1209_v21 = vmax.f32 %v1194_v62, 0.0 }
 0xabc   : > { %v1196_v1 = vpop.f32.mrf.mxu0 }
 0xabe   : > { %v1199_v2 = vpop.f32.mrf.mxu0 }
 0xabf   : > { %v1210_v3 = vmax.f32 %v1199_v2, 0.0 }
 0xac0   : > { %v1201_v4 = vpop.f32.mrf.mxu0 }
 0xac1   : > { %1220 = vrot.lane.b32.xlu0 %v1210_v3, %s4064_s21 }
 0xac2   : > { %v1204_v7 = vpop.f32.mrf.mxu0 }
 0xac3   : > { %v1211_v12 = vmax.f32 %v1204_v7, 0.0  ;;  %v1381_v7 = vld [vmem:[%s5811_s1 + $0xe0] sm:$0xff] }
 0xac4   : > { %v1206_v14 = vpop.f32.mrf.mxu0  ;;  %1469 = vmatprep.mubr.f32.mxu1 %v1381_v7 }
 0xac5   : > { %1216 = vrot.lane.b32.xlu0 %v1208_v8, %s4064_s21  ;;  %1222 = vrot.lane.b32.xlu1 %v1211_v12, %s4064_s21 }
 0xac9   : > { %1218 = vrot.lane.b32.xlu1 %v1209_v21, %s4064_s21 }
 0xb33   : > { %v1221_v22 = vpop.permute.xlu0 %1220 }
 0xb34   : > { %v1230_v48 = vsel %vm1008_vm4, 0.0, %v1221_v22 }
 0xb35   : > { %v4722_v18 = vsel %vm1011_vm6, %v1230_v48, 0.0 }
 0xb36   : > { %v1246_v51 = vmul.f32 %v4722_v18, %v4605_v53  ;;  %v1242_v57 = vmul.f32 %v4722_v18, %v4613_v56  ;;  %v1254_v60 = vmul.f32 %v4722_v18, %v4587_v63  ;;  %v1258_v12 = vmul.f32 %v4722_v18, %v4625_v61 }
 0xb37   : > { %v1217_v26 = vpop.permute.xlu0 %1216  ;;  %v1223_v27 = vpop.permute.xlu1 %1222 }
 0xb38   : > { %v1228_v29 = vsel %vm1008_vm4, 0.0, %v1217_v26  ;;  %v1231_v55 = vsel %vm1008_vm4, 0.0, %v1223_v27 }
 0xb39   : > { %v4699_v30 = vsel %vm1011_vm6, %v1228_v29, 0.0  ;;  %v4737_v58 = vsel %vm1011_vm6, %v1231_v55, 0.0 }
 0xb3a   : > { %1352 = vrot.lane.b32.xlu1 %v4699_v30, %s4063_s12  ;;  %v1244_v33 = vmul.f32 %v4699_v30, %v4605_v53  ;;  %v1252_v41 = vmul.f32 %v4699_v30, %v4587_v63  ;;  %v1247_v62 = vmul.f32 %v4737_v58, %v4605_v53  ;;  %v1240_v1 = vmul.f32 %v4699_v30, %v4613_v56 }
 0xb3b   : > { %v1219_v36 = vpop.permute.xlu1 %1218  ;;  %v1255_v2 = vmul.f32 %v4737_v58, %v4587_v63  ;;  %v1243_v3 = vmul.f32 %v4737_v58, %v4613_v56  ;;  %v1259_v8 = vmul.f32 %v4737_v58, %v4625_v61  ;;  %v1256_v21 = vmul.f32 %v4699_v30, %v4625_v61 }
 0xb3c   : > { %v1229_v37 = vsel %vm1008_vm4, 0.0, %v1219_v36  ;;  %1296 = vrot.lane.b32.xlu0 %v1244_v33, %s4069_s6  ;;  %vm1392_vm4 = vcmask 269312   ;;  %v1239_v7 = vmul.f32 %v4737_v58, %v4566_v32 }
 0xb3d   : > { %v4710_v44 = vsel %vm1011_vm6, %v1229_v37, 0.0 }
 0xb3e   : > { %1340 = vrot.lane.b32.xlu1 %v1252_v41, %s4062_s11  ;;  %v1245_v40 = vmul.f32 %v4710_v44, %v4605_v53  ;;  %v1241_v45 = vmul.f32 %v4710_v44, %v4613_v56  ;;  %v1253_v50 = vmul.f32 %v4710_v44, %v4587_v63  ;;  %v1250_v53 = vmul.f32 %v4722_v18, %v4593_v15 }
 0xb3f   : > { %v1249_v4 = vmul.f32 %v4710_v44, %v4593_v15  ;;  %v1251_v63 = vmul.f32 %v4737_v58, %v4593_v15  ;;  %v1248_v56 = vmul.f32 %v4699_v30, %v4593_v15  ;;  %v1382_v15 = vld [vmem:[%s5811_s1 + $0xe8] sm:$0xff]  ;;  %v1257_v14 = vmul.f32 %v4710_v44, %v4625_v61 }
 0xb40   : > { %1298 = vrot.lane.b32.xlu0 %v1245_v40, %s4069_s6  ;;  %3945 = vmatprep.mubr.msk.f32.mxu0 %vm1392_vm4, %v1382_v15 }
 0xb42   : > { %1354 = vrot.lane.b32.xlu1 %v4710_v44, %s4063_s12 }
 0xb44   : > { %1282 = vrot.lane.b32.xlu0 %v1241_v45, %s4055_s3 }
 0xb46   : > { %1342 = vrot.lane.b32.xlu1 %v1253_v50, %s4062_s11 }
 0xb48   : > { %1300 = vrot.lane.b32.xlu0 %v1246_v51, %s4069_s6 }
 0xb4a   : > { %1356 = vrot.lane.b32.xlu1 %v4722_v18, %s4063_s12 }
 0xb4c   : > { %1284 = vrot.lane.b32.xlu0 %v1242_v57, %s4055_s3 }
 0xb4e   : > { %1344 = vrot.lane.b32.xlu1 %v1254_v60, %s4062_s11 }
 0xb50   : > { %1302 = vrot.lane.b32.xlu0 %v1247_v62, %s4069_s6 }
 0xb52   : > { %1358 = vrot.lane.b32.xlu1 %v4737_v58, %s4063_s12 }
 0xb54   : > { %1280 = vrot.lane.b32.xlu0 %v1240_v1, %s4055_s3 }
 0xb56   : > { %1346 = vrot.lane.b32.xlu1 %v1255_v2, %s4062_s11 }
 0xb58   : > { %1286 = vrot.lane.b32.xlu0 %v1243_v3, %s4055_s3 }
 0xb5a   : > { %1328 = vrot.lane.b32.xlu1 %v1250_v53, %s4067_s24 }
 0xb5c   : > { %1270 = vrot.lane.b32.xlu0 %v4737_v58, %s4057_s4 }
 0xb5e   : > { %1326 = vrot.lane.b32.xlu1 %v1249_v4, %s4067_s24 }
 0xb60   : > { %1268 = vrot.lane.b32.xlu0 %v4722_v18, %s4057_s4 }
 0xb62   : > { %1330 = vrot.lane.b32.xlu1 %v1251_v63, %s4067_s24 }
 0xb64   : > { %1266 = vrot.lane.b32.xlu0 %v4710_v44, %s4057_s4 }
 0xb66   : > { %1324 = vrot.lane.b32.xlu1 %v1248_v56, %s4067_s24 }
 0xb68   : > { %1264 = vrot.lane.b32.xlu0 %v4699_v30, %s4057_s4 }
 0xb6a   : > { %1314 = vrot.lane.b32.xlu1 %v4737_v58, %s4068_s20  ;;  %v1380_v58 = vld [vmem:[%s5811_s1 + $0xd8] sm:$0xff] }
 0xb6c   : > { %1312 = vrot.lane.b32.xlu0 %v4722_v18, %s4068_s20 }
 0xb6e   : > { %1310 = vrot.lane.b32.xlu1 %v4710_v44, %s4068_s20 }
 0xb70   : > { %1308 = vrot.lane.b32.xlu0 %v4699_v30, %s4068_s20 }
 0xb72   : > { %1374 = vrot.lane.b32.xlu1 %v1259_v8, %s4061_s23  ;;  %v1238_v8 = vmul.f32 %v4722_v18, %v4566_v32  ;;  %v1384_v18 = vld [vmem:[%s5811_s1 + $0xf8] sm:$0xff] }
 0xb74   : > { %1372 = vrot.lane.b32.xlu0 %v1258_v12, %s4061_s23 }
 0xb76   : > { %1370 = vrot.lane.b32.xlu1 %v1257_v14, %s4061_s23  ;;  %v1237_v14 = vmul.f32 %v4710_v44, %v4566_v32 }
 0xb78   : > { %1368 = vrot.lane.b32.xlu0 %v1256_v21, %s4061_s23 }
 0xbac   : > { %v1353_v22 = vpop.permute.xlu1 %1352 }
 0xbae   : > { %v1297_v26 = vpop.permute.xlu0 %1296 }
 0xbb0   : > { %v1341_v27 = vpop.permute.xlu1 %1340 }
 0xbb2   : > { %v1299_v29 = vpop.permute.xlu0 %1298 }
 0xbb4   : > { %v1355_v33 = vpop.permute.xlu1 %1354 }
 0xbb6   : > { %v1283_v36 = vpop.permute.xlu0 %1282 }
 0xbb8   : > { %v1343_v37 = vpop.permute.xlu1 %1342 }
 0xbba   : > { %v1301_v41 = vpop.permute.xlu0 %1300 }
 0xbbc   : > { %v1357_v40 = vpop.permute.xlu1 %1356 }
 0xbbe   : > { %v1285_v48 = vpop.permute.xlu0 %1284 }
 0xbc0   : > { %v1345_v45 = vpop.permute.xlu1 %1344 }
 0xbc2   : > { %v1303_v50 = vpop.permute.xlu0 %1302 }
 0xbc4   : > { %v1359_v51 = vpop.permute.xlu1 %1358 }
 0xbc5   : > { %3744 = vmatprep.subr.mxu1 %v1359_v51 }
 0xbc6   : > { %v1281_v55 = vpop.permute.xlu0 %1280  ;;  %3745 = vmatpush3.msra.mxu1 %v1303_v50  ;;  %v1579_v50 = vld [vmem:[%s5811_s1 + $0x5e8] sm:$0xff] }
 0xbc7   : > { %3746 = vmatprep.subr.mxu1 %v1357_v40  ;;  %v1389_v40 = vld [vmem:[%s5811_s1 + $0x120] sm:$0xff] }
 0xbc8   : > { %3747 = vmatpush3.msra.mxu1 %v1301_v41  ;;  %v1347_v61 = vpop.permute.xlu1 %1346  ;;  %v1388_v41 = vld [vmem:[%s5811_s1 + $0x118] sm:$0xff] }
 0xbc9   : > { %3748 = vmatprep.subr.mxu1 %v1355_v33  ;;  %v1386_v33 = vld [vmem:[%s5811_s1 + $0x108] sm:$0xff] }
 0xbca   : > { %v1287_v57 = vpop.permute.xlu0 %1286  ;;  %3749 = vmatpush3.msra.mxu1 %v1299_v29 }
 0xbcb   : > { %3750 = vmatprep.subr.mxu1 %v1353_v22  ;;  %v1236_v22 = vmul.f32 %v4699_v30, %v4566_v32  ;;  %v1383_v32 = vld [vmem:[%s5811_s1 + $0xf0] sm:$0xff] }
 0xbcc   : > { %3751 = vmatpush3.msra.mxu1 %v1297_v26  ;;  %v1329_v60 = vpop.permute.xlu1 %1328  ;;  %v1387_v30 = vld [vmem:[%s5811_s1 + $0x110] sm:$0xff] }
 0xbcd   : > { %3752 = vmatprep.subr.mxu1 %v1347_v61 }
 0xbce   : > { %v1271_v62 = vpop.permute.xlu0 %1270  ;;  %3753 = vmatpush3.msra.mxu1 %v1287_v57 }
 0xbcf   : > { %3754 = vmatprep.subr.mxu1 %v1345_v45  ;;  %v1580_v45 = vld [vmem:[%s5811_s1 + $0x600] sm:$0xff] }
 0xbd0   : > { %3755 = vmatpush3.msra.mxu1 %v1285_v48  ;;  %v1327_v1 = vpop.permute.xlu1 %1326  ;;  %v1391_v48 = vld [vmem:[%s5811_s1 + $0x130] sm:$0xff] }
 0xbd1   : > { %3756 = vmatprep.subr.mxu1 %v1343_v37  ;;  %v1390_v37 = vld [vmem:[%s5811_s1 + $0x128] sm:$0xff] }
 0xbd2   : > { %v1269_v2 = vpop.permute.xlu0 %1268  ;;  %3757 = vmatpush3.msra.mxu1 %v1283_v36  ;;  %v1385_v36 = vld [vmem:[%s5811_s1 + $0x100] sm:$0xff] }
 0xbd3   : > { %3758 = vmatprep.subr.mxu1 %v1341_v27 }
 0xbd4   : > { %3759 = vmatpush3.msra.mxu1 %v1281_v55  ;;  %v1331_v3 = vpop.permute.xlu1 %1330 }
 0xbd5   : > { %3760 = vmatprep.subr.mxu1 %v1331_v3 }
 0xbd6   : > { %v1267_v53 = vpop.permute.xlu0 %1266  ;;  %3761 = vmatpush3.msra.mxu1 %v1271_v62 }
 0xbd7   : > { %3762 = vmatprep.subr.mxu1 %v1329_v60 }
 0xbd8   : > { %3763 = vmatpush3.msra.mxu1 %v1269_v2  ;;  %v1325_v4 = vpop.permute.xlu1 %1324 }
 0xbd9   : > { %3764 = vmatprep.subr.mxu1 %v1327_v1 }
 0xbda   : > { %v1265_v63 = vpop.permute.xlu0 %1264  ;;  %3765 = vmatpush3.msra.mxu1 %v1267_v53 }
 0xbdb   : > { %3766 = vmatprep.subr.mxu1 %v1325_v4 }
 0xbdc   : > { %3767 = vmatpush3.msra.mxu1 %v1265_v63  ;;  %v1315_v56 = vpop.permute.xlu1 %1314 }
 0xbdd   : > { %3768 = vmatprep.subr.mxu1 %v1315_v56 }
 0xbde   : > { %v1313_v15 = vpop.permute.xlu0 %1312  ;;  %3769 = vmatpush3.msra.mxu1 %v1239_v7 }
 0xbdf   : > { %3770 = vmatprep.subr.mxu1 %v1313_v15 }
 0xbe0   : > { %3771 = vmatpush3.msra.mxu1 %v1238_v8  ;;  %v1311_v12 = vpop.permute.xlu1 %1310 }
 0xbe1   : > { %3772 = vmatprep.subr.mxu1 %v1311_v12 }
 0xbe2   : > { %v1309_v21 = vpop.permute.xlu0 %1308  ;;  %3773 = vmatpush3.msra.mxu1 %v1237_v14 }
 0xbe3   : > { %3774 = vmatprep.subr.mxu1 %v1309_v21 }
 0xbe4   : > { %3775 = vmatpush3.msra.mxu1 %v1236_v22  ;;  %v1375_v26 = vpop.permute.xlu1 %1374 }
 0xbe5   : > { %1470 = vmatmul.mubr.f32.vlgmr.msra.gmra.mxu1 %v1380_v58  ;;  %3937 = vmatprep.subr.mxu0 %v1375_v26 }
 0xbe6   : > { %v1373_v44 = vpop.permute.xlu0 %1372  ;;  %3938 = vmatpush3.msra.mxu0 %v1375_v26  ;;  %1474 = vmatprep.mubr.f32.mxu1 %v1384_v18 }
 0xbe7   : > { %3939 = vmatprep.subr.mxu0 %v1373_v44 }
 0xbe8   : > { %3940 = vmatpush3.msra.mxu0 %v1373_v44  ;;  %v1371_v27 = vpop.permute.xlu1 %1370 }
 0xbe9   : > { %1475 = vmatmul.mubr.f32.gmra.mxu1 %v1383_v32  ;;  %3941 = vmatprep.subr.mxu0 %v1371_v27 }
 0xbea   : > { %v1369_v29 = vpop.permute.xlu0 %1368  ;;  %3942 = vmatpush3.msra.mxu0 %v1371_v27  ;;  %1479 = vmatprep.mubr.f32.mxu1 %v1387_v30 }
 0xbeb   : > { %3943 = vmatprep.subr.mxu0 %v1369_v29 }
 0xbec   : > { %3944 = vmatpush3.msra.mxu0 %v1369_v29 }
 0xbed   : > { %1480 = vmatmul.mubr.f32.gmra.mxu1 %v1386_v33  ;;  %3946 = vmatmul.mubr.msk.f32.vlgmr.msra.gmra.mxu0 %vm1392_vm4, %v1385_v36 }
 0xbee   : > { %1484 = vmatprep.mubr.f32.mxu1 %v1390_v37  ;;  %3948 = vmatprep.mubr.msk.f32.mxu0 %vm1392_vm4, %v1388_v41 }
 0xbef   : > { %3951 = vmatprep.subr.mxu0 %v1580_v45 }
 0xbf0   : > { %3952 = vmatpush3.msra.mxu0 %v1580_v45 }
 0xbf1   : > { %1485 = vmatmul.mubr.f32.gmra.mxu1 %v1389_v40  ;;  %3949 = vmatmul.mubr.msk.f32.gmra.mxu0 %vm1392_vm4, %v1391_v48 }
 0xbf2   : > { %3953 = vmatprep.subr.mxu0 %v1579_v50 }
 0xbf3   : > { %3954 = vmatpush3.msra.mxu0 %v1579_v50 }
 0xbf4   : > { %3961 = vmatprep.subr.msk.mxu0 %vm359_vm1, %v4050_v24 }
 0xca5   : > { %v3776_v51 = vpop.f32.mrf.mxu1 }
 0xca7   : > { %v3777_v55 = vpop.f32.mrf.mxu1 }
 0xca8   : > { %v3778_v2 = vadd.f32 %v3777_v55, %v3776_v51 }
 0xca9   : > { %v3779_v61 = vpop.f32.mrf.mxu1 }
 0xcab   : > { %v3780_v57 = vpop.f32.mrf.mxu1 }
 0xcac   : > { %v3781_v60 = vadd.f32 %v3780_v57, %v3779_v61 }
 0xcad   : > { %v3782_v62 = vpop.f32.mrf.mxu1  ;;  %v3947_v1 = vpop.f32.mrf.mxu0 }
 0xcae   : > { %v1562_v3 = vadd.f32 %v3947_v1, %v3781_v60 }
 0xcaf   : > { %v3783_v53 = vpop.f32.mrf.mxu1  ;;  %v1556_v4 = vpop.f32.mrf.mxu0 }
 0xcb0   : > { %v1557_v63 = vadd.f32 %v3778_v2, %v1556_v4  ;;  %v3784_v15 = vadd.f32 %v3783_v53, %v3782_v62  ;;  %v1576_v12 = vmax.f32 %v1562_v3, 0.0 }
 0xcb1   : > { %v3785_v56 = vpop.f32.mrf.mxu1  ;;  %v3950_v7 = vpop.f32.mrf.mxu0 }
 0xcb2   : > { %v1575_v8 = vmax.f32 %v1557_v63, 0.0 }
 0xcb3   : > { %v3786_v14 = vpop.f32.mrf.mxu1  ;;  %v1566_v21 = vpop.f32.mrf.mxu0 }
 0xcb4   : > { %v3787_v22 = vadd.f32 %v3786_v14, %v3785_v56  ;;  %v1567_v58 = vadd.f32 %v3784_v15, %v1566_v21  ;;  %3955 = vmatprep.mubr.msk.f32.mxu0 %vm205_vm5, %v1575_v8 }
 0xcb5   : > { %3956 = vmatmul.mubr.msk.f32.vlgmr.msra.gmra.mxu0 %vm205_vm5, %v1576_v12 }
 0xcb6   : > { %v1572_v18 = vadd.f32 %v3950_v7, %v3787_v22  ;;  %v1577_v26 = vmax.f32 %v1567_v58, 0.0  ;;  %3962 = vmatpush3.msk.msra.mxu0 %vm359_vm1, %v4050_v24  ;;  %v1847_v22 = vld [vmem:[%s5811_s1 + $0x140] sm:$0xff] }
 0xcb7   : > { %1922 = vmatprep.mubr.f32.mxu1 %v1847_v22 }
 0xcb8   : > { %v1578_v44 = vmax.f32 %v1572_v18, 0.0  ;;  %3958 = vmatprep.mubr.msk.f32.mxu0 %vm205_vm5, %v1577_v26  ;;  %v1848_v18 = vld [vmem:[%s5811_s1 + $0x148] sm:$0xff] }
 0xcba   : > { %3959 = vmatmul.mubr.msk.f32.gmra.mxu0 %vm205_vm5, %v1578_v44 }
 0xcbb   : > { %3971 = vmatprep.mubr.msk.f32.mxu0 %vm1392_vm4, %v1848_v18 }
 0xd75   : > { %v3957_v32 = vpop.f32.mrf.mxu0 }
 0xd77   : > { %v1659_v30 = vpop.f32.mrf.mxu0 }
 0xd7a   : > { %v3960_v27 = vpop.f32.mrf.mxu0 }
 0xd7b   : > { %1688 = vrot.lane.b32.xlu1 %v3960_v27, %s4059_s22 }
 0xd7c   : > { %v1669_v29 = vpop.f32.mrf.mxu0 }
 0xd7d   : > { %1686 = vrot.lane.b32.xlu0 %v1669_v29, %s4059_s22 }
 0xd7f   : > { %1684 = vrot.lane.b32.xlu1 %v3957_v32, %s4059_s22 }
 0xd81   : > { %1682 = vrot.lane.b32.xlu0 %v1659_v30, %s4059_s22 }
 0xded   : > { %v1689_v33 = vpop.permute.xlu1 %1688 }
 0xdee   : > { %v1697_v60 = vsel %vm574_vm2, 0.0, %v1689_v33 }
 0xdef   : > { %v1687_v36 = vpop.permute.xlu0 %1686  ;;  %v4894_v2 = vsel %vm355_vm15, %v1697_v60, 0.0 }
 0xdf0   : > { %v1696_v3 = vsel %vm574_vm2, 0.0, %v1687_v36  ;;  %v1713_v53 = vmul.f32 %v4894_v2, %v4411_v9  ;;  %v1709_v63 = vmul.f32 %v4894_v2, %v4420_v16  ;;  %v1721_v56 = vmul.f32 %v4894_v2, %v4405_v6 }
 0xdf1   : > { %v1685_v37 = vpop.permute.xlu1 %1684  ;;  %v4904_v4 = vsel %vm355_vm15, %v1696_v3, 0.0  ;;  %v1717_v15 = vmul.f32 %v4894_v2, %v4403_v5  ;;  %v1725_v26 = vmul.f32 %v4894_v2, %v4397_v0 }
 0xdf2   : > { %v1695_v41 = vsel %vm574_vm2, 0.0, %v1685_v37  ;;  %v1712_v7 = vmul.f32 %v4904_v4, %v4411_v9  ;;  %v1720_v8 = vmul.f32 %v4904_v4, %v4405_v6  ;;  %v1708_v12 = vmul.f32 %v4904_v4, %v4420_v16 }
 0xdf3   : > { %v4865_v40 = vsel %vm355_vm15, %v1695_v41, 0.0  ;;  %v1683_v48 = vpop.permute.xlu0 %1682  ;;  %v1716_v21 = vmul.f32 %v4904_v4, %v4403_v5  ;;  %v1724_v44 = vmul.f32 %v4904_v4, %v4397_v0 }
 0xdf4   : > { %v1694_v45 = vsel %vm574_vm2, 0.0, %v1683_v48  ;;  %1820 = vrot.lane.b32.xlu1 %v4865_v40, %s4049_s26  ;;  %v1711_v50 = vmul.f32 %v4865_v40, %v4411_v9  ;;  %v1707_v55 = vmul.f32 %v4865_v40, %v4420_v16  ;;  %v1719_v61 = vmul.f32 %v4865_v40, %v4405_v6 }
 0xdf5   : > { %v4874_v51 = vsel %vm355_vm15, %v1694_v45, 0.0  ;;  %v1715_v14 = vmul.f32 %v4865_v40, %v4403_v5  ;;  %v1723_v32 = vmul.f32 %v4865_v40, %v4397_v0 }
 0xdf6   : > { %1764 = vrot.lane.b32.xlu0 %v1711_v50, %s4062_s11  ;;  %v1710_v57 = vmul.f32 %v4874_v51, %v4411_v9  ;;  %v1718_v62 = vmul.f32 %v4874_v51, %v4405_v6  ;;  %v1706_v1 = vmul.f32 %v4874_v51, %v4420_v16  ;;  %v1714_v58 = vmul.f32 %v4874_v51, %v4403_v5 }
 0xdf7   : > { %v1722_v30 = vmul.f32 %v4874_v51, %v4397_v0 }
 0xdf8   : > { %1818 = vrot.lane.b32.xlu1 %v4874_v51, %s4049_s26 }
 0xdfa   : > { %1748 = vrot.lane.b32.xlu0 %v1707_v55, %s4055_s3 }
 0xdfc   : > { %1808 = vrot.lane.b32.xlu1 %v1719_v61, %s4054_s30 }
 0xdfe   : > { %1762 = vrot.lane.b32.xlu0 %v1710_v57, %s4062_s11 }
 0xe00   : > { %1806 = vrot.lane.b32.xlu1 %v1718_v62, %s4054_s30 }
 0xe02   : > { %1746 = vrot.lane.b32.xlu0 %v1706_v1, %s4055_s3 }
 0xe04   : > { %1824 = vrot.lane.b32.xlu1 %v4894_v2, %s4049_s26 }
 0xe06   : > { %1768 = vrot.lane.b32.xlu0 %v1713_v53, %s4062_s11 }
 0xe08   : > { %1822 = vrot.lane.b32.xlu1 %v4904_v4, %s4049_s26 }
 0xe0a   : > { %1752 = vrot.lane.b32.xlu0 %v1709_v63, %s4055_s3 }
 0xe0c   : > { %1812 = vrot.lane.b32.xlu1 %v1721_v56, %s4054_s30 }
 0xe0e   : > { %1766 = vrot.lane.b32.xlu0 %v1712_v7, %s4062_s11 }
 0xe10   : > { %1796 = vrot.lane.b32.xlu1 %v1717_v15, %s4061_s23 }
 0xe12   : > { %1736 = vrot.lane.b32.xlu0 %v4894_v2, %s4057_s4 }
 0xe14   : > { %1810 = vrot.lane.b32.xlu1 %v1720_v8, %s4054_s30 }
 0xe16   : > { %1750 = vrot.lane.b32.xlu0 %v1708_v12, %s4055_s3 }
 0xe18   : > { %1792 = vrot.lane.b32.xlu1 %v1715_v14, %s4061_s23  ;;  %v4977_v14 = vld [vmem:[%s5811_s1 + $0x708] ss:$0 sm:$0xff] }
 0xe1a   : > { %1734 = vrot.lane.b32.xlu0 %v4904_v4, %s4057_s4 }
 0xe1c   : > { %1794 = vrot.lane.b32.xlu1 %v1716_v21, %s4061_s23  ;;  %v1705_v21 = vmul.f32 %v4977_v14, %v4894_v2 }
 0xe1e   : > { %1732 = vrot.lane.b32.xlu0 %v4865_v40, %s4057_s4 }
 0xe20   : > { %1790 = vrot.lane.b32.xlu1 %v1714_v58, %s4061_s23  ;;  %v1704_v58 = vmul.f32 %v4977_v14, %v4904_v4 }
 0xe22   : > { %1730 = vrot.lane.b32.xlu0 %v4874_v51, %s4057_s4 }
 0xe24   : > { %1780 = vrot.lane.b32.xlu1 %v4894_v2, %s4063_s12  ;;  %v1846_v2 = vld [vmem:[%s5811_s1 + $0x138] sm:$0xff] }
 0xe26   : > { %1778 = vrot.lane.b32.xlu0 %v4904_v4, %s4063_s12  ;;  %v1850_v4 = vld [vmem:[%s5811_s1 + $0x158] sm:$0xff] }
 0xe28   : > { %1776 = vrot.lane.b32.xlu1 %v4865_v40, %s4063_s12 }
 0xe2a   : > { %1774 = vrot.lane.b32.xlu0 %v4874_v51, %s4063_s12 }
 0xe2c   : > { %1840 = vrot.lane.b32.xlu1 %v1725_v26, %s4053_s29  ;;  %v1703_v26 = vmul.f32 %v4977_v14, %v4865_v40 }
 0xe2e   : > { %1838 = vrot.lane.b32.xlu0 %v1724_v44, %s4053_s29 }
 0xe30   : > { %1836 = vrot.lane.b32.xlu1 %v1723_v32, %s4053_s29  ;;  %v1702_v32 = vmul.f32 %v4977_v14, %v4874_v51  ;;  %v1849_v51 = vld [vmem:[%s5811_s1 + $0x150] sm:$0xff] }
 0xe32   : > { %1834 = vrot.lane.b32.xlu0 %v1722_v30, %s4053_s29 }
 0xe34   : > { %2036 = vrot.lane.b32.xlu1 %v4541_v59, %s4059_s22 }
 0xe36   : > { %2034 = vrot.lane.b32.xlu0 %v4530_v52, %s4059_s22 }
 0xe66   : > { %v1821_v27 = vpop.permute.xlu1 %1820 }
 0xe68   : > { %v1765_v29 = vpop.permute.xlu0 %1764 }
 0xe6a   : > { %v1819_v33 = vpop.permute.xlu1 %1818 }
 0xe6c   : > { %v1749_v36 = vpop.permute.xlu0 %1748 }
 0xe6e   : > { %v1809_v37 = vpop.permute.xlu1 %1808 }
 0xe70   : > { %v1763_v41 = vpop.permute.xlu0 %1762 }
 0xe72   : > { %v1807_v48 = vpop.permute.xlu1 %1806 }
 0xe74   : > { %v1747_v45 = vpop.permute.xlu0 %1746 }
 0xe76   : > { %v1825_v50 = vpop.permute.xlu1 %1824 }
 0xe77   : > { %3803 = vmatprep.subr.mxu1 %v1825_v50 }
 0xe78   : > { %v1769_v55 = vpop.permute.xlu0 %1768 }
 0xe79   : > { %3804 = vmatpush3.msra.mxu1 %v1769_v55 }
 0xe7a   : > { %v1823_v61 = vpop.permute.xlu1 %1822 }
 0xe7b   : > { %3805 = vmatprep.subr.mxu1 %v1823_v61 }
 0xe7c   : > { %v1753_v57 = vpop.permute.xlu0 %1752 }
 0xe7e   : > { %v1813_v60 = vpop.permute.xlu1 %1812 }
 0xe80   : > { %v1767_v59 = vpop.permute.xlu0 %1766 }
 0xe81   : > { %3806 = vmatpush3.msra.mxu1 %v1767_v59 }
 0xe82   : > { %v1797_v62 = vpop.permute.xlu1 %1796  ;;  %3807 = vmatprep.subr.mxu1 %v1821_v27 }
 0xe83   : > { %3808 = vmatpush3.msra.mxu1 %v1765_v29 }
 0xe84   : > { %3809 = vmatprep.subr.mxu1 %v1819_v33  ;;  %v1737_v52 = vpop.permute.xlu0 %1736  ;;  %v1851_v33 = vld [vmem:[%s5811_s1 + $0x160] sm:$0xff] }
 0xe85   : > { %3810 = vmatpush3.msra.mxu1 %v1763_v41 }
 0xe86   : > { %v1811_v1 = vpop.permute.xlu1 %1810  ;;  %3811 = vmatprep.subr.mxu1 %v1813_v60 }
 0xe87   : > { %3812 = vmatpush3.msra.mxu1 %v1753_v57 }
 0xe88   : > { %3813 = vmatprep.subr.mxu1 %v1811_v1  ;;  %v1751_v3 = vpop.permute.xlu0 %1750 }
 0xe89   : > { %3814 = vmatpush3.msra.mxu1 %v1751_v3 }
 0xe8a   : > { %v1793_v53 = vpop.permute.xlu1 %1792  ;;  %3815 = vmatprep.subr.mxu1 %v1809_v37 }
 0xe8b   : > { %3816 = vmatpush3.msra.mxu1 %v1749_v36 }
 0xe8c   : > { %3817 = vmatprep.subr.mxu1 %v1807_v48  ;;  %v1735_v63 = vpop.permute.xlu0 %1734 }
 0xe8d   : > { %3818 = vmatpush3.msra.mxu1 %v1747_v45 }
 0xe8e   : > { %v1795_v56 = vpop.permute.xlu1 %1794  ;;  %3819 = vmatprep.subr.mxu1 %v1797_v62 }
 0xe8f   : > { %3820 = vmatpush3.msra.mxu1 %v1737_v52 }
 0xe90   : > { %3821 = vmatprep.subr.mxu1 %v1795_v56  ;;  %v1733_v7 = vpop.permute.xlu0 %1732 }
 0xe91   : > { %3822 = vmatpush3.msra.mxu1 %v1735_v63 }
 0xe92   : > { %v1791_v15 = vpop.permute.xlu1 %1790  ;;  %3823 = vmatprep.subr.mxu1 %v1793_v53 }
 0xe93   : > { %3824 = vmatpush3.msra.mxu1 %v1733_v7 }
 0xe94   : > { %3825 = vmatprep.subr.mxu1 %v1791_v15  ;;  %v1731_v8 = vpop.permute.xlu0 %1730 }
 0xe95   : > { %3826 = vmatpush3.msra.mxu1 %v1731_v8 }
 0xe96   : > { %v1781_v12 = vpop.permute.xlu1 %1780 }
 0xe97   : > { %3827 = vmatprep.subr.mxu1 %v1781_v12 }
 0xe98   : > { %3828 = vmatpush3.msra.mxu1 %v1705_v21  ;;  %v1779_v22 = vpop.permute.xlu0 %1778 }
 0xe99   : > { %3829 = vmatprep.subr.mxu1 %v1779_v22 }
 0xe9a   : > { %v1777_v18 = vpop.permute.xlu1 %1776  ;;  %3830 = vmatpush3.msra.mxu1 %v1704_v58 }
 0xe9b   : > { %3831 = vmatprep.subr.mxu1 %v1777_v18 }
 0xe9c   : > { %3832 = vmatpush3.msra.mxu1 %v1703_v26  ;;  %v1775_v44 = vpop.permute.xlu0 %1774 }
 0xe9d   : > { %3833 = vmatprep.subr.mxu1 %v1775_v44 }
 0xe9e   : > { %v1841_v30 = vpop.permute.xlu1 %1840  ;;  %3834 = vmatpush3.msra.mxu1 %v1702_v32 }
 0xe9f   : > { %1923 = vmatmul.mubr.f32.vlgmr.msra.gmra.mxu1 %v1846_v2  ;;  %3963 = vmatprep.subr.mxu0 %v1841_v30 }
 0xea0   : > { %3964 = vmatpush3.msra.mxu0 %v1841_v30  ;;  %v1839_v40 = vpop.permute.xlu0 %1838  ;;  %1927 = vmatprep.mubr.f32.mxu1 %v1850_v4 }
 0xea1   : > { %3965 = vmatprep.subr.mxu0 %v1839_v40 }
 0xea2   : > { %v1837_v27 = vpop.permute.xlu1 %1836  ;;  %3966 = vmatpush3.msra.mxu0 %v1839_v40 }
 0xea3   : > { %1928 = vmatmul.mubr.f32.gmra.mxu1 %v1849_v51  ;;  %3967 = vmatprep.subr.mxu0 %v1837_v27 }
 0xea4   : > { %3968 = vmatpush3.msra.mxu0 %v1837_v27  ;;  %v1835_v29 = vpop.permute.xlu0 %1834 }
 0xea5   : > { %3969 = vmatprep.subr.mxu0 %v1835_v29 }
 0xea6   : > { %3970 = vmatpush3.msra.mxu0 %v1835_v29  ;;  %v2037_v41 = vpop.permute.xlu1 %2036 }
 0xea7   : > { %3972 = vmatmul.mubr.msk.f32.vlgmr.msra.gmra.mxu0 %vm1392_vm4, %v1851_v33  ;;  %v2041_v55 = vsel %vm574_vm2, 0.0, %v2037_v41 }
 0xea8   : > { %v2035_v45 = vpop.permute.xlu0 %2034  ;;  %v5003_v52 = vsel %vm355_vm15, %v2041_v55, 0.0  ;;  %v2183_v55 = vld [vmem:[%s5811_s1 + $0x170] sm:$0xff] }
 0xea9   : > { %v2040_v60 = vsel %vm574_vm2, 0.0, %v2035_v45  ;;  %v2055_v63 = vmul.f32 %v5003_v52, %v4397_v0  ;;  %v2053_v7 = vmul.f32 %v5003_v52, %v4405_v6  ;;  %v2051_v8 = vmul.f32 %v5003_v52, %v4403_v5  ;;  %2260 = vmatprep.mubr.f32.mxu0 %v2183_v55 }
 0xeaa   : > { %v5007_v53 = vsel %vm355_vm15, %v2040_v60, 0.0  ;;  %v2049_v21 = vmul.f32 %v5003_v52, %v4411_v9  ;;  %v2047_v58 = vmul.f32 %v5003_v52, %v4420_v16 }
 0xeab   : > { %v2054_v56 = vmul.f32 %v5007_v53, %v4397_v0  ;;  %v2052_v15 = vmul.f32 %v5007_v53, %v4405_v6  ;;  %v2050_v12 = vmul.f32 %v5007_v53, %v4403_v5  ;;  %v2048_v22 = vmul.f32 %v5007_v53, %v4411_v9 }
 0xeac   : > { %v2046_v18 = vmul.f32 %v5007_v53, %v4420_v16 }
 0xf5f   : > { %v3835_v36 = vpop.f32.mrf.mxu1 }
 0xf61   : > { %v3836_v37 = vpop.f32.mrf.mxu1 }
 0xf62   : > { %v3837_v59 = vadd.f32 %v3836_v37, %v3835_v36 }
 0xf63   : > { %v3838_v48 = vpop.f32.mrf.mxu1 }
 0xf65   : > { %v3839_v50 = vpop.f32.mrf.mxu1 }
 0xf66   : > { %v3840_v61 = vadd.f32 %v3839_v50, %v3838_v48 }
 0xf67   : > { %v3973_v57 = vpop.f32.mrf.mxu0 }
 0xf68   : > { %v2005_v62 = vadd.f32 %v3973_v57, %v3840_v61 }
 0xf69   : > { %v1999_v1 = vpop.f32.mrf.mxu0 }
 0xf6a   : > { %v2000_v3 = vadd.f32 %v3837_v59, %v1999_v1  ;;  %2012 = vrot.lane.b32.xlu1 %v2005_v62, %s4059_s22  ;;  %v2184_v59 = vld [vmem:[%s5811_s1 + $0x178] sm:$0xff] }
 0xf6b   : > { %3984 = vmatprep.mubr.msk.f32.mxu1 %vm1392_vm4, %v2184_v59 }
 0xf6c   : > { %2010 = vrot.lane.b32.xlu0 %v2000_v3, %s4059_s22 }
 0xf6e   : > { %2166 = vrot.lane.b32.xlu1 %v2055_v63, %s4057_s4 }
 0xf70   : > { %2164 = vrot.lane.b32.xlu0 %v2054_v56, %s4057_s4 }
 0xf72   : > { %2158 = vrot.lane.b32.xlu1 %v2053_v7, %s4054_s30 }
 0xf76   : > { %2156 = vrot.lane.b32.xlu1 %v2052_v15, %s4054_s30 }
 0xf7a   : > { %2150 = vrot.lane.b32.xlu1 %v2051_v8, %s4061_s23 }
 0xf7e   : > { %2148 = vrot.lane.b32.xlu1 %v2050_v12, %s4061_s23 }
 0xf82   : > { %2142 = vrot.lane.b32.xlu1 %v5003_v52, %s4063_s12 }
 0xf86   : > { %2140 = vrot.lane.b32.xlu1 %v5007_v53, %s4063_s12 }
 0xf8a   : > { %2136 = vrot.lane.b32.xlu1 %v2049_v21, %s4062_s11 }
 0xf8e   : > { %2134 = vrot.lane.b32.xlu1 %v2048_v22, %s4062_s11 }
 0xf92   : > { %2128 = vrot.lane.b32.xlu1 %v2047_v58, %s4055_s3 }
 0xf96   : > { %2126 = vrot.lane.b32.xlu1 %v2046_v18, %s4055_s3 }
 0xf9a   : > { %2120 = vrot.lane.b32.xlu1 %v5003_v52, %s4057_s4 }
 0xf9e   : > { %2118 = vrot.lane.b32.xlu1 %v5007_v53, %s4057_s4 }
 0xfdc   : > { %v2013_v26 = vpop.permute.xlu1 %2012 }
 0xfdd   : > { %v2017_v44 = vsel %vm574_vm2, 0.0, %v2013_v26 }
 0xfde   : > { %v5050_v32 = vsel %vm355_vm15, %v2017_v44, 0.0  ;;  %v2011_v2 = vpop.permute.xlu0 %2010 }
 0xfdf   : > { %v2016_v4 = vsel %vm574_vm2, 0.0, %v2011_v2  ;;  %2060 = vrot.lane.b32.xlu1 %v5050_v32, %s4057_s4  ;;  %v2031_v51 = vmul.f32 %v5050_v32, %v4397_v0  ;;  %v2029_v41 = vmul.f32 %v5050_v32, %v4405_v6  ;;  %v2027_v48 = vmul.f32 %v5050_v32, %v4403_v5 }
 0xfe0   : > { %v5056_v30 = vsel %vm355_vm15, %v2016_v4, 0.0  ;;  %v2167_v40 = vpop.permute.xlu1 %2166  ;;  %v2025_v50 = vmul.f32 %v5050_v32, %v4411_v9  ;;  %v2023_v61 = vmul.f32 %v5050_v32, %v4420_v16  ;;  %v2021_v55 = vmul.f32 %v4977_v14, %v5050_v32 }
 0xfe1   : > { %2102 = vrot.lane.b32.xlu0 %v5056_v30, %s4049_s26  ;;  %v2028_v29 = vmul.f32 %v5056_v30, %v4405_v6  ;;  %v2026_v36 = vmul.f32 %v5056_v30, %v4403_v5  ;;  %v2024_v37 = vmul.f32 %v5056_v30, %v4411_v9  ;;  %v2022_v45 = vmul.f32 %v5056_v30, %v4420_v16 }
 0xfe2   : > { %v2165_v33 = vpop.permute.xlu0 %2164  ;;  %v2030_v60 = vmul.f32 %v5056_v30, %v4397_v0 }
 0xfe3   : > { %2112 = vrot.lane.b32.xlu1 %v2031_v51, %s4053_s29 }
 0xfe4   : > { %v2159_v27 = vpop.permute.xlu1 %2158 }
 0xfe5   : > { %3848 = vmatprep.subr.mxu0 %v2159_v27  ;;  %2080 = vrot.lane.b32.xlu0 %v5056_v30, %s4063_s12 }
 0xfe7   : > { %2176 = vrot.lane.b32.xlu1 %v4050_v24, %s4049_s26 }
 0xfe8   : > { %v2157_v57 = vpop.permute.xlu1 %2156 }
 0xfe9   : > { %2096 = vrot.lane.b32.xlu0 %v2028_v29, %s4054_s30 }
 0xfeb   : > { %2172 = vrot.lane.b32.xlu1 %v2165_v33, %s4049_s26 }
 0xfec   : > { %v2151_v62 = vpop.permute.xlu1 %2150 }
 0xfed   : > { %2088 = vrot.lane.b32.xlu0 %v2026_v36, %s4061_s23 }
 0xfef   : > { %2168 = vrot.lane.b32.xlu1 %v5007_v53, %s4049_s26 }
 0xff0   : > { %v2149_v1 = vpop.permute.xlu1 %2148 }
 0xff1   : > { %2074 = vrot.lane.b32.xlu0 %v2024_v37, %s4062_s11 }
 0xff4   : > { %v2143_v3 = vpop.permute.xlu1 %2142 }
 0xff5   : > { %2104 = vrot.lane.b32.xlu0 %v5050_v32, %s4049_s26 }
 0xff8   : > { %v2141_v63 = vpop.permute.xlu1 %2140 }
 0xff9   : > { %2082 = vrot.lane.b32.xlu0 %v5050_v32, %s4063_s12  ;;  %v2185_v32 = vld [vmem:[%s5811_s1 + $0x180] sm:$0xff] }
 0xffc   : > { %v2137_v56 = vpop.permute.xlu1 %2136 }
 0xffd   : > { %2098 = vrot.lane.b32.xlu0 %v2029_v41, %s4054_s30 }
0x1000   : > { %v2135_v7 = vpop.permute.xlu1 %2134 }
0x1001   : > { %2090 = vrot.lane.b32.xlu0 %v2027_v48, %s4061_s23  ;;  %v2045_v48 = vmul.f32 %v4977_v14, %v5003_v52 }
0x1004   : > { %v2129_v15 = vpop.permute.xlu1 %2128 }
0x1005   : > { %2066 = vrot.lane.b32.xlu0 %v2022_v45, %s4055_s3 }
0x1008   : > { %v2127_v8 = vpop.permute.xlu1 %2126 }
0x1009   : > { %2076 = vrot.lane.b32.xlu0 %v2025_v50, %s4062_s11  ;;  %v2044_v50 = vmul.f32 %v4977_v14, %v5007_v53  ;;  %v2186_v53 = vld [vmem:[%s5811_s1 + $0x188] sm:$0xff] }
0x100c   : > { %v2121_v12 = vpop.permute.xlu1 %2120 }
0x100d   : > { %2068 = vrot.lane.b32.xlu0 %v2023_v61, %s4055_s3 }
0x1010   : > { %v2119_v21 = vpop.permute.xlu1 %2118 }
0x1011   : > { %2058 = vrot.lane.b32.xlu0 %v5056_v30, %s4057_s4 }
0x1015   : > { %2110 = vrot.lane.b32.xlu0 %v2030_v60, %s4053_s29 }
0x1019   : > { %2174 = vrot.lane.b32.xlu0 %v2167_v40, %s4049_s26 }
0x101d   : > { %2170 = vrot.lane.b32.xlu0 %v5003_v52, %s4049_s26  ;;  %v2182_v52 = vld [vmem:[%s5811_s1 + $0x168] sm:$0xff] }
0x1051   : > { %v2061_v22 = vpop.permute.xlu1 %2060 }
0x1053   : > { %v2103_v58 = vpop.permute.xlu0 %2102 }
0x1055   : > { %v2113_v18 = vpop.permute.xlu1 %2112 }
0x1057   : > { %v2081_v26 = vpop.permute.xlu0 %2080 }
0x1059   : > { %v2177_v44 = vpop.permute.xlu1 %2176 }
0x105a   : > { %3974 = vmatprep.subr.msk.mxu1 %vm359_vm1, %v2177_v44 }
0x105b   : > { %v2097_v2 = vpop.permute.xlu0 %2096  ;;  %3975 = vmatpush3.msk.msra.mxu1 %vm359_vm1, %v2177_v44 }
0x105d   : > { %v2173_v60 = vpop.permute.xlu1 %2172 }
0x105f   : > { %v2089_v4 = vpop.permute.xlu0 %2088 }
0x1063   : > { %v2075_v40 = vpop.permute.xlu0 %2074 }
0x1067   : > { %v2105_v51 = vpop.permute.xlu0 %2104 }
0x1068   : > { %3849 = vmatpush3.msra.mxu0 %v2105_v51 }
0x1069   : > { %3850 = vmatprep.subr.mxu0 %v2157_v57  ;;  %v2020_v57 = vmul.f32 %v4977_v14, %v5056_v30 }
0x106a   : > { %3851 = vmatpush3.msra.mxu0 %v2103_v58 }
0x106b   : > { %3852 = vmatprep.subr.mxu0 %v2151_v62  ;;  %v2083_v27 = vpop.permute.xlu0 %2082  ;;  %v2169_v62 = vpop.permute.xlu1 %2168 }
0x106f   : > { %v2099_v29 = vpop.permute.xlu0 %2098 }
0x1070   : > { %3853 = vmatpush3.msra.mxu0 %v2099_v29 }
0x1071   : > { %3854 = vmatprep.subr.mxu0 %v2149_v1  ;;  %v2187_v1 = vld [vmem:[%s5811_s1 + $0x190] sm:$0xff] }
0x1072   : > { %3855 = vmatpush3.msra.mxu0 %v2097_v2 }
0x1073   : > { %3856 = vmatprep.subr.mxu0 %v2143_v3  ;;  %v2091_v33 = vpop.permute.xlu0 %2090 }
0x1074   : > { %3857 = vmatpush3.msra.mxu0 %v2091_v33 }
0x1075   : > { %3858 = vmatprep.subr.mxu0 %v2141_v63 }
0x1076   : > { %3859 = vmatpush3.msra.mxu0 %v2089_v4 }
0x1077   : > { %3860 = vmatprep.subr.mxu0 %v2137_v56  ;;  %v2067_v36 = vpop.permute.xlu0 %2066 }
0x1078   : > { %3861 = vmatpush3.msra.mxu0 %v2083_v27 }
0x1079   : > { %3862 = vmatprep.subr.mxu0 %v2135_v7 }
0x107a   : > { %3863 = vmatpush3.msra.mxu0 %v2081_v26 }
0x107b   : > { %3864 = vmatprep.subr.mxu0 %v2129_v15  ;;  %v2077_v37 = vpop.permute.xlu0 %2076 }
0x107c   : > { %3865 = vmatpush3.msra.mxu0 %v2077_v37 }
0x107d   : > { %3866 = vmatprep.subr.mxu0 %v2127_v8 }
0x107e   : > { %3867 = vmatpush3.msra.mxu0 %v2075_v40 }
0x107f   : > { %3868 = vmatprep.subr.mxu0 %v2121_v12  ;;  %v2069_v41 = vpop.permute.xlu0 %2068 }
0x1080   : > { %3869 = vmatpush3.msra.mxu0 %v2069_v41 }
0x1081   : > { %3870 = vmatprep.subr.mxu0 %v2119_v21 }
0x1082   : > { %3871 = vmatpush3.msra.mxu0 %v2067_v36 }
0x1083   : > { %3872 = vmatprep.subr.mxu0 %v2045_v48  ;;  %v2059_v45 = vpop.permute.xlu0 %2058 }
0x1084   : > { %3873 = vmatpush3.msra.mxu0 %v2061_v22 }
0x1085   : > { %3874 = vmatprep.subr.mxu0 %v2044_v50  ;;  %v2534_v50 = vld [vmem:[%s5811_s1 + $0x6c8] sm:$0xff] }
0x1086   : > { %3875 = vmatpush3.msra.mxu0 %v2059_v45  ;;  %v2433_v45 = vld [vmem:[%s5811_s1 + $0x1a0] sm:$0xff] }
0x1087   : > { %3876 = vmatprep.subr.mxu0 %v2113_v18  ;;  %v2111_v61 = vpop.permute.xlu0 %2110 }
0x1088   : > { %3877 = vmatpush3.msra.mxu0 %v2021_v55  ;;  %v2533_v55 = vld [vmem:[%s5811_s1 + $0x6c0] sm:$0xff] }
0x1089   : > { %3878 = vmatprep.subr.mxu0 %v2111_v61  ;;  %v2532_v61 = vld [vmem:[%s5811_s1 + $0x6b0] sm:$0xff] }
0x108a   : > { %3879 = vmatpush3.msra.mxu0 %v2020_v57  ;;  %v2531_v57 = vld [vmem:[%s5811_s1 + $0x6a8] sm:$0xff] }
0x108b   : > { %v2175_v59 = vpop.permute.xlu0 %2174  ;;  %2261 = vmatmul.mubr.f32.vlgmr.msra.gmra.mxu0 %v2182_v52  ;;  %2557 = vmatprep.subr.mxu0 %v2534_v50  ;;  %v2529_v52 = vld [vmem:[%s5811_s1 + $0x690] sm:$0xff] }
0x108c   : > { %3976 = vmatprep.subr.mxu1 %v2175_v59  ;;  %2265 = vmatprep.mubr.f32.mxu0 %v2186_v53  ;;  %v2528_v53 = vld [vmem:[%s5811_s1 + $0x680] sm:$0xff] }
0x108d   : > { %3977 = vmatpush3.msra.mxu1 %v2175_v59  ;;  %2558 = vmatpush1.msra.mxu0 %v2533_v55  ;;  %v2526_v59 = vld [vmem:[%s5811_s1 + $0x668] sm:$0xff] }
0x108e   : > { %3978 = vmatprep.subr.mxu1 %v2173_v60  ;;  %2559 = vmatprep.subr.mxu0 %v2532_v61 }
0x108f   : > { %3979 = vmatpush3.msra.mxu1 %v2173_v60  ;;  %v2171_v30 = vpop.permute.xlu0 %2170  ;;  %2266 = vmatmul.mubr.f32.gmra.mxu0 %v2185_v32  ;;  %v2527_v60 = vld [vmem:[%s5811_s1 + $0x678] sm:$0xff]  ;;  %v2525_v32 = vld [vmem:[%s5811_s1 + $0x660] sm:$0xff] }
0x1090   : > { %3980 = vmatprep.subr.mxu1 %v2171_v30  ;;  %2605 = vmatprep.mubr.f32.mxu0 %v4056_v47 }
0x1091   : > { %3981 = vmatpush3.msra.mxu1 %v2171_v30  ;;  %2560 = vmatpush1.msra.mxu0 %v2531_v57  ;;  %v2524_v30 = vld [vmem:[%s5811_s1 + $0x650] sm:$0xff] }
0x1092   : > { %3982 = vmatprep.subr.mxu1 %v2169_v62 }
0x1093   : > { %3983 = vmatpush3.msra.mxu1 %v2169_v62  ;;  %v2523_v62 = vld [vmem:[%s5811_s1 + $0x648] sm:$0xff] }
0x1094   : > { %3985 = vmatmul.mubr.msk.f32.vlgmr.msra.gmra.mxu1 %vm1392_vm4, %v2187_v1  ;;  %2442 = vmatprep.subr.mxu1 %v4056_v47  ;;  %v2522_v1 = vld [vmem:[%s5811_s1 + $0x638] sm:$0xff] }
0x1095   : > { %3667 = vmatprep.mubr.msk.f32.mxu1 %vm160_vm0, %v2433_v45 }
0x114b   : > { %v3880_v3 = vpop.f32.mrf.mxu0 }
0x114d   : > { %v3881_v63 = vpop.f32.mrf.mxu0 }
0x114e   : > { %v3882_v12 = vadd.f32 %v3881_v63, %v3880_v3 }
0x114f   : > { %v3883_v56 = vpop.f32.mrf.mxu0 }
0x1151   : > { %v3884_v7 = vpop.f32.mrf.mxu0 }
0x1152   : > { %v3885_v15 = vadd.f32 %v3884_v7, %v3883_v56 }
0x1154   : > { %v3986_v8 = vpop.f32.mrf.mxu1 }
0x1155   : > { %v2343_v21 = vadd.f32 %v3986_v8, %v3885_v15 }
0x1156   : > { %v2337_v22 = vpop.f32.mrf.mxu1 }
0x1157   : > { %v2347_v58 = vmax.f32 %v2343_v21, 0.0  ;;  %v2338_v18 = vadd.f32 %v3882_v12, %v2337_v22 }
0x1159   : > { %v2346_v26 = vmax.f32 %v2338_v18, 0.0  ;;  %2352 = vrot.lane.b32.xlu0 %v2347_v58, %s4059_s22 }
0x115b   : > { %2350 = vrot.lane.b32.xlu1 %v2346_v26, %s4059_s22 }
0x11cb   : > { %v2353_v44 = vpop.permute.xlu0 %2352 }
0x11cc   : > { %v2357_v2 = vsel %vm574_vm2, 0.0, %v2353_v44 }
0x11cd   : > { %v5142_v4 = vsel %vm355_vm15, %v2357_v2, 0.0  ;;  %v2351_v40 = vpop.permute.xlu1 %2350 }
0x11ce   : > { %v2356_v51 = vsel %vm574_vm2, 0.0, %v2351_v40  ;;  %2420 = vrot.lane.b32.xlu0 %v5142_v4, %s4049_s26  ;;  %v2369_v29 = vmul.f32 %v5142_v4, %v4405_v6  ;;  %v2367_v36 = vmul.f32 %v5142_v4, %v4403_v5  ;;  %v2361_v40 = vmul.f32 %v4977_v14, %v5142_v4 }
0x11cf   : > { %v5148_v27 = vsel %vm355_vm15, %v2356_v51, 0.0 }
0x11d0   : > { %2418 = vrot.lane.b32.xlu1 %v5148_v27, %s4049_s26  ;;  %v2368_v33 = vmul.f32 %v5148_v27, %v4405_v6  ;;  %v2366_v37 = vmul.f32 %v5148_v27, %v4403_v5  ;;  %v2365_v6 = vmul.f32 %v5142_v4, %v4411_v9  ;;  %v2364_v41 = vmul.f32 %v5148_v27, %v4411_v9 }
0x11d1   : > { %v2363_v5 = vmul.f32 %v5142_v4, %v4420_v16  ;;  %v2362_v48 = vmul.f32 %v5148_v27, %v4420_v16  ;;  %v2371_v9 = vmul.f32 %v5142_v4, %v4397_v0  ;;  %v2370_v16 = vmul.f32 %v5148_v27, %v4397_v0  ;;  %v2530_v0 = vld [vmem:[%s5811_s1 + $0x698] sm:$0xff] }
0x11d2   : > { %2414 = vrot.lane.b32.xlu0 %v2369_v29, %s4054_s30  ;;  %2561 = vmatprep.subr.mxu0 %v2530_v0  ;;  %v2360_v51 = vmul.f32 %v4977_v14, %v5148_v27  ;;  %v2435_v14 = vld [vmem:[%s5811_s1 + $0x1b8] sm:$0xff] }
0x11d3   : > { %2562 = vmatpush1.msra.mxu0 %v2529_v52 }
0x11d4   : > { %2412 = vrot.lane.b32.xlu1 %v2368_v33, %s4054_s30  ;;  %2563 = vmatprep.subr.mxu0 %v2528_v53 }
0x11d5   : > { %2564 = vmatpush1.msra.mxu0 %v2527_v60 }
0x11d6   : > { %2406 = vrot.lane.b32.xlu0 %v2367_v36, %s4061_s23  ;;  %2565 = vmatprep.subr.mxu0 %v2526_v59  ;;  %v2521_v36 = vld [vmem:[%s5811_s1 + $0x630] sm:$0xff] }
0x11d7   : > { %2566 = vmatpush1.msra.mxu0 %v2525_v32 }
0x11d8   : > { %2404 = vrot.lane.b32.xlu1 %v2366_v37, %s4061_s23  ;;  %2567 = vmatprep.subr.mxu0 %v2524_v30  ;;  %v2520_v37 = vld [vmem:[%s5811_s1 + $0x620] sm:$0xff] }
0x11d9   : > { %2568 = vmatpush1.msra.mxu0 %v2523_v62 }
0x11da   : > { %2398 = vrot.lane.b32.xlu0 %v5142_v4, %s4063_s12  ;;  %2569 = vmatprep.subr.mxu0 %v2522_v1 }
0x11db   : > { %2570 = vmatpush1.msra.mxu0 %v2521_v36 }
0x11dc   : > { %2396 = vrot.lane.b32.xlu1 %v5148_v27, %s4063_s12  ;;  %2571 = vmatprep.subr.mxu0 %v2520_v37 }
0x11de   : > { %2392 = vrot.lane.b32.xlu0 %v2365_v6, %s4062_s11  ;;  %v2519_v6 = vld [vmem:[%s5811_s1 + $0x618] sm:$0xff] }
0x11df   : > { %2572 = vmatpush1.msra.mxu0 %v2519_v6 }
0x11e0   : > { %2390 = vrot.lane.b32.xlu1 %v2364_v41, %s4062_s11 }
0x11e2   : > { %2384 = vrot.lane.b32.xlu0 %v2363_v5, %s4055_s3 }
0x11e4   : > { %2382 = vrot.lane.b32.xlu1 %v2362_v48, %s4055_s3 }
0x11e6   : > { %2376 = vrot.lane.b32.xlu0 %v5142_v4, %s4057_s4  ;;  %v2432_v4 = vld [vmem:[%s5811_s1 + $0x198] sm:$0xff] }
0x11e8   : > { %2374 = vrot.lane.b32.xlu1 %v5148_v27, %s4057_s4  ;;  %v2434_v27 = vld [vmem:[%s5811_s1 + $0x1b0] sm:$0xff] }
0x11ea   : > { %2428 = vrot.lane.b32.xlu0 %v2371_v9, %s4053_s29 }
0x11ec   : > { %2426 = vrot.lane.b32.xlu1 %v2370_v16, %s4053_s29 }
0x1240   : > { %v2421_v3 = vpop.permute.xlu0 %2420 }
0x1241   : > { %2443 = vmatpush1.msra.mxu1 %v2421_v3 }
0x1242   : > { %2444 = vmatprep.subr.mxu1 %v4056_v47  ;;  %v2419_v63 = vpop.permute.xlu1 %2418 }
0x1243   : > { %2445 = vmatpush1.msra.mxu1 %v2419_v63 }
0x1244   : > { %v2415_v56 = vpop.permute.xlu0 %2414  ;;  %2446 = vmatprep.subr.mxu1 %v4056_v47 }
0x1245   : > { %2447 = vmatpush1.msra.mxu1 %v2415_v56 }
0x1246   : > { %2448 = vmatprep.subr.mxu1 %v4056_v47  ;;  %v2413_v7 = vpop.permute.xlu1 %2412 }
0x1247   : > { %2449 = vmatpush1.msra.mxu1 %v2413_v7 }
0x1248   : > { %v2407_v15 = vpop.permute.xlu0 %2406  ;;  %2450 = vmatprep.subr.mxu1 %v4056_v47 }
0x1249   : > { %2451 = vmatpush1.msra.mxu1 %v2407_v15 }
0x124a   : > { %2452 = vmatprep.subr.mxu1 %v4056_v47  ;;  %v2405_v8 = vpop.permute.xlu1 %2404 }
0x124b   : > { %2453 = vmatpush1.msra.mxu1 %v2405_v8 }
0x124c   : > { %v2399_v12 = vpop.permute.xlu0 %2398  ;;  %2454 = vmatprep.subr.mxu1 %v4056_v47 }
0x124d   : > { %2455 = vmatpush1.msra.mxu1 %v2399_v12 }
0x124e   : > { %2456 = vmatprep.subr.mxu1 %v4056_v47  ;;  %v2397_v21 = vpop.permute.xlu1 %2396 }
0x124f   : > { %2457 = vmatpush1.msra.mxu1 %v2397_v21 }
0x1250   : > { %v2393_v22 = vpop.permute.xlu0 %2392  ;;  %2458 = vmatprep.subr.mxu1 %v4056_v47 }
0x1251   : > { %2459 = vmatpush1.msra.mxu1 %v2393_v22 }
0x1252   : > { %2460 = vmatprep.subr.mxu1 %v4056_v47  ;;  %v2391_v58 = vpop.permute.xlu1 %2390 }
0x1253   : > { %2461 = vmatpush1.msra.mxu1 %v2391_v58 }
0x1254   : > { %v2385_v18 = vpop.permute.xlu0 %2384  ;;  %2462 = vmatprep.subr.mxu1 %v4056_v47 }
0x1255   : > { %2463 = vmatpush1.msra.mxu1 %v2385_v18 }
0x1256   : > { %2464 = vmatprep.subr.mxu1 %v4056_v47  ;;  %v2383_v26 = vpop.permute.xlu1 %2382 }
0x1257   : > { %2465 = vmatpush1.msra.mxu1 %v2383_v26 }
0x1258   : > { %v2377_v44 = vpop.permute.xlu0 %2376  ;;  %2466 = vmatprep.subr.mxu1 %v4056_v47 }
0x1259   : > { %2467 = vmatpush1.msra.mxu1 %v2377_v44 }
0x125a   : > { %2468 = vmatprep.subr.mxu1 %v4056_v47  ;;  %v2375_v2 = vpop.permute.xlu1 %2374 }
0x125b   : > { %2469 = vmatpush1.msra.mxu1 %v2375_v2 }
0x125c   : > { %2470 = vmatprep.subr.mxu1 %v4056_v47  ;;  %v2429_v29 = vpop.permute.xlu0 %2428 }
0x125d   : > { %2471 = vmatpush1.msra.mxu1 %v2361_v40 }
0x125e   : > { %2472 = vmatprep.subr.mxu1 %v4056_v47  ;;  %v2427_v33 = vpop.permute.xlu1 %2426 }
0x125f   : > { %2473 = vmatpush1.msra.mxu1 %v2360_v51 }
0x1260   : > { %2500 = vmatprep.subr.mxu1 %v4056_v47 }
0x1261   : > { %3666 = vmatpush2.msk.msra.mxu1 %vm359_vm1, %v4050_v24 }
0x1262   : > { %2502 = vmatprep.subr.mxu1 %v4056_v47 }
0x1263   : > { %2503 = vmatpush2.msra.mxu1 %v2429_v29 }
0x1264   : > { %2504 = vmatprep.subr.mxu1 %v4056_v47 }
0x1265   : > { %2505 = vmatpush2.msra.mxu1 %v2427_v33 }
0x1266   : > { %2507 = vmatmul.mubr.f32.vlgmr.msra.gmra.mxu1 %v2432_v4 }
0x1267   : > { %3668 = vmatprep.mubr.msk.f32.mxu1 %vm160_vm0, %v2435_v14 }
0x126a   : > { %2512 = vmatmul.mubr.f32.gmra.mxu1 %v2434_v27 }
0x1326   : > { %v2508_v41 = vpop.f32.mrf.mxu1 }
0x1327   : > { %v2517_v5 = vmax.f32 %v2508_v41, 0.0 }
0x1328   : > { %v2510_v48 = vpop.f32.mrf.mxu1 }
0x1329   : > { %3669 = vmatmul.mubr.msk.f32.vlgmr.msra.gmra.mxu0 %vm886_vm3, %v2517_v5  ;;  %v2871_v48 = vld [vmem:[%s5811_s1 + $0x1d0] sm:$0xff] }
0x132a   : > { %v2513_v45 = vpop.f32.mrf.mxu1  ;;  %2611 = vmatprep.mubr.f32.mxu0 %v4056_v47 }
0x132b   : > { %v2518_v9 = vmax.f32 %v2513_v45, 0.0 }
0x132c   : > { %v2515_v16 = vpop.f32.mrf.mxu1 }
0x132d   : > { %3670 = vmatmul.mubr.msk.f32.gmra.mxu0 %vm886_vm3, %v2518_v9 }
0x132e   : > { %3673 = vmatprep.mubr.msk.f32.mxu0 %vm160_vm0, %v2871_v48 }
0x13e9   : > { %v2607_v50 = vpop.f32.mrf.mxu0 }
0x13ea   : > { %2622 = vrot.lane.b32.xlu0 %v2607_v50, %s4042_s17 }
0x13eb   : > { %v2609_v55 = vpop.f32.mrf.mxu0 }
0x13ec   : > { %2624 = vrot.lane.b32.xlu1 %v2609_v55, %s4042_s17 }
0x13ed   : > { %v2613_v61 = vpop.f32.mrf.mxu0 }
0x13ee   : > { %2626 = vrot.lane.b32.xlu0 %v2613_v61, %s4042_s17 }
0x13ef   : > { %v2615_v57 = vpop.f32.mrf.mxu0 }
0x13f0   : > { %2628 = vrot.lane.b32.xlu1 %v2615_v57, %s4042_s17 }
0x145c   : > { %v2623_v0 = vpop.permute.xlu0 %2622 }
0x145d   : > { %v5284_v52 = vsel %vm160_vm0, 0.0, %v2623_v0 }
0x145e   : > { %v2625_v53 = vpop.permute.xlu1 %2624  ;;  %2824 = vrot.lane.b32.xlu1 %v5284_v52, %s4048_s25  ;;  %v2664_v62 = vmul.f32 %v5284_v52, %v4144_v20  ;;  %v2658_v3 = vmul.f32 %v5284_v52, %v4160_v25  ;;  %v2652_v56 = vmul.f32 %v5284_v52, %v4176_v31  ;;  %v2646_v15 = vmul.f32 %v5284_v52, %v4210_v42 }
0x145f   : > { %v5289_v60 = vsel %vm160_vm0, %v2625_v53, 0.0  ;;  %v5298_v32 = vsel %vm160_vm0, %v2623_v0, %v2625_v53  ;;  %v2670_v50 = vmul.f32 %v5284_v52, %v4121_v13 }
0x1460   : > { %2828 = vrot.lane.b32.xlu0 %v5289_v60, %s4048_s25  ;;  %v2627_v59 = vpop.permute.xlu0 %2626  ;;  %v2666_v1 = vmul.f32 %v5289_v60, %v4142_v19  ;;  %v2660_v63 = vmul.f32 %v5289_v60, %v4154_v23  ;;  %v2654_v7 = vmul.f32 %v5289_v60, %v4170_v28  ;;  %v2648_v8 = vmul.f32 %v5289_v60, %v4184_v34 }
0x1461   : > { %v5303_v30 = vsel %vm160_vm0, 0.0, %v2627_v59  ;;  %v2665_v21 = vmul.f32 %v5298_v32, %v4198_v38  ;;  %v2659_v58 = vmul.f32 %v5298_v32, %v4202_v39  ;;  %v2653_v26 = vmul.f32 %v5298_v32, %v4215_v43 }
0x1462   : > { %2752 = vrot.lane.b32.xlu1 %v5284_v52, %s4049_s26  ;;  %v2629_v12 = vpop.permute.xlu1 %2628  ;;  %v2667_v18 = vmul.f32 %v5303_v30, %v4144_v20  ;;  %v2661_v44 = vmul.f32 %v5303_v30, %v4160_v25  ;;  %v2647_v2 = vmul.f32 %v5298_v32, %v4225_v46  ;;  %v2655_v51 = vmul.f32 %v5303_v30, %v4176_v31 }
0x1463   : > { %v5339_v22 = vsel %vm160_vm0, %v2627_v59, %v2629_v12  ;;  %v2641_v40 = vsel %vm160_vm0, %v2629_v12, 0.0  ;;  %v2649_v29 = vmul.f32 %v5303_v30, %v4210_v42  ;;  %v2671_v5 = vmul.f32 %v5298_v32, %v4188_v35 }
0x1464   : > { %2756 = vrot.lane.b32.xlu0 %v5289_v60, %s4049_s26  ;;  %v2669_v4 = vmul.f32 %v2641_v40, %v4142_v19  ;;  %v2663_v33 = vmul.f32 %v2641_v40, %v4154_v23  ;;  %v2668_v14 = vmul.f32 %v5339_v22, %v4198_v38  ;;  %v2662_v27 = vmul.f32 %v5339_v22, %v4202_v39 }
0x1465   : > { %v2657_v36 = vmul.f32 %v2641_v40, %v4170_v28  ;;  %v2651_v37 = vmul.f32 %v2641_v40, %v4184_v34  ;;  %v2656_v6 = vmul.f32 %v5339_v22, %v4215_v43  ;;  %v2650_v41 = vmul.f32 %v5339_v22, %v4225_v46 }
0x1466   : > { %2826 = vrot.lane.b32.xlu1 %v5298_v32, %s4048_s25  ;;  %v2673_v45 = vmul.f32 %v5303_v30, %v4121_v13  ;;  %v2675_v9 = vmul.f32 %v2641_v40, %v4129_v17  ;;  %v2674_v16 = vmul.f32 %v5339_v22, %v4188_v35  ;;  %v2672_v55 = vmul.f32 %v5289_v60, %v4129_v17 }
0x1468   : > { %2830 = vrot.lane.b32.xlu0 %v5303_v30, %s4048_s25 }
0x146a   : > { %2804 = vrot.lane.b32.xlu1 %v2664_v62, %s4052_s28 }
0x146c   : > { %2808 = vrot.lane.b32.xlu0 %v2666_v1, %s4052_s28 }
0x146e   : > { %2778 = vrot.lane.b32.xlu1 %v2658_v3, %s4053_s29 }
0x1470   : > { %2782 = vrot.lane.b32.xlu0 %v2660_v63, %s4053_s29 }
0x1472   : > { %2754 = vrot.lane.b32.xlu1 %v5298_v32, %s4049_s26 }
0x1474   : > { %2758 = vrot.lane.b32.xlu0 %v5303_v30, %s4049_s26 }
0x1476   : > { %2732 = vrot.lane.b32.xlu1 %v2652_v56, %s4054_s30 }
0x1478   : > { %2736 = vrot.lane.b32.xlu0 %v2654_v7, %s4054_s30 }
0x147a   : > { %2706 = vrot.lane.b32.xlu1 %v2646_v15, %s4055_s3 }
0x147c   : > { %2710 = vrot.lane.b32.xlu0 %v2648_v8, %s4055_s3 }
0x147e   : > { %2806 = vrot.lane.b32.xlu1 %v2665_v21, %s4052_s28 }
0x1480   : > { %2832 = vrot.lane.b32.xlu0 %v5339_v22, %s4048_s25 }
0x1482   : > { %2780 = vrot.lane.b32.xlu1 %v2659_v58, %s4053_s29 }
0x1484   : > { %2810 = vrot.lane.b32.xlu0 %v2667_v18, %s4052_s28 }
0x1486   : > { %2734 = vrot.lane.b32.xlu1 %v2653_v26, %s4054_s30 }
0x1488   : > { %2784 = vrot.lane.b32.xlu0 %v2661_v44, %s4053_s29 }
0x148a   : > { %2708 = vrot.lane.b32.xlu1 %v2647_v2, %s4055_s3 }
0x148c   : > { %2760 = vrot.lane.b32.xlu0 %v5339_v22, %s4049_s26 }
0x148e   : > { %2834 = vrot.lane.b32.xlu1 %v2641_v40, %s4048_s25 }
0x1490   : > { %2738 = vrot.lane.b32.xlu0 %v2655_v51, %s4054_s30 }
0x1492   : > { %2762 = vrot.lane.b32.xlu1 %v2641_v40, %s4049_s26 }
0x1494   : > { %2712 = vrot.lane.b32.xlu0 %v2649_v29, %s4055_s3 }
0x1496   : > { %2814 = vrot.lane.b32.xlu1 %v2669_v4, %s4052_s28 }
0x1498   : > { %2688 = vrot.lane.b32.xlu0 %v5339_v22, %s4057_s4 }
0x149a   : > { %2788 = vrot.lane.b32.xlu1 %v2663_v33, %s4053_s29 }
0x149c   : > { %2812 = vrot.lane.b32.xlu0 %v2668_v14, %s4052_s28 }
0x149e   : > { %2690 = vrot.lane.b32.xlu1 %v2641_v40, %s4057_s4 }
0x14a0   : > { %2786 = vrot.lane.b32.xlu0 %v2662_v27, %s4053_s29 }
0x14a2   : > { %2742 = vrot.lane.b32.xlu1 %v2657_v36, %s4054_s30 }
0x14a4   : > { %2686 = vrot.lane.b32.xlu0 %v5303_v30, %s4057_s4 }
0x14a6   : > { %2716 = vrot.lane.b32.xlu1 %v2651_v37, %s4055_s3 }
0x14a8   : > { %2740 = vrot.lane.b32.xlu0 %v2656_v6, %s4054_s30 }
0x14aa   : > { %2682 = vrot.lane.b32.xlu1 %v5298_v32, %s4057_s4 }
0x14ac   : > { %2714 = vrot.lane.b32.xlu0 %v2650_v41, %s4055_s3 }
0x14ae   : > { %2680 = vrot.lane.b32.xlu1 %v5284_v52, %s4057_s4 }
0x14b0   : > { %2684 = vrot.lane.b32.xlu0 %v5289_v60, %s4057_s4 }
0x14b2   : > { %2852 = vrot.lane.b32.xlu1 %v2671_v5, %s4051_s27 }
0x14b4   : > { %2856 = vrot.lane.b32.xlu0 %v2673_v45, %s4051_s27 }
0x14b6   : > { %2860 = vrot.lane.b32.xlu1 %v2675_v9, %s4051_s27 }
0x14b8   : > { %2858 = vrot.lane.b32.xlu0 %v2674_v16, %s4051_s27 }
0x14ba   : > { %2850 = vrot.lane.b32.xlu1 %v2670_v50, %s4051_s27 }
0x14bc   : > { %2854 = vrot.lane.b32.xlu0 %v2672_v55, %s4051_s27 }
0x14be   : > { %2977 = vrot.lane.b32.xlu1 %v4281_v54, %s4042_s17 }
0x14c0   : > { %2975 = vrot.lane.b32.xlu0 %v4267_v49, %s4042_s17 }
0x14d0   : > { %v2825_v61 = vpop.permute.xlu1 %2824 }
0x14d2   : > { %v2829_v57 = vpop.permute.xlu0 %2828 }
0x14d4   : > { %v5425_v0 = vpop.permute.xlu1 %2752 }
0x14d6   : > { %v5427_v53 = vpop.permute.xlu0 %2756 }
0x14d8   : > { %v2827_v59 = vpop.permute.xlu1 %2826 }
0x14d9   : > { %v2837_v14 = vsel %vm335_vm8, %v2827_v59, %v2829_v57  ;;  %v2836_v36 = vsel %vm335_vm8, %v2825_v61, %v2827_v59 }
0x14da   : > { %v2831_v62 = vpop.permute.xlu0 %2830 }
0x14dc   : > { %v2805_v1 = vpop.permute.xlu1 %2804 }
0x14de   : > { %v2809_v3 = vpop.permute.xlu0 %2808 }
0x14e0   : > { %v2779_v63 = vpop.permute.xlu1 %2778 }
0x14e2   : > { %v2783_v60 = vpop.permute.xlu0 %2782 }
0x14e4   : > { %v2755_v56 = vpop.permute.xlu1 %2754 }
0x14e6   : > { %v2759_v7 = vpop.permute.xlu0 %2758 }
0x14e8   : > { %v5429_v15 = vpop.permute.xlu1 %2732 }
0x14ea   : > { %v5431_v54 = vpop.permute.xlu0 %2736 }
0x14ec   : > { %v5433_v8 = vpop.permute.xlu1 %2706 }
0x14ee   : > { %v5435_v49 = vpop.permute.xlu0 %2710 }
0x14f0   : > { %v2807_v12 = vpop.permute.xlu1 %2806 }
0x14f1   : > { %v2817_v50 = vsel %vm324_vm9, %v2807_v12, %v2809_v3  ;;  %v2816_v57 = vsel %vm324_vm9, %v2805_v1, %v2807_v12  ;;  %v2765_v12 = vsel %vm296_vm11, %v2755_v56, %v5427_v53 }
0x14f2   : > { %v2833_v21 = vpop.permute.xlu0 %2832 }
0x14f3   : > { %v2838_v33 = vsel %vm335_vm8, %v2831_v62, %v2833_v21 }
0x14f4   : > { %v2781_v58 = vpop.permute.xlu1 %2780 }
0x14f6   : > { %v2811_v18 = vpop.permute.xlu0 %2810 }
0x14f8   : > { %v2735_v26 = vpop.permute.xlu1 %2734 }
0x14f9   : > { %v2744_v53 = vsel %vm285_vm12, %v5429_v15, %v2735_v26 }
0x14fa   : > { %v2785_v44 = vpop.permute.xlu0 %2784 }
0x14fc   : > { %v5437_v2 = vpop.permute.xlu1 %2708 }
0x14fe   : > { %v2761_v40 = vpop.permute.xlu0 %2760 }
0x14ff   : > { %v2766_v1 = vsel %vm296_vm11, %v2759_v7, %v2761_v40  ;;  %v2745_v7 = vsel %vm285_vm12, %v2735_v26, %v5431_v54  ;;  %v2718_v54 = vsel %vm271_vm13, %v5433_v8, %v5437_v2  ;;  %v2644_v8 = vmul.f32 %v5303_v30, %v4106_v10 }
0x1500   : > { %v2835_v51 = vpop.permute.xlu1 %2834 }
0x1501   : > { %v2839_v29 = vsel %vm335_vm8, %v2833_v21, %v2835_v51  ;;  %v2791_v21 = vsel %vm310_vm10, %v2781_v58, %v2783_v60  ;;  %v2790_v51 = vsel %vm310_vm10, %v2779_v63, %v2781_v58  ;;  %v2764_v60 = vsel %vm296_vm11, %v5425_v0, %v2755_v56 }
0x1502   : > { %v2739_v4 = vpop.permute.xlu0 %2738  ;;  %2875 = vmatprep.subr.mxu0 %v2839_v29 }
0x1503   : > { %2876 = vmatpush1.msra.mxu0 %v2838_v33 }
0x1504   : > { %2877 = vmatprep.subr.mxu0 %v2837_v14  ;;  %v2763_v27 = vpop.permute.xlu1 %2762 }
0x1505   : > { %2878 = vmatpush1.msra.mxu0 %v2836_v36  ;;  %v2767_v3 = vsel %vm296_vm11, %v2761_v40, %v2763_v27 }
0x1506   : > { %v2713_v37 = vpop.permute.xlu0 %2712 }
0x1508   : > { %v2815_v6 = vpop.permute.xlu1 %2814 }
0x150a   : > { %v2689_v41 = vpop.permute.xlu0 %2688 }
0x150c   : > { %v2789_v5 = vpop.permute.xlu1 %2788 }
0x150e   : > { %v2813_v48 = vpop.permute.xlu0 %2812 }
0x150f   : > { %v2819_v45 = vsel %vm324_vm9, %v2813_v48, %v2815_v6  ;;  %v2818_v9 = vsel %vm324_vm9, %v2811_v18, %v2813_v48  ;;  %v2642_v48 = vmul.f32 %v5284_v52, %v4106_v10  ;;  %v2870_v52 = vld [vmem:[%s5811_s1 + $0x1c8] sm:$0xff] }
0x1510   : > { %2879 = vmatprep.subr.mxu0 %v2819_v45  ;;  %v2691_v16 = vpop.permute.xlu1 %2690 }
0x1511   : > { %2880 = vmatpush1.msra.mxu0 %v2818_v9  ;;  %v2695_v15 = vsel %vm257_vm14, %v2689_v41, %v2691_v16 }
0x1512   : > { %v2787_v55 = vpop.permute.xlu0 %2786  ;;  %2881 = vmatprep.subr.mxu0 %v2817_v50 }
0x1513   : > { %v2792_v61 = vsel %vm310_vm10, %v2785_v44, %v2787_v55  ;;  %2882 = vmatpush1.msra.mxu0 %v2816_v57  ;;  %v2793_v59 = vsel %vm310_vm10, %v2787_v55, %v2789_v5 }
0x1514   : > { %2883 = vmatprep.subr.mxu0 %v2793_v59  ;;  %v2743_v62 = vpop.permute.xlu1 %2742 }
0x1515   : > { %2884 = vmatpush1.msra.mxu0 %v2792_v61 }
0x1516   : > { %v2687_v18 = vpop.permute.xlu0 %2686  ;;  %2885 = vmatprep.subr.mxu0 %v2791_v21 }
0x1517   : > { %2886 = vmatpush1.msra.mxu0 %v2790_v51  ;;  %v2694_v26 = vsel %vm257_vm14, %v2687_v18, %v2689_v41  ;;  %v2643_v41 = vmul.f32 %v5298_v32, %v4109_v11 }
0x1518   : > { %2887 = vmatprep.subr.mxu0 %v2767_v3  ;;  %v2717_v29 = vpop.permute.xlu1 %2716 }
0x1519   : > { %2888 = vmatpush1.msra.mxu0 %v2766_v1 }
0x151a   : > { %v2741_v44 = vpop.permute.xlu0 %2740  ;;  %2889 = vmatprep.subr.mxu0 %v2765_v12 }
0x151b   : > { %v2746_v33 = vsel %vm285_vm12, %v2739_v4, %v2741_v44  ;;  %2890 = vmatpush1.msra.mxu0 %v2764_v60  ;;  %v2747_v63 = vsel %vm285_vm12, %v2741_v44, %v2743_v62  ;;  %v2719_v4 = vsel %vm271_vm13, %v5437_v2, %v5435_v49  ;;  %v2645_v49 = vmul.f32 %v5339_v22, %v4109_v11 }
0x151c   : > { %2891 = vmatprep.subr.mxu0 %v2747_v63  ;;  %v2683_v58 = vpop.permute.xlu1 %2682 }
0x151d   : > { %2892 = vmatpush1.msra.mxu0 %v2746_v33 }
0x151e   : > { %v2715_v40 = vpop.permute.xlu0 %2714  ;;  %2893 = vmatprep.subr.mxu0 %v2745_v7 }
0x151f   : > { %v2720_v14 = vsel %vm271_vm13, %v2713_v37, %v2715_v40  ;;  %2894 = vmatpush1.msra.mxu0 %v2744_v53  ;;  %v2721_v0 = vsel %vm271_vm13, %v2715_v40, %v2717_v29 }
0x1520   : > { %2895 = vmatprep.subr.mxu0 %v2721_v0  ;;  %v2681_v56 = vpop.permute.xlu1 %2680 }
0x1521   : > { %2896 = vmatpush1.msra.mxu0 %v2720_v14  ;;  %v2692_v6 = vsel %vm257_vm14, %v2681_v56, %v2683_v58 }
0x1522   : > { %v2685_v27 = vpop.permute.xlu0 %2684  ;;  %2897 = vmatprep.subr.mxu0 %v2719_v4 }
0x1523   : > { %2898 = vmatpush1.msra.mxu0 %v2718_v54  ;;  %v2693_v37 = vsel %vm257_vm14, %v2683_v58, %v2685_v27 }
0x1524   : > { %2899 = vmatprep.subr.mxu0 %v2695_v15  ;;  %v2853_v36 = vpop.permute.xlu1 %2852 }
0x1525   : > { %2900 = vmatpush1.msra.mxu0 %v2694_v26 }
0x1526   : > { %v2857_v5 = vpop.permute.xlu0 %2856  ;;  %2901 = vmatprep.subr.mxu0 %v2693_v37 }
0x1527   : > { %2902 = vmatpush1.msra.mxu0 %v2692_v6 }
0x1528   : > { %2903 = vmatprep.subr.mxu0 %v2645_v49  ;;  %v2861_v2 = vpop.permute.xlu1 %2860 }
0x1529   : > { %2904 = vmatpush1.msra.mxu0 %v2644_v8 }
0x152a   : > { %v2859_v45 = vpop.permute.xlu0 %2858  ;;  %2905 = vmatprep.subr.mxu0 %v2643_v41 }
0x152b   : > { %2906 = vmatpush1.msra.mxu0 %v2642_v48  ;;  %v2865_v30 = vsel %vm349_vm7, %v2859_v45, %v2861_v2  ;;  %v2864_v9 = vsel %vm349_vm7, %v2857_v5, %v2859_v45 }
0x152c   : > { %3671 = vmatprep.subr.msk.mxu0 %vm359_vm1, %v4050_v24  ;;  %v2851_v22 = vpop.permute.xlu1 %2850 }
0x152d   : > { %3672 = vmatpush2.msk.msra.mxu0 %vm359_vm1, %v4050_v24  ;;  %v2862_v50 = vsel %vm349_vm7, %v2851_v22, %v2853_v36 }
0x152e   : > { %v2855_v16 = vpop.permute.xlu0 %2854  ;;  %2935 = vmatprep.subr.mxu0 %v2865_v30 }
0x152f   : > { %2936 = vmatpush2.msra.mxu0 %v2864_v9  ;;  %v2863_v32 = vsel %vm349_vm7, %v2853_v36, %v2855_v16 }
0x1530   : > { %2937 = vmatprep.subr.mxu0 %v2863_v32  ;;  %v2978_v55 = vpop.permute.xlu1 %2977 }
0x1531   : > { %v5495_v57 = vsel %vm160_vm0, %v2978_v55, 0.0  ;;  %2938 = vmatpush2.msra.mxu0 %v2862_v50 }
0x1532   : > { %v2976_v61 = vpop.permute.xlu0 %2975  ;;  %2940 = vmatmul.mubr.f32.vlgmr.msra.gmra.mxu0 %v2870_v52  ;;  %v3001_v59 = vmul.f32 %v5495_v57, %v4129_v17  ;;  %3677 = vmatprep.subr.msk.mxu0 %vm359_vm1, %v4050_v24  ;;  %v2998_v1 = vmul.f32 %v5495_v57, %v4142_v19  ;;  %v2995_v12 = vmul.f32 %v5495_v57, %v4154_v23 }
0x1533   : > { %v5500_v62 = vsel %vm160_vm0, %v2976_v61, %v2978_v55  ;;  %3480 = vmatprep.mubr.f32.mxu0 %v4056_v47  ;;  %v5509_v18 = vsel %vm160_vm0, 0.0, %v2976_v61  ;;  %3678 = vmatpush1.msk.msra.mxu0 %vm359_vm1, %v4050_v24  ;;  %v2992_v5 = vmul.f32 %v5495_v57, %v4170_v28  ;;  %v2989_v2 = vmul.f32 %v5495_v57, %v4184_v34 }
0x1534   : > { %3180 = vrot.lane.b32.xlu1 %v3001_v59, %s4057_s4  ;;  %v3000_v21 = vmul.f32 %v5500_v62, %v4188_v35  ;;  %v2997_v51 = vmul.f32 %v5500_v62, %v4198_v38  ;;  %v2999_v3 = vmul.f32 %v5509_v18, %v4121_v13  ;;  %v2996_v29 = vmul.f32 %v5509_v18, %v4144_v20 }
0x1535   : > { %v2994_v44 = vmul.f32 %v5500_v62, %v4202_v39  ;;  %v2993_v60 = vmul.f32 %v5509_v18, %v4160_v25  ;;  %v2991_v6 = vmul.f32 %v5500_v62, %v4215_v43  ;;  %v2990_v49 = vmul.f32 %v5509_v18, %v4176_v31 }
0x1536   : > { %3178 = vrot.lane.b32.xlu0 %v3000_v21, %s4057_s4  ;;  %v2988_v8 = vmul.f32 %v5500_v62, %v4225_v46  ;;  %v2987_v41 = vmul.f32 %v5509_v18, %v4210_v42 }
0x1538   : > { %3165 = vrot.lane.b32.xlu1 %v2997_v51, %s4052_s28 }
0x153a   : > { %3176 = vrot.lane.b32.xlu0 %v2999_v3, %s4057_s4 }
0x153c   : > { %3163 = vrot.lane.b32.xlu1 %v2996_v29, %s4052_s28 }
0x153e   : > { %3167 = vrot.lane.b32.xlu0 %v2998_v1, %s4052_s28 }
0x1540   : > { %3154 = vrot.lane.b32.xlu1 %v2995_v12, %s4053_s29 }
0x1542   : > { %3152 = vrot.lane.b32.xlu0 %v2994_v44, %s4053_s29 }
0x1544   : > { %3139 = vrot.lane.b32.xlu1 %v5500_v62, %s4049_s26 }
0x1546   : > { %3150 = vrot.lane.b32.xlu0 %v2993_v60, %s4053_s29 }
0x15a6   : > { %v5537_v33 = vpop.permute.xlu1 %3180 }
0x15a8   : > { %v5539_v63 = vpop.permute.xlu0 %3178 }
0x15aa   : > { %v3166_v58 = vpop.permute.xlu1 %3165 }
0x15ac   : > { %v3177_v7 = vpop.permute.xlu0 %3176 }
0x15ad   : > { %v5543_v40 = vsel %vm257_vm14, %v3177_v7, %v5539_v63 }
0x15ae   : > { %v3164_v53 = vpop.permute.xlu1 %3163 }
0x15af   : > { %v3169_v56 = vsel %vm324_vm9, %v3164_v53, %v3166_v58 }
0x15b0   : > { %v3168_v14 = vpop.permute.xlu0 %3167 }
0x15b1   : > { %v3170_v0 = vsel %vm324_vm9, %v3166_v58, %v3168_v14 }
0x15b2   : > { %3213 = vmatprep.subr.mxu1 %v3170_v0  ;;  %v3155_v4 = vpop.permute.xlu1 %3154 }
0x15b3   : > { %3214 = vmatpush1.msra.mxu1 %v3169_v56 }
0x15b4   : > { %v3153_v27 = vpop.permute.xlu0 %3152 }
0x15b5   : > { %v3157_v54 = vsel %vm310_vm10, %v3153_v27, %v3155_v4 }
0x15b6   : > { %3215 = vmatprep.subr.mxu1 %v3157_v54  ;;  %v3140_v48 = vpop.permute.xlu1 %3139 }
0x15b8   : > { %v3151_v15 = vpop.permute.xlu0 %3150 }
0x15b9   : > { %v3156_v26 = vsel %vm310_vm10, %v3151_v15, %v3153_v27 }
0x15ba   : > { %3216 = vmatpush1.msra.mxu1 %v3156_v26  ;;  %v2986_v26 = vmul.f32 %v5500_v62, %v4109_v11 }
0x15f2   : > { %v2941_v36 = vpop.f32.mrf.mxu0 }
0x15f3   : > { %2948 = vrot.lane.b32.xlu0 %v2941_v36, %s4042_s17  ;;  %v2985_v36 = vmul.f32 %v5509_v18, %v4106_v10 }
0x15f4   : > { %v2943_v37 = vpop.f32.mrf.mxu0 }
0x15f5   : > { %2950 = vrot.lane.b32.xlu1 %v2943_v37, %s4042_s17 }
0x15f7   : > { %3141 = vrot.lane.b32.xlu0 %v5495_v57, %s4049_s26 }
0x15f9   : > { %3137 = vrot.lane.b32.xlu1 %v5509_v18, %s4049_s26 }
0x15fb   : > { %3129 = vrot.lane.b32.xlu0 %v2991_v6, %s4054_s30 }
0x15fd   : > { %3131 = vrot.lane.b32.xlu1 %v2992_v5, %s4054_s30 }
0x15ff   : > { %3127 = vrot.lane.b32.xlu0 %v2990_v49, %s4054_s30 }
0x1601   : > { %3116 = vrot.lane.b32.xlu1 %v2988_v8, %s4055_s3 }
0x1603   : > { %3118 = vrot.lane.b32.xlu0 %v2989_v2, %s4055_s3 }
0x1605   : > { %3114 = vrot.lane.b32.xlu1 %v2987_v41, %s4055_s3 }
0x1607   : > { %3103 = vrot.lane.b32.xlu0 %v5500_v62, %s4057_s4 }
0x1609   : > { %3105 = vrot.lane.b32.xlu1 %v5495_v57, %s4057_s4 }
0x160b   : > { %3101 = vrot.lane.b32.xlu0 %v5509_v18, %s4057_s4 }
0x160d   : > { %3196 = vrot.lane.b32.xlu1 %v4050_v24, %s4048_s25 }
0x1665   : > { %v2949_v45 = vpop.permute.xlu0 %2948 }
0x1666   : > { %v5582_v22 = vsel %vm160_vm0, 0.0, %v2949_v45 }
0x1667   : > { %v2951_v30 = vpop.permute.xlu1 %2950  ;;  %3076 = vrot.lane.b32.xlu0 %v5582_v22, %s4048_s25  ;;  %3040 = vrot.lane.b32.xlu1 %v5582_v22, %s4049_s26  ;;  %v2972_v32 = vmul.f32 %v5582_v22, %v4121_v13  ;;  %v2966_v29 = vmul.f32 %v5582_v22, %v4160_v25  ;;  %v2969_v12 = vmul.f32 %v5582_v22, %v4144_v20 }
0x1668   : > { %v5596_v61 = vsel %vm160_vm0, %v2949_v45, %v2951_v30  ;;  %v2957_v59 = vsel %vm160_vm0, %v2951_v30, 0.0  ;;  %v2963_v0 = vmul.f32 %v5582_v22, %v4176_v31  ;;  %v2960_v56 = vmul.f32 %v5582_v22, %v4210_v42 }
0x1669   : > { %v3142_v9 = vpop.permute.xlu0 %3141  ;;  %v2974_v37 = vmul.f32 %v2957_v59, %v4129_v17  ;;  %v2973_v6 = vmul.f32 %v5596_v61, %v4188_v35  ;;  %v2971_v5 = vmul.f32 %v2957_v59, %v4142_v19  ;;  %v2970_v49 = vmul.f32 %v5596_v61, %v4198_v38 }
0x166a   : > { %v3144_v16 = vsel %vm296_vm11, %v3140_v48, %v3142_v9  ;;  %v2967_v8 = vmul.f32 %v5596_v61, %v4202_v39  ;;  %v2968_v2 = vmul.f32 %v2957_v59, %v4154_v23  ;;  %v2964_v41 = vmul.f32 %v5596_v61, %v4215_v43  ;;  %v3207_v9 = vld [vmem:[%s5811_s1 + $0x1e8] sm:$0xff] }
0x166b   : > { %v3138_v52 = vpop.permute.xlu1 %3137  ;;  %3217 = vmatprep.subr.mxu1 %v3144_v16  ;;  %3004 = vrot.lane.b32.xlu0 %v5582_v22, %s4057_s4  ;;  %v2962_v45 = vmul.f32 %v2957_v59, %v4184_v34  ;;  %v2961_v30 = vmul.f32 %v5596_v61, %v4225_v46  ;;  %v3183_v16 = vsel %vm257_vm14, %v5539_v63, %v5537_v33 }
0x166c   : > { %v3143_v50 = vsel %vm296_vm11, %v3138_v52, %v3140_v48  ;;  %3089 = vrot.lane.b32.xlu1 %v2972_v32, %s4051_s27  ;;  %v2965_v48 = vmul.f32 %v2957_v59, %v4170_v28  ;;  %3676 = vmatprep.mubr.msk.f32.mxu1 %vm160_vm0, %v3207_v9 }
0x166d   : > { %3218 = vmatpush1.msra.mxu1 %v3143_v50  ;;  %v3130_v55 = vpop.permute.xlu0 %3129 }
0x166f   : > { %v3132_v21 = vpop.permute.xlu1 %3131  ;;  %3078 = vrot.lane.b32.xlu0 %v5596_v61, %s4048_s25 }
0x1670   : > { %3080 = vrot.lane.b32.xlu1 %v2957_v59, %s4048_s25  ;;  %v3134_v51 = vsel %vm285_vm12, %v3130_v55, %v3132_v21 }
0x1671   : > { %3219 = vmatprep.subr.mxu1 %v3134_v51  ;;  %v3128_v3 = vpop.permute.xlu0 %3127 }
0x1672   : > { %v3133_v1 = vsel %vm285_vm12, %v3128_v3, %v3130_v55 }
0x1673   : > { %3053 = vrot.lane.b32.xlu0 %v2966_v29, %s4053_s29  ;;  %3220 = vmatpush1.msra.mxu1 %v3133_v1  ;;  %v3117_v44 = vpop.permute.xlu1 %3116 }
0x1674   : > { %3066 = vrot.lane.b32.xlu1 %v2969_v12, %s4052_s28 }
0x1675   : > { %v3119_v60 = vpop.permute.xlu0 %3118 }
0x1676   : > { %v3121_v58 = vsel %vm271_vm13, %v3117_v44, %v3119_v60 }
0x1677   : > { %3044 = vrot.lane.b32.xlu0 %v2957_v59, %s4049_s26  ;;  %3221 = vmatprep.subr.mxu1 %v3121_v58  ;;  %v3115_v7 = vpop.permute.xlu1 %3114 }
0x1678   : > { %3042 = vrot.lane.b32.xlu1 %v5596_v61, %s4049_s26  ;;  %v3120_v53 = vsel %vm271_vm13, %v3115_v7, %v3117_v44 }
0x1679   : > { %v3104_v14 = vpop.permute.xlu0 %3103  ;;  %3222 = vmatpush1.msra.mxu1 %v3120_v53 }
0x167b   : > { %3030 = vrot.lane.b32.xlu0 %v2963_v0, %s4054_s30  ;;  %v3106_v4 = vpop.permute.xlu1 %3105 }
0x167c   : > { %3017 = vrot.lane.b32.xlu1 %v2960_v56, %s4055_s3  ;;  %v3108_v27 = vsel %vm257_vm14, %v3104_v14, %v3106_v4 }
0x167d   : > { %v3102_v54 = vpop.permute.xlu0 %3101  ;;  %3223 = vmatprep.subr.mxu1 %v3108_v27 }
0x167e   : > { %v3107_v15 = vsel %vm257_vm14, %v3102_v54, %v3104_v14 }
0x167f   : > { %3006 = vrot.lane.b32.xlu0 %v5596_v61, %s4057_s4  ;;  %3224 = vmatpush1.msra.mxu1 %v3107_v15  ;;  %v5673_v32 = vpop.permute.xlu1 %3196 }
0x1680   : > { %3008 = vrot.lane.b32.xlu1 %v2957_v59, %s4057_s4  ;;  %3225 = vmatprep.subr.mxu1 %v2986_v26 }
0x1681   : > { %3226 = vmatpush1.msra.mxu1 %v2985_v36 }
0x1683   : > { %3093 = vrot.lane.b32.xlu0 %v2974_v37, %s4051_s27 }
0x1684   : > { %3091 = vrot.lane.b32.xlu1 %v2973_v6, %s4051_s27 }
0x1687   : > { %3070 = vrot.lane.b32.xlu0 %v2971_v5, %s4052_s28 }
0x1688   : > { %3068 = vrot.lane.b32.xlu1 %v2970_v49, %s4052_s28 }
0x168b   : > { %3055 = vrot.lane.b32.xlu0 %v2967_v8, %s4053_s29 }
0x168c   : > { %3057 = vrot.lane.b32.xlu1 %v2968_v2, %s4053_s29 }
0x168f   : > { %3032 = vrot.lane.b32.xlu0 %v2964_v41, %s4054_s30 }
0x1690   : > { %3034 = vrot.lane.b32.xlu1 %v2965_v48, %s4054_s30 }
0x1693   : > { %3021 = vrot.lane.b32.xlu0 %v2962_v45, %s4055_s3 }
0x1694   : > { %3019 = vrot.lane.b32.xlu1 %v2961_v30, %s4055_s3 }
0x1697   : > { %3192 = vrot.lane.b32.xlu0 %v3183_v16, %s4048_s25 }
0x1698   : > { %3194 = vrot.lane.b32.xlu1 %v5537_v33, %s4048_s25 }
0x169b   : > { %3190 = vrot.lane.b32.xlu0 %v5543_v40, %s4048_s25 }
0x169c   : > { %3186 = vrot.lane.b32.xlu1 %v5500_v62, %s4048_s25 }
0x169f   : > { %3188 = vrot.lane.b32.xlu0 %v5495_v57, %s4048_s25 }
0x16a0   : > { %3184 = vrot.lane.b32.xlu1 %v5509_v18, %s4048_s25 }
0x16d9   : > { %v3077_v63 = vpop.permute.xlu0 %3076  ;;  %v3041_v52 = vpop.permute.xlu1 %3040 }
0x16dd   : > { %v3005_v50 = vpop.permute.xlu0 %3004 }
0x16de   : > { %v3090_v55 = vpop.permute.xlu1 %3089 }
0x16e1   : > { %v3079_v59 = vpop.permute.xlu0 %3078 }
0x16e2   : > { %v3081_v33 = vpop.permute.xlu1 %3080  ;;  %v3082_v53 = vsel %vm335_vm8, %v3077_v63, %v3079_v59  ;;  %v2959_v63 = vmul.f32 %v5596_v61, %v4109_v11 }
0x16e3   : > { %v3083_v7 = vsel %vm335_vm8, %v3079_v59, %v3081_v33 }
0x16e5   : > { %v3054_v21 = vpop.permute.xlu0 %3053 }
0x16e6   : > { %v3067_v51 = vpop.permute.xlu1 %3066 }
0x16e9   : > { %v3045_v40 = vpop.permute.xlu0 %3044 }
0x16ea   : > { %v3043_v3 = vpop.permute.xlu1 %3042 }
0x16eb   : > { %v3047_v36 = vsel %vm296_vm11, %v3043_v3, %v3045_v40  ;;  %v3046_v37 = vsel %vm296_vm11, %v3041_v52, %v3043_v3  ;;  %v2958_v52 = vmul.f32 %v5582_v22, %v4106_v10 }
0x16ed   : > { %v3031_v29 = vpop.permute.xlu0 %3030 }
0x16ee   : > { %v3018_v62 = vpop.permute.xlu1 %3017 }
0x16f1   : > { %v3007_v1 = vpop.permute.xlu0 %3006 }
0x16f2   : > { %v3009_v12 = vpop.permute.xlu1 %3008  ;;  %v3010_v9 = vsel %vm257_vm14, %v3005_v50, %v3007_v1 }
0x16f3   : > { %v3011_v30 = vsel %vm257_vm14, %v3007_v1, %v3009_v12 }
0x16f5   : > { %v3094_v57 = vpop.permute.xlu0 %3093 }
0x16f6   : > { %v3092_v44 = vpop.permute.xlu1 %3091 }
0x16f7   : > { %v3095_v18 = vsel %vm349_vm7, %v3090_v55, %v3092_v44  ;;  %v3096_v60 = vsel %vm349_vm7, %v3092_v44, %v3094_v57 }
0x16f8   : > { %3227 = vmatprep.subr.mxu1 %v3096_v60 }
0x16f9   : > { %3228 = vmatpush1.msra.mxu1 %v3095_v18  ;;  %v3071_v58 = vpop.permute.xlu0 %3070 }
0x16fa   : > { %v3069_v14 = vpop.permute.xlu1 %3068  ;;  %3229 = vmatprep.subr.mxu1 %v3083_v7 }
0x16fb   : > { %v3072_v0 = vsel %vm324_vm9, %v3067_v51, %v3069_v14  ;;  %3230 = vmatpush1.msra.mxu1 %v3082_v53  ;;  %v3073_v56 = vsel %vm324_vm9, %v3069_v14, %v3071_v58  ;;  %v3206_v51 = vld [vmem:[%s5811_s1 + $0x1e0] sm:$0xff] }
0x16fc   : > { %3231 = vmatprep.subr.mxu1 %v3073_v56 }
0x16fd   : > { %3232 = vmatpush1.msra.mxu1 %v3072_v0  ;;  %v3056_v4 = vpop.permute.xlu0 %3055 }
0x16fe   : > { %v3059_v27 = vsel %vm310_vm10, %v3054_v21, %v3056_v4  ;;  %v3058_v54 = vpop.permute.xlu1 %3057 }
0x16ff   : > { %v3060_v15 = vsel %vm310_vm10, %v3056_v4, %v3058_v54 }
0x1700   : > { %3233 = vmatprep.subr.mxu1 %v3060_v15 }
0x1701   : > { %3234 = vmatpush1.msra.mxu1 %v3059_v27  ;;  %v3033_v26 = vpop.permute.xlu0 %3032 }
0x1702   : > { %v3036_v6 = vsel %vm285_vm12, %v3031_v29, %v3033_v26  ;;  %v3035_v5 = vpop.permute.xlu1 %3034  ;;  %3235 = vmatprep.subr.mxu1 %v3047_v36 }
0x1703   : > { %3236 = vmatpush1.msra.mxu1 %v3046_v37  ;;  %v3037_v49 = vsel %vm285_vm12, %v3033_v26, %v3035_v5 }
0x1704   : > { %3237 = vmatprep.subr.mxu1 %v3037_v49 }
0x1705   : > { %3238 = vmatpush1.msra.mxu1 %v3036_v6  ;;  %v3022_v8 = vpop.permute.xlu0 %3021 }
0x1706   : > { %v3020_v2 = vpop.permute.xlu1 %3019 }
0x1707   : > { %v3023_v41 = vsel %vm271_vm13, %v3018_v62, %v3020_v2  ;;  %v3024_v48 = vsel %vm271_vm13, %v3020_v2, %v3022_v8 }
0x1708   : > { %3239 = vmatprep.subr.mxu1 %v3024_v48 }
0x1709   : > { %3240 = vmatpush1.msra.mxu1 %v3023_v41  ;;  %v3193_v45 = vpop.permute.xlu0 %3192 }
0x170a   : > { %v3195_v16 = vpop.permute.xlu1 %3194  ;;  %3241 = vmatprep.subr.mxu1 %v3011_v30 }
0x170b   : > { %3242 = vmatpush1.msra.mxu1 %v3010_v9  ;;  %v3201_v50 = vsel %vm335_vm8, %v3193_v45, %v3195_v16 }
0x170c   : > { %3243 = vmatprep.subr.mxu1 %v2959_v63 }
0x170d   : > { %3244 = vmatpush1.msra.mxu1 %v2958_v52  ;;  %v3191_v55 = vpop.permute.xlu0 %3190 }
0x170e   : > { %v3200_v59 = vsel %vm335_vm8, %v3191_v55, %v3193_v45  ;;  %v3187_v33 = vpop.permute.xlu1 %3186  ;;  %3674 = vmatprep.subr.msk.mxu1 %vm359_vm1, %v5673_v32 }
0x170f   : > { %3675 = vmatpush2.msk.msra.mxu1 %vm359_vm1, %v5673_v32 }
0x1710   : > { %3273 = vmatprep.subr.mxu1 %v3201_v50 }
0x1711   : > { %3274 = vmatpush2.msra.mxu1 %v3200_v59  ;;  %v3189_v61 = vpop.permute.xlu0 %3188 }
0x1712   : > { %v3185_v21 = vpop.permute.xlu1 %3184  ;;  %v3199_v22 = vsel %vm335_vm8, %v3187_v33, %v3189_v61 }
0x1713   : > { %v3198_v40 = vsel %vm335_vm8, %v3185_v21, %v3187_v33  ;;  %3275 = vmatprep.subr.mxu1 %v3199_v22 }
0x1714   : > { %3276 = vmatpush2.msra.mxu1 %v3198_v40 }
0x1715   : > { %3278 = vmatmul.mubr.f32.vlgmr.msra.gmra.mxu1 %v3206_v51  ;;  %3680 = vmatprep.subr.msk.mxu1 %vm359_vm1, %v4050_v24 }
0x1716   : > { %3681 = vmatpush1.msk.msra.mxu1 %vm359_vm1, %v4050_v24  ;;  %3557 = vmatprep.mubr.f32.mxu1 %v4056_v47 }
0x17d5   : > { %v3279_v32 = vpop.f32.mrf.mxu1 }
0x17d6   : > { %v3284_v3 = vmax.f32 %v3279_v32, 0.0 }
0x17d7   : > { %v3281_v29 = vpop.f32.mrf.mxu1 }
0x17d8   : > { %v3285_v62 = vmax.f32 %v3281_v29, 0.0  ;;  %3288 = vrot.lane.b32.xlu0 %v3284_v3, %s4042_s17 }
0x17da   : > { %3290 = vrot.lane.b32.xlu1 %v3285_v62, %s4042_s17 }
0x184a   : > { %v3289_v1 = vpop.permute.xlu0 %3288 }
0x184b   : > { %v5714_v12 = vsel %vm160_vm0, 0.0, %v3289_v1 }
0x184c   : > { %3353 = vrot.lane.b32.xlu0 %v5714_v12, %s4049_s26  ;;  %3389 = vrot.lane.b32.xlu1 %v5714_v12, %s4048_s25  ;;  %v3291_v24 = vpop.permute.xlu1 %3290  ;;  %v3312_v47 = vmul.f32 %v5714_v12, %v4121_v13  ;;  %v3306_v44 = vmul.f32 %v5714_v12, %v4160_v25  ;;  %v3309_v13 = vmul.f32 %v5714_v12, %v4144_v20 }
0x184d   : > { %v5723_v57 = vsel %vm160_vm0, %v3289_v1, %v3291_v24  ;;  %v3297_v18 = vsel %vm160_vm0, %v3291_v24, 0.0  ;;  %v3303_v60 = vmul.f32 %v5714_v12, %v4176_v31  ;;  %v3300_v25 = vmul.f32 %v5714_v12, %v4210_v42  ;;  %v3412_v1 = vld [vmem:[%s5811_s1 + $0x1f8] sm:$0xff] }
0x184e   : > { %v3314_v20 = vmul.f32 %v3297_v18, %v4129_v17  ;;  %v3313_v58 = vmul.f32 %v5723_v57, %v4188_v35  ;;  %v3311_v31 = vmul.f32 %v3297_v18, %v4142_v19  ;;  %v3310_v7 = vmul.f32 %v5723_v57, %v4198_v38 }
0x184f   : > { %v3308_v42 = vmul.f32 %v3297_v18, %v4154_v23  ;;  %v3307_v17 = vmul.f32 %v5723_v57, %v4202_v39  ;;  %v3305_v35 = vmul.f32 %v3297_v18, %v4170_v28  ;;  %v3304_v19 = vmul.f32 %v5723_v57, %v4215_v43 }
0x1850   : > { %3402 = vrot.lane.b32.xlu0 %v3312_v47, %s4051_s27  ;;  %3391 = vrot.lane.b32.xlu1 %v5723_v57, %s4048_s25  ;;  %v3302_v38 = vmul.f32 %v3297_v18, %v4184_v34  ;;  %v3301_v23 = vmul.f32 %v5723_v57, %v4225_v46  ;;  %v3299_v29 = vmul.f32 %v5723_v57, %v4109_v11  ;;  %v3489_v11 = vld [vmem:[%s5811_s1 + $0x210] sm:$0x7] }
0x1851   : > { %v3298_v62 = vmul.f32 %v5714_v12, %v4106_v10 }
0x1854   : > { %3393 = vrot.lane.b32.xlu0 %v3297_v18, %s4048_s25  ;;  %3366 = vrot.lane.b32.xlu1 %v3306_v44, %s4053_s29 }
0x1858   : > { %3379 = vrot.lane.b32.xlu0 %v3309_v13, %s4052_s28  ;;  %3357 = vrot.lane.b32.xlu1 %v3297_v18, %s4049_s26 }
0x185c   : > { %3355 = vrot.lane.b32.xlu0 %v5723_v57, %s4049_s26  ;;  %3343 = vrot.lane.b32.xlu1 %v3303_v60, %s4054_s30 }
0x1860   : > { %3330 = vrot.lane.b32.xlu0 %v3300_v25, %s4055_s3  ;;  %3319 = vrot.lane.b32.xlu1 %v5723_v57, %s4057_s4 }
0x1864   : > { %3406 = vrot.lane.b32.xlu1 %v3314_v20, %s4051_s27  ;;  %3404 = vrot.lane.b32.xlu0 %v3313_v58, %s4051_s27 }
0x1868   : > { %3383 = vrot.lane.b32.xlu1 %v3311_v31, %s4052_s28  ;;  %3381 = vrot.lane.b32.xlu0 %v3310_v7, %s4052_s28  ;;  %s3686_s28 = sshll.u32 %s5814_s10, 3 }
0x186c   : > { %3370 = vrot.lane.b32.xlu0 %v3308_v42, %s4053_s29  ;;  %3368 = vrot.lane.b32.xlu1 %v3307_v17, %s4053_s29 }
0x1870   : > { %3347 = vrot.lane.b32.xlu0 %v3305_v35, %s4054_s30  ;;  %3345 = vrot.lane.b32.xlu1 %v3304_v19, %s4054_s30 }
0x1874   : > { %3334 = vrot.lane.b32.xlu1 %v3302_v38, %s4055_s3  ;;  %3332 = vrot.lane.b32.xlu0 %v3301_v23, %s4055_s3  ;;  %s143_s3 = scalar_lea.vmem %s5812_s2, %s3686_s28 }
0x1878   : > { %3317 = vrot.lane.b32.xlu1 %v5714_v12, %s4057_s4  ;;  %3321 = vrot.lane.b32.xlu0 %v3297_v18, %s4057_s4 }
0x18be   : > { %v3354_v28 = vpop.permute.xlu0 %3353  ;;  %v3390_v39 = vpop.permute.xlu1 %3389 }
0x18c2   : > { %v3403_v43 = vpop.permute.xlu0 %3402  ;;  %v3392_v53 = vpop.permute.xlu1 %3391 }
0x18c3   : > { %v3395_v5 = vsel %vm335_vm8, %v3390_v39, %v3392_v53 }
0x18c6   : > { %v3394_v14 = vpop.permute.xlu0 %3393  ;;  %v3367_v0 = vpop.permute.xlu1 %3366 }
0x18c7   : > { %v3396_v6 = vsel %vm335_vm8, %v3392_v53, %v3394_v14 }
0x18ca   : > { %v3380_v56 = vpop.permute.xlu0 %3379  ;;  %v3358_v34 = vpop.permute.xlu1 %3357 }
0x18ce   : > { %v3356_v4 = vpop.permute.xlu0 %3355  ;;  %v3344_v27 = vpop.permute.xlu1 %3343 }
0x18cf   : > { %v3360_v16 = vsel %vm296_vm11, %v3356_v4, %v3358_v34  ;;  %v3359_v63 = vsel %vm296_vm11, %v3354_v28, %v3356_v4 }
0x18d2   : > { %v3331_v46 = vpop.permute.xlu0 %3330  ;;  %v3320_v54 = vpop.permute.xlu1 %3319 }
0x18d6   : > { %v3405_v15 = vpop.permute.xlu0 %3404  ;;  %v3407_v26 = vpop.permute.xlu1 %3406 }
0x18d7   : > { %v3408_v36 = vsel %vm349_vm7, %v3403_v43, %v3405_v15  ;;  %v3409_v37 = vsel %vm349_vm7, %v3405_v15, %v3407_v26 }
0x18d8   : > { %3430 = vmatprep.subr.mxu0 %v3409_v37 }
0x18d9   : > { %3431 = vmatpush1.msra.mxu0 %v3408_v36 }
0x18da   : > { %v3382_v49 = vpop.permute.xlu0 %3381  ;;  %3432 = vmatprep.subr.mxu0 %v3396_v6  ;;  %v3384_v8 = vpop.permute.xlu1 %3383 }
0x18db   : > { %v3385_v2 = vsel %vm324_vm9, %v3380_v56, %v3382_v49  ;;  %3433 = vmatpush1.msra.mxu0 %v3395_v5  ;;  %v3386_v41 = vsel %vm324_vm9, %v3382_v49, %v3384_v8 }
0x18dc   : > { %3434 = vmatprep.subr.mxu0 %v3386_v41 }
0x18dd   : > { %3435 = vmatpush1.msra.mxu0 %v3385_v2 }
0x18de   : > { %v3371_v48 = vpop.permute.xlu0 %3370  ;;  %v3369_v45 = vpop.permute.xlu1 %3368 }
0x18df   : > { %v3372_v30 = vsel %vm310_vm10, %v3367_v0, %v3369_v45  ;;  %v3373_v9 = vsel %vm310_vm10, %v3369_v45, %v3371_v48 }
0x18e0   : > { %3436 = vmatprep.subr.mxu0 %v3373_v9 }
0x18e1   : > { %3437 = vmatpush1.msra.mxu0 %v3372_v30 }
0x18e2   : > { %v3348_v52 = vpop.permute.xlu0 %3347  ;;  %3438 = vmatprep.subr.mxu0 %v3360_v16  ;;  %v3346_v55 = vpop.permute.xlu1 %3345 }
0x18e3   : > { %v3349_v59 = vsel %vm285_vm12, %v3344_v27, %v3346_v55  ;;  %3439 = vmatpush1.msra.mxu0 %v3359_v63  ;;  %v3350_v33 = vsel %vm285_vm12, %v3346_v55, %v3348_v52 }
0x18e4   : > { %3440 = vmatprep.subr.mxu0 %v3350_v33 }
0x18e5   : > { %3441 = vmatpush1.msra.mxu0 %v3349_v59 }
0x18e6   : > { %v3333_v50 = vpop.permute.xlu0 %3332  ;;  %v3335_v61 = vpop.permute.xlu1 %3334 }
0x18e7   : > { %v3336_v21 = vsel %vm271_vm13, %v3331_v46, %v3333_v50  ;;  %v3337_v22 = vsel %vm271_vm13, %v3333_v50, %v3335_v61 }
0x18e8   : > { %3442 = vmatprep.subr.mxu0 %v3337_v22 }
0x18e9   : > { %3443 = vmatpush1.msra.mxu0 %v3336_v21 }
0x18ea   : > { %v3322_v51 = vpop.permute.xlu0 %3321  ;;  %v3318_v40 = vpop.permute.xlu1 %3317 }
0x18eb   : > { %v3323_v32 = vsel %vm257_vm14, %v3318_v40, %v3320_v54  ;;  %v3324_v3 = vsel %vm257_vm14, %v3320_v54, %v3322_v51 }
0x18ec   : > { %3444 = vmatprep.subr.mxu0 %v3324_v3 }
0x18ed   : > { %3445 = vmatpush1.msra.mxu0 %v3323_v32 }
0x18ee   : > { %3446 = vmatprep.subr.mxu0 %v3299_v29 }
0x18ef   : > { %3447 = vmatpush1.msra.mxu0 %v3298_v62 }
0x18f0   : > { %3679 = vmatmul.mubr.msk.f32.vlgmr.msra.gmra.mxu0 %vm355_vm15, %v3412_v1 }
0x19b0   : > { %v3482_v24 = vpop.f32.mrf.mxu0 }
0x19b1   : > { %v3487_v18 = vmax.f32 %v3482_v24, 0.0 }
0x19b2   : > { %v3484_v47 = vpop.f32.mrf.mxu0 }
0x19b3   : > { %v3488_v44 = vmax.f32 %v3484_v47, 0.0 }
0x19b5   : > { %3523 = vmatprep.subr.mxu1 %v3488_v44 }
0x19b6   : > { %3524 = vmatpush1.msra.mxu1 %v3487_v18 }
0x19b7   : > { %3682 = vmatmul.mubr.msk.f32.vlgmr.msra.gmra.mxu1 %vm574_vm2, %v3489_v11 }
0x1a77   : > { %v3559_v10 = vpop.f32.mrf.mxu1 }
0x1a79   : > { %v3561_v12 = vpop.f32.mrf.mxu1 }
0x1a7a   : > { %v3566_v57 = vcombine.low %v3559_v10, %v3561_v12 }
0x1a7c   : > { %3568 = vst [vmem:[%s143_s3] sm:$0x77] %v3566_v57 }
0x1a7d PF: > { %s12_s9 = sadd.s32 1, %s4040_s9  }
0x1a7e   : > { %p9_p4 = scmp.ge.s32.totalorder %s12_s9, 4  }
0x1a80   :  { %11 = sbr.rel (!%p9_p4) target bundleno = 1 (0x1), region = 60 }

</bundles_post_ra>
